<compile_context>
chip_gen: v7x
topology: tpu7x:2x2x1
jax: 0.10.0
libtpu: 0.0.40
codegen_flags: <defaults>
</compile_context>

<pallas_src>
import jax
import jax.numpy as jnp
from jax.experimental import pallas as pl
from jax.experimental.pallas import tpu as pltpu


def _round_up(x, m):
    return ((x + m - 1) // m) * m


def _disc_kernel(pos_ref, neg_ref, ctx_ref, scal_ref, out_ref):
    """Scores one tile of nodes.

    pos_ref  : (TILE_N, D)       positive stream (projected h_pl, or raw h_pl)
    neg_ref  : (K, TILE_N, D)    gathered negative streams
    ctx_ref  : (TILE_N, D)       per-node context (raw h_c, or projected h_c)
    scal_ref : (1, 3) f32 SMEM   [bilinear bias b, s_bias1, s_bias2]
    out_ref  : (K+1, TILE_N) f32 row 0 = positive scores, rows 1..K = negatives
    """
    b = scal_ref[0, 0]
    sb1 = scal_ref[0, 1]
    sb2 = scal_ref[0, 2]
    num_neg = neg_ref.shape[0]

    ctx = ctx_ref[...].astype(jnp.float32)                   # (T, D)
    pos = pos_ref[...].astype(jnp.float32)                   # (T, D)
    neg = neg_ref[...].astype(jnp.float32)                   # (K, T, D)

    # Per-node dot products: VPU multiply + XLU lane reduce (no MXU needed,
    # the weight was already folded in on the XLA side).
    s_pos = jnp.sum(pos * ctx, axis=-1) + b                  # (T,)
    s_neg = jnp.sum(neg * ctx[None, :, :], axis=-1) + b      # (K, T)

    # Direct row stores (no per-row concat); post-sigmoid scalar biases fused.
    out_ref[pl.ds(0, 1), :] = (jax.nn.sigmoid(s_pos) + sb1)[None, :]
    out_ref[pl.ds(1, num_neg), :] = jax.nn.sigmoid(s_neg) + sb2


def discriminator_forward(h_c, h_pl, sample_list, weight, bias,
                          s_bias1=None, s_bias2=None, *,
                          tile_n=2048, compute_dtype=jnp.bfloat16):
    """JAX/Pallas equivalent of Discriminator.forward.

    h_c        : (1, N, n_h2)
    h_pl       : (1, N, n_h1)
    sample_list: K index arrays of length N (negative-sample row shuffles)
    weight     : (n_h1, n_h2) or raw nn.Bilinear weight (1, n_h1, n_h2)
    bias       : () float  (bilinear bias, added BEFORE the sigmoid)
    s_bias1/2  : optional biases added AFTER the sigmoid (module semantics);
                 scalars are fused into the kernel epilogue.
    Returns (sc_1: (1, N), sc_2: (K, N)).
    """
    assert h_pl.shape[0] == 1 and h_c.shape[0] == 1
    _, n, n_h1 = h_pl.shape
    n_h2 = h_c.shape[2]
    if weight.ndim == 3:                      # raw nn.Bilinear weight (1, n_h1, n_h2)
        weight = weight[0]
    samples = jnp.stack([jnp.asarray(s, dtype=jnp.int32) for s in sample_list], axis=0)
    num_neg = samples.shape[0]
    assert num_neg >= 1

    # Apply W once in XLA on the side that keeps the (K+1)-replicated gathered
    # stream as narrow as possible (shrinks gather + kernel traffic by
    # min(n_h1,n_h2)/max(n_h1,n_h2)).
    if n_h2 <= n_h1:
        # stream = h_pl @ W : (N, n_h2);  context = h_c
        stream = jnp.dot(h_pl[0].astype(compute_dtype), weight.astype(compute_dtype),
                         preferred_element_type=jnp.float32).astype(compute_dtype)
        ctx = h_c[0].astype(compute_dtype)
    else:
        # stream = h_pl : (N, n_h1);      context = h_c @ W^T
        stream = h_pl[0].astype(compute_dtype)
        ctx = jnp.dot(h_c[0].astype(compute_dtype), weight.T.astype(compute_dtype),
                      preferred_element_type=jnp.float32).astype(compute_dtype)
    d = stream.shape[1]

    # Data-dependent per-node row gather stays in plain JAX, AFTER the cast to
    # compute_dtype so the dominant (K, N, d) stream moves at half width in the
    # bf16 default.  No concat with the positive stream, no pad copy.
    neg = jnp.take(stream, samples, axis=0)                  # (K, N, d)

    # Optional post-sigmoid biases: scalars fused via SMEM; non-scalar
    # (broadcast tensors) fall back to a post-call add.
    def _split(sb):
        if sb is None:
            return jnp.float32(0.0), None
        sb = jnp.asarray(sb, jnp.float32)
        if sb.size == 1:
            return sb.reshape(()), None
        return jnp.float32(0.0), sb
    sb1_f, sb1_post = _split(s_bias1)
    sb2_f, sb2_post = _split(s_bias2)
    scal = jnp.stack([jnp.asarray(bias, jnp.float32).reshape(()), sb1_f, sb2_f]).reshape(1, 3)

    # Node-axis tiling: multiples of 128 keep the (K+1, TILE_N) output stores
    # lane-dense; cap the tile so the grid has >= 2 steps (v7x megacore split).
    tile = min(_round_up(tile_n, 128), _round_up(n, 128))
    tile = max(128, min(tile, _round_up(pl.cdiv(n, 2), 128)))
    grid = (pl.cdiv(n, tile),)

    scores = pl.pallas_call(
        _disc_kernel,
        out_shape=jax.ShapeDtypeStruct((num_neg + 1, n), jnp.float32),
        grid=grid,
        in_specs=[
            pl.BlockSpec((tile, d), lambda i: (i, 0)),               # positive stream
            pl.BlockSpec((num_neg, tile, d), lambda i: (0, i, 0)),   # gathered negatives
            pl.BlockSpec((tile, d), lambda i: (i, 0)),               # context
            pl.BlockSpec(memory_space=pltpu.MemorySpace.SMEM),       # [b, s_bias1, s_bias2]
        ],
        out_specs=pl.BlockSpec((num_neg + 1, tile), lambda i: (0, i)),
        compiler_params=pltpu.CompilerParams(
            dimension_semantics=("parallel",),   # node tiles split across TCs on v7x
        ),
    )(stream, neg, ctx, scal)

    sc_1 = scores[0:1]                    # (1, N)  positive scores
    sc_2 = scores[1:]                     # (K, N)  negative scores
    if sb1_post is not None:              # non-scalar post-sigmoid biases (rare)
        sc_1 = sc_1 + sb1_post
    if sb2_post is not None:
        sc_2 = sc_2 + sb2_post
    return sc_1, sc_2


def _reference_forward(h_c, h_pl, sample_list, weight, bias):
    """Pure-JAX mirror of the PyTorch bilinear discriminator (for verification)."""
    hp = h_pl[0]
    hc = h_c[0]
    sc1 = jax.nn.sigmoid(jnp.sum((hp @ weight) * hc, axis=-1) + bias)[None, :]
    sc2_rows = []
    for s in sample_list:
        hm = hp[jnp.asarray(s, jnp.int32)]
        sc2_rows.append(jax.nn.sigmoid(jnp.sum((hm @ weight) * hc, axis=-1) + bias))
    sc2 = jnp.stack(sc2_rows, axis=0)
    return sc1, sc2


if __name__ == "__main__":
    key = jax.random.PRNGKey(0)

    def make_case(k, n_nodes, n_h1, n_h2, n_samples):
        k_w, k_c, k_pl, k_s = jax.random.split(k, 4)
        # Deterministic Xavier-uniform init of the (1, n_h1, n_h2) bilinear weight, bias = 0.
        fan_in, fan_out = n_h1 * n_h2, 1 * n_h2
        bound = (6.0 / (fan_in + fan_out)) ** 0.5
        weight = jax.random.uniform(k_w, (n_h1, n_h2), jnp.float32, -bound, bound)
        bias = jnp.float32(0.0)
        h_c = jax.random.normal(k_c, (1, n_nodes, n_h2), jnp.float32)
        h_pl = jax.random.normal(k_pl, (1, n_nodes, n_h1), jnp.float32)
        sample_list = [
            jax.random.permutation(jax.random.fold_in(k_s, i), n_nodes).astype(jnp.int32)
            for i in range(n_samples)
        ]
        return h_c, h_pl, sample_list, weight, bias

    # Case 1: n_h2 < n_h1 -> project h_pl @ W; N=300 not tile aligned (ragged edge, 2-step grid).
    n_nodes, n_h1, n_h2, n_samples = 300, 64, 48, 4
    h_c, h_pl, sample_list, weight, bias = make_case(key, n_nodes, n_h1, n_h2, n_samples)
    ref_1, ref_2 = _reference_forward(h_c, h_pl, sample_list, weight, bias)

    # f32 compute path.
    sc_1, sc_2 = discriminator_forward(h_c, h_pl, sample_list, weight, bias,
                                       compute_dtype=jnp.float32)
    jax.block_until_ready((sc_1, sc_2))
    assert sc_1.shape == (1, n_nodes) and sc_2.shape == (n_samples, n_nodes)
    assert jnp.allclose(sc_1, ref_1, atol=1e-3, rtol=1e-3)
    assert jnp.allclose(sc_2, ref_2, atol=1e-3, rtol=1e-3)

    # Default bf16 path (halved HBM traffic on the dominant gathered stream).
    sc_1b, sc_2b = discriminator_forward(h_c, h_pl, sample_list, weight, bias)
    jax.block_until_ready((sc_1b, sc_2b))
    assert jnp.allclose(sc_1b, ref_1, atol=2e-2, rtol=2e-2)
    assert jnp.allclose(sc_2b, ref_2, atol=2e-2, rtol=2e-2)

    # Small explicit tile -> 3-step grid exercising the masked ragged last block.
    sc_1t, sc_2t = discriminator_forward(h_c, h_pl, sample_list, weight, bias,
                                         tile_n=128, compute_dtype=jnp.float32)
    jax.block_until_ready((sc_1t, sc_2t))
    assert jnp.allclose(sc_1t, ref_1, atol=1e-3, rtol=1e-3)
    assert jnp.allclose(sc_2t, ref_2, atol=1e-3, rtol=1e-3)

    # Optional post-sigmoid scalar biases (fused into the kernel epilogue via SMEM).
    sc_1c, sc_2c = discriminator_forward(h_c, h_pl, sample_list, weight, bias,
                                         s_bias1=jnp.float32(0.1),
                                         s_bias2=jnp.float32(-0.05),
                                         compute_dtype=jnp.float32)
    jax.block_until_ready((sc_1c, sc_2c))
    assert jnp.allclose(sc_1c, ref_1 + 0.1, atol=1e-3, rtol=1e-3)
    assert jnp.allclose(sc_2c, ref_2 - 0.05, atol=1e-3, rtol=1e-3)

    # Case 2: n_h2 > n_h1 -> the other projection branch (context side projected).
    h_c2, h_pl2, sl2, w2, b2 = make_case(jax.random.fold_in(key, 7), 260, 32, 80, 3)
    r1, r2 = _reference_forward(h_c2, h_pl2, sl2, w2, b2)
    o1, o2 = discriminator_forward(h_c2, h_pl2, sl2, w2, b2, compute_dtype=jnp.float32)
    jax.block_until_ready((o1, o2))
    assert o1.shape == (1, 260) and o2.shape == (3, 260)
    assert jnp.allclose(o1, r1, atol=1e-3, rtol=1e-3)
    assert jnp.allclose(o2, r2, atol=1e-3, rtol=1e-3)

    print("KERNEL_OK")
</pallas_src>

<mosaic_0001>
module attributes {stable_mosaic.version = 11 : i64} {
  func.func @_disc_kernel(%arg0: i32, %arg1: memref<256x48xf32, #tpu.memory_space<vmem>>, %arg2: memref<4x256x48xf32, #tpu.memory_space<vmem>>, %arg3: memref<256x48xf32, #tpu.memory_space<vmem>>, %arg4: memref<1x3xf32, #tpu.memory_space<smem>>, %arg5: memref<5x256xf32, #tpu.memory_space<vmem>>) attributes {dimension_semantics = [#tpu.dimension_semantics<parallel>], iteration_bounds = array<i64: 2>, scalar_prefetch = 0 : i64, scratch_operands = 0 : i64, tpu.core_type = #tpu.core_type<tc>, window_params = [{transform_indices = @transform_0, window_bounds = array<i64: 256, 48>}, {transform_indices = @transform_1, window_bounds = array<i64: 4, 256, 48>}, {transform_indices = @transform_2, window_bounds = array<i64: 256, 48>}, {transform_indices = @transform_3, window_bounds = array<i64: 1, 3>}, {transform_indices = @transform_4, window_bounds = array<i64: 5, 256>}]} {
    %c0 = arith.constant 0 : index
    %c0_0 = arith.constant 0 : index
    %0 = memref.load %arg4[%c0, %c0_0] : memref<1x3xf32, #tpu.memory_space<smem>>
    %c0_1 = arith.constant 0 : index
    %c1 = arith.constant 1 : index
    %1 = memref.load %arg4[%c0_1, %c1] : memref<1x3xf32, #tpu.memory_space<smem>>
    %c0_2 = arith.constant 0 : index
    %c2 = arith.constant 2 : index
    %2 = memref.load %arg4[%c0_2, %c2] : memref<1x3xf32, #tpu.memory_space<smem>>
    %c0_3 = arith.constant 0 : index
    %c0_4 = arith.constant 0 : index
    %3 = vector.load %arg3[%c0_3, %c0_4] : memref<256x48xf32, #tpu.memory_space<vmem>>, vector<256x48xf32>
    %c0_5 = arith.constant 0 : index
    %c0_6 = arith.constant 0 : index
    %4 = vector.load %arg1[%c0_5, %c0_6] : memref<256x48xf32, #tpu.memory_space<vmem>>, vector<256x48xf32>
    %c0_7 = arith.constant 0 : index
    %c0_8 = arith.constant 0 : index
    %c0_9 = arith.constant 0 : index
    %5 = vector.load %arg2[%c0_7, %c0_8, %c0_9] : memref<4x256x48xf32, #tpu.memory_space<vmem>>, vector<4x256x48xf32>
    %6 = arith.mulf %4, %3 : vector<256x48xf32>
    %cst = arith.constant dense<0.000000e+00> : vector<256xf32>
    %7 = vector.multi_reduction <add>, %6, %cst [1] : vector<256x48xf32> to vector<256xf32>
    %8 = vector.broadcast %0 : f32 to vector<256xf32>
    %9 = arith.addf %7, %8 : vector<256xf32>
    %10 = vector.shape_cast %3 : vector<256x48xf32> to vector<1x256x48xf32>
    %11 = vector.broadcast %10 : vector<1x256x48xf32> to vector<4x256x48xf32>
    %12 = arith.mulf %5, %11 : vector<4x256x48xf32>
    %cst_10 = arith.constant dense<0.000000e+00> : vector<4x256xf32>
    %13 = vector.multi_reduction <add>, %12, %cst_10 [2] : vector<4x256x48xf32> to vector<4x256xf32>
    %14 = vector.broadcast %0 : f32 to vector<4x256xf32>
    %15 = arith.addf %13, %14 : vector<4x256xf32>
    %16 = arith.negf %9 : vector<256xf32>
    %17 = math.exp %16 : vector<256xf32>
    %cst_11 = arith.constant 1.000000e+00 : f32
    %18 = vector.broadcast %cst_11 : f32 to vector<256xf32>
    %19 = arith.addf %18, %17 : vector<256xf32>
    %20 = arith.divf %18, %19 : vector<256xf32>
    %21 = vector.broadcast %1 : f32 to vector<256xf32>
    %22 = arith.addf %20, %21 : vector<256xf32>
    %23 = vector.shape_cast %22 : vector<256xf32> to vector<1x256xf32>
    %c0_12 = arith.constant 0 : index
    %c0_13 = arith.constant 0 : index
    %24 = vector.load %arg5[%c0_12, %c0_13] : memref<5x256xf32, #tpu.memory_space<vmem>>, vector<1x256xf32>
    tpu.vector_store %arg5[%c0_12, %c0_13], %23 {strides = array<i32>} : memref<5x256xf32, #tpu.memory_space<vmem>>, vector<1x256xf32>,
    %25 = arith.negf %15 : vector<4x256xf32>
    %26 = math.exp %25 : vector<4x256xf32>
    %cst_14 = arith.constant 1.000000e+00 : f32
    %27 = vector.broadcast %cst_14 : f32 to vector<4x256xf32>
    %28 = arith.addf %27, %26 : vector<4x256xf32>
    %29 = arith.divf %27, %28 : vector<4x256xf32>
    %30 = vector.broadcast %2 : f32 to vector<4x256xf32>
    %31 = arith.addf %29, %30 : vector<4x256xf32>
    %c1_15 = arith.constant 1 : index
    %c0_16 = arith.constant 0 : index
    %32 = vector.load %arg5[%c1_15, %c0_16] : memref<5x256xf32, #tpu.memory_space<vmem>>, vector<4x256xf32>
    tpu.vector_store %arg5[%c1_15, %c0_16], %31 {strides = array<i32>} : memref<5x256xf32, #tpu.memory_space<vmem>>, vector<4x256xf32>,
    return
  }
  func.func @transform_0(%arg0: i32) -> (i32, i32) {
    %c0_i32 = arith.constant 0 : i32
    %c0_i32_0 = arith.constant 0 : i32
    return %arg0, %c0_i32 : i32, i32
  }
  func.func @transform_1(%arg0: i32) -> (i32, i32, i32) {
    %c0_i32 = arith.constant 0 : i32
    %c0_i32_0 = arith.constant 0 : i32
    %c0_i32_1 = arith.constant 0 : i32
    return %c0_i32, %arg0, %c0_i32_0 : i32, i32, i32
  }
  func.func @transform_2(%arg0: i32) -> (i32, i32) {
    %c0_i32 = arith.constant 0 : i32
    %c0_i32_0 = arith.constant 0 : i32
    return %arg0, %c0_i32 : i32, i32
  }
  func.func @transform_3(%arg0: i32) -> (i32, i32) {
    %c0_i32 = arith.constant 0 : i32
    %c0_i32_0 = arith.constant 0 : i32
    %c0_i32_1 = arith.constant 0 : i32
    return %c0_i32, %c0_i32_0 : i32, i32
  }
  func.func @transform_4(%arg0: i32) -> (i32, i32) {
    %c0_i32 = arith.constant 0 : i32
    %c0_i32_0 = arith.constant 0 : i32
    return %c0_i32, %arg0 : i32, i32
  }
}

</mosaic_0001>

<bundles_post_ra>
// kernel: tpu_custom_call.1
= control target key start
LH: loop header
LB: loop body
LE: loop exit
PB: predicated region body
PF: predicated region fallthrough
CT: control target
= control target key end

     0   :  { %9 = vsyncpa [#allocation5], 0  ;;  %s11040_s0 = inlined_call_operand.vmem [shape: f32[300,48], index: 0, kind: input, shape index: {}]   ;;  %s11041_s1 = inlined_call_operand.vmem [shape: f32[4,300,48], index: 1, kind: input, shape index: {}]   ;;  %s11042_s2 = inlined_call_operand.vmem [shape: f32[300,48], index: 2, kind: input, shape index: {}]   ;;  %s11043_s3 = inlined_call_operand.vmem [shape: f32[1,3], index: 3, kind: input, shape index: {}]   ;;  %s11044_s4 = inlined_call_operand.hbm [shape: f32[5,300], index: 4, kind: output, shape index: {}]  }
   0x1   :  { %10 = vsyncpa [#allocation4], 0 }
   0x2   :  { %12 = vsyncpa [#allocation4 + $0x1], 0  ;;  %s7838_s15 = smov 0   ;;  %s7840_s16 = smov 0  }
   0x3   :  { %s7842_s17 = smov 0   ;;  %s7844_s18 = smov 0  }
   0x4 LB: > { %s7859_s19 = sadd.s32 4294967295, %s7775_s18   ;;  %s6671_s20 = sadd.s32 4294967294, %s7775_s18   ;;  %s7775_s18 = sphi %s7844_s18, %s11385_s18   ;;  %s7771_s17 = sphi %s7842_s17, %s11384_s17   ;;  %s7767_s16 = sphi %s7840_s16, %s11383_s16   ;;  %s7763_s15 = sphi %s7838_s15, %s11382_s15  }
   0x5   : > { %s7863_s21 = sadd.s32 1, %s7775_s18   ;;  %s51_s22 = sadd.s32 1, %s7771_s17 }
   0x6   : > { %s48_s23 = ssub.s32 %s7775_s18, %s7863_s21  ;;  %p58_p0 = scmp.ne.s32.totalorder %s7771_s17, %s7767_s16 }
   0x7   : > { %p49_p1 = scmp.eq.s32.totalorder %s48_s23, 0  ;;  %p59_p2 = scmp.eq.s32.totalorder %s7775_s18, 0 }
   0x8   : > { %p135_p3 = scmp.eq.s32.totalorder %s7859_s19, 1  ;;  %p140_p4 = scmp.ne.s32.totalorder %s7767_s16, %s7763_s15 }
   0x9   : > { %s7875_s24 = scalar_select %p49_p1, %s7771_s17, %s51_s22  }
   0xa   : > { %p7877_p5 = por %p59_p2, %p58_p0  ;;  %p7881_p6 = por %p135_p3, %p58_p0 }
   0xb   : > { %p141_p7 = scmp.eq.s32.totalorder %s6671_s20, 1  ;;  %p6672_p8 = scmp.ge.s32.totalorder %s7775_s18, 1 }
   0xc   : > { %s11120_s26 = scalar_select %p7881_p6, 1, 0 }
   0xd   : > { %p148_p9 = scmp.lt.s32.totalorder %s7775_s18, 3  ;;  %p7887_p10 = por %p141_p7, %p140_p4 }
   0xe   : > { %p6886_p11 = scmp.eq.s32.totalorder %s7859_s19, 0  ;;  %s161_s5 = sshll.u32 %s11043_s3, 4  ;;  %s162_s5 = int_to_ptr.vmem [resolvable:$true] %s161_s5 }
   0xf   : > { %s11121_s27 = scalar_select %p7887_p10, 1, 0 }
  0x10   : > { %p7892_p12 = pnand %p6672_p8, %p148_p9  ;;  %s7662_s6 = scalar_lea.vmem %s162_s5, 16 }
  0x11   : > { %p7663_p1 = scmp.ne.s32.totalorder %s162_s5, %s7662_s6  ;;  %p7670_p7 = scmp.lt.s32.totalorder %s162_s5, %s162_s5 }
  0x12   : > { %p6878_p13 = pneg %p7892_p12  ;;  %p7671_p8 = scmp.lt.s32.totalorder %s7662_s6, %s7662_s6 }
  0x14   : > { %p6879_p0 = pnand %p6886_p11, %p6878_p13  ;;  %p7672_p9 = por %p7671_p8, %p7670_p7 }
  0x16   : > { %p7664_p2 = pneg %p6879_p0 }
  0x18   : > { %p7665_p3 = pnand %p7664_p2, %p7663_p1 }
  0x1a   : > { %p7666_p4 = pneg %p7665_p3 }
  0x1c   : > { %p7673_p10 = pnand %p7672_p9, %p7666_p4 }
  0x1e   : > { %7676 = shalt.err (!%p7673_p10)
}
  0x1f   : > { %s7809_s7 = smov [#allocation3]   ;;  %p6674_p6 = scmp.ge.s32.totalorder %s7775_s18, 2 }
  0x20   : > { %6881 = dma.vmem_to_smem (!%p6879_p0), %s162_s5, 16, %s7809_s7, [#allocation5]  }
  0x21   : > { %168 = sbr.rel (%p6674_p6) target bundleno = 119 (0x77), region = 20 }
  0x28   : > { %188 = sbr.rel (!%p7877_p5) target bundleno = 119 (0x77), region = 28  ;;  %s190_s8 = sand.u32 (%p7877_p5), 1, %s7771_s17  }
  0x29   : > { %s6676_s9 = sshll.u32 (%p7877_p5), %s7775_s18, 5  ;;  %s6675_s10 = sshll.u32 (%p7877_p5), %s190_s8, 10 }
  0x2a   : > { %s194_s11 = ssub.s32 (%p7877_p5), 38, %s6676_s9  ;;  %s6869_s12 = sshll.u32 (%p7877_p5), %s7775_s18, 8 }
  0x2b   : > { %p195_p13 = scmp.lt.s32.totalorder (%p7877_p5), %s194_s11, 32  ;;  %s7916_s20 = scalar_lea.vmem (%p7877_p5), %s11041_s1, %s6869_s12  }
  0x2c   : > { %s7919_s23 = scalar_lea.vmem (%p7877_p5), [#allocation2], %s6675_s10  }
  0x2f   : > { %s11387_s11 = smov (!%p195_p13, %s194_s11), 32 }
  0x30   : > { %s6677_s22 = sshll.u32 %s11387_s11, 9 }
  0x31   : > { %p6680_p5 = scmp.eq.s32.totalorder %s6677_s22, 0 }
  0x32   : > { %s7922_s25 = sshrl.u32 (!%p6680_p5), %s11387_s11, 4 }
  0x33   : > { %203 = sbr.rel (%p6680_p5) target bundleno = 119 (0x77), region = 32  ;;  %p6681_p10 = scmp.le.s32.totalorder (!%p6680_p5), %s7922_s25, 0 }
  0x3a   : > { %6606 = sbr.rel (%p6681_p10) target bundleno = 98 (0x62), region = 141  ;;  %s11123_s29 = smov (!%p6681_p10), %s7919_s23 }
  0x3b   : > { %s11124_s30 = smov (!%p6681_p10), %s7916_s20  ;;  %s7931_s5 = smov (!%p6681_p10), 0  }
  0x3c   : > { %s7933_s6 = smov (!%p6681_p10), 0  }
  0x41 LB: >> { %v397_v0 = vld [vmem:[%s7783_s30] sm:$0xff]  ;;  %v399_v1 = vld [vmem:[%s7783_s30 + $0x8] sm:$0xff]  ;;  %v401_v2 = vld [vmem:[%s7783_s30 + $0x10] sm:$0xff]  ;;  %s525_s7 = sadd.s32 1, %s7787_s5  ;;  %s391_s6 = sadd.s32 1, %s7791_s6   ;;  %s7791_s6 = sphi %s7933_s6, %s391_s6   ;;  %s7787_s5 = sphi %s7931_s5, %s11127_s5   ;;  %s7783_s30 = sphi %s11124_s30, %s11126_s30   ;;  %s7779_s29 = sphi %s11123_s29, %s11125_s29  }
  0x42   : >> { %398 = vst [vmem:[%s7779_s29] sm:$0xff] %v397_v0  ;;  %400 = vst [vmem:[%s7779_s29 + $0x8] sm:$0xff] %v399_v1  ;;  %v403_v3 = vld [vmem:[%s7783_s30 + $0x18] sm:$0xff]  ;;  %v405_v4 = vld [vmem:[%s7783_s30 + $0x20] sm:$0xff]  ;;  %p526_p0 = scmp.ge.s32.totalorder %s525_s7, %s7922_s25  ;;  %p390_p1 = scmp.ge.s32.totalorder %s391_s6, %s7922_s25 }
  0x43   : >> { %402 = vst [vmem:[%s7779_s29 + $0x10] sm:$0xff] %v401_v2  ;;  %v407_v5 = vld [vmem:[%s7783_s30 + $0x28] sm:$0xff]  ;;  %404 = vst [vmem:[%s7779_s29 + $0x18] sm:$0xff] %v403_v3  ;;  %v409_v6 = vld [vmem:[%s7783_s30 + $0x30] sm:$0xff] }
  0x44   : >> { %406 = vst [vmem:[%s7779_s29 + $0x20] sm:$0xff] %v405_v4  ;;  %408 = vst [vmem:[%s7779_s29 + $0x28] sm:$0xff] %v407_v5  ;;  %v411_v7 = vld [vmem:[%s7783_s30 + $0x38] sm:$0xff]  ;;  %v413_v8 = vld [vmem:[%s7783_s30 + $0x40] sm:$0xff]  ;;  %s11389_s7 = smov (%p526_p0, %s525_s7), 0 }
  0x45   : >> { %410 = vst [vmem:[%s7779_s29 + $0x30] sm:$0xff] %v409_v6  ;;  %412 = vst [vmem:[%s7779_s29 + $0x38] sm:$0xff] %v411_v7  ;;  %v415_v9 = vld [vmem:[%s7783_s30 + $0x48] sm:$0xff]  ;;  %v417_v10 = vld [vmem:[%s7783_s30 + $0x50] sm:$0xff]  ;;  %s6682_s8 = sshll.u32 %s11389_s7, 7  ;;  %s11127_s5 = smov %s11389_s7 }
  0x46   : >> { %414 = vst [vmem:[%s7779_s29 + $0x40] sm:$0xff] %v413_v8  ;;  %v419_v11 = vld [vmem:[%s7783_s30 + $0x58] sm:$0xff]  ;;  %416 = vst [vmem:[%s7779_s29 + $0x48] sm:$0xff] %v415_v9  ;;  %v421_v12 = vld [vmem:[%s7783_s30 + $0x60] sm:$0xff]  ;;  %s7989_s9 = scalar_lea.vmem %s7916_s20, %s6682_s8   ;;  %s7992_s10 = scalar_lea.vmem %s7919_s23, %s6682_s8 [#allocation2]  }
  0x47   : >> { %418 = vst [vmem:[%s7779_s29 + $0x50] sm:$0xff] %v417_v10  ;;  %420 = vst [vmem:[%s7779_s29 + $0x58] sm:$0xff] %v419_v11  ;;  %v423_v13 = vld [vmem:[%s7783_s30 + $0x68] sm:$0xff]  ;;  %v425_v14 = vld [vmem:[%s7783_s30 + $0x70] sm:$0xff] }
  0x48   : >> { %422 = vst [vmem:[%s7779_s29 + $0x60] sm:$0xff] %v421_v12  ;;  %424 = vst [vmem:[%s7779_s29 + $0x68] sm:$0xff] %v423_v13  ;;  %v427_v15 = vld [vmem:[%s7783_s30 + $0x78] sm:$0xff]  ;;  %v429_v16 = vld [vmem:[%s7783_s30 + $0x130] sm:$0xff] }
  0x49   : >> { %426 = vst [vmem:[%s7779_s29 + $0x70] sm:$0xff] %v425_v14  ;;  %v431_v17 = vld [vmem:[%s7783_s30 + $0x138] sm:$0xff]  ;;  %428 = vst [vmem:[%s7779_s29 + $0x78] sm:$0xff] %v427_v15  ;;  %v433_v18 = vld [vmem:[%s7783_s30 + $0x140] sm:$0xff] }
  0x4a   : >> { %430 = vst [vmem:[%s7779_s29 + $0x100] sm:$0xff] %v429_v16  ;;  %432 = vst [vmem:[%s7779_s29 + $0x108] sm:$0xff] %v431_v17  ;;  %v435_v19 = vld [vmem:[%s7783_s30 + $0x148] sm:$0xff]  ;;  %v437_v20 = vld [vmem:[%s7783_s30 + $0x150] sm:$0xff] }
  0x4b   : >> { %434 = vst [vmem:[%s7779_s29 + $0x110] sm:$0xff] %v433_v18  ;;  %436 = vst [vmem:[%s7779_s29 + $0x118] sm:$0xff] %v435_v19  ;;  %v439_v21 = vld [vmem:[%s7783_s30 + $0x158] sm:$0xff]  ;;  %v441_v22 = vld [vmem:[%s7783_s30 + $0x160] sm:$0xff] }
  0x4c   : >> { %438 = vst [vmem:[%s7779_s29 + $0x120] sm:$0xff] %v437_v20  ;;  %v443_v23 = vld [vmem:[%s7783_s30 + $0x168] sm:$0xff]  ;;  %440 = vst [vmem:[%s7779_s29 + $0x128] sm:$0xff] %v439_v21  ;;  %v445_v24 = vld [vmem:[%s7783_s30 + $0x170] sm:$0xff] }
  0x4d   : >> { %442 = vst [vmem:[%s7779_s29 + $0x130] sm:$0xff] %v441_v22  ;;  %444 = vst [vmem:[%s7779_s29 + $0x138] sm:$0xff] %v443_v23  ;;  %v447_v25 = vld [vmem:[%s7783_s30 + $0x178] sm:$0xff]  ;;  %v449_v26 = vld [vmem:[%s7783_s30 + $0x180] sm:$0xff] }
  0x4e   : >> { %446 = vst [vmem:[%s7779_s29 + $0x140] sm:$0xff] %v445_v24  ;;  %448 = vst [vmem:[%s7779_s29 + $0x148] sm:$0xff] %v447_v25  ;;  %v451_v27 = vld [vmem:[%s7783_s30 + $0x188] sm:$0xff]  ;;  %v453_v28 = vld [vmem:[%s7783_s30 + $0x190] sm:$0xff] }
  0x4f   : >> { %450 = vst [vmem:[%s7779_s29 + $0x150] sm:$0xff] %v449_v26  ;;  %v455_v29 = vld [vmem:[%s7783_s30 + $0x198] sm:$0xff]  ;;  %452 = vst [vmem:[%s7779_s29 + $0x158] sm:$0xff] %v451_v27  ;;  %v457_v30 = vld [vmem:[%s7783_s30 + $0x1a0] sm:$0xff] }
  0x50   : >> { %454 = vst [vmem:[%s7779_s29 + $0x160] sm:$0xff] %v453_v28  ;;  %456 = vst [vmem:[%s7779_s29 + $0x168] sm:$0xff] %v455_v29  ;;  %v459_v31 = vld [vmem:[%s7783_s30 + $0x1a8] sm:$0xff]  ;;  %v461_v32 = vld [vmem:[%s7783_s30 + $0x260] sm:$0xff] }
  0x51   : >> { %458 = vst [vmem:[%s7779_s29 + $0x170] sm:$0xff] %v457_v30  ;;  %460 = vst [vmem:[%s7779_s29 + $0x178] sm:$0xff] %v459_v31  ;;  %v463_v33 = vld [vmem:[%s7783_s30 + $0x268] sm:$0xff]  ;;  %v465_v34 = vld [vmem:[%s7783_s30 + $0x270] sm:$0xff] }
  0x52   : >> { %462 = vst [vmem:[%s7779_s29 + $0x200] sm:$0xff] %v461_v32  ;;  %v467_v35 = vld [vmem:[%s7783_s30 + $0x278] sm:$0xff]  ;;  %464 = vst [vmem:[%s7779_s29 + $0x208] sm:$0xff] %v463_v33  ;;  %v469_v36 = vld [vmem:[%s7783_s30 + $0x280] sm:$0xff] }
  0x53   : >> { %466 = vst [vmem:[%s7779_s29 + $0x210] sm:$0xff] %v465_v34  ;;  %468 = vst [vmem:[%s7779_s29 + $0x218] sm:$0xff] %v467_v35  ;;  %v471_v37 = vld [vmem:[%s7783_s30 + $0x288] sm:$0xff]  ;;  %v473_v38 = vld [vmem:[%s7783_s30 + $0x290] sm:$0xff] }
  0x54   : >> { %470 = vst [vmem:[%s7779_s29 + $0x220] sm:$0xff] %v469_v36  ;;  %472 = vst [vmem:[%s7779_s29 + $0x228] sm:$0xff] %v471_v37  ;;  %v475_v39 = vld [vmem:[%s7783_s30 + $0x298] sm:$0xff]  ;;  %v477_v40 = vld [vmem:[%s7783_s30 + $0x2a0] sm:$0xff] }
  0x55   : >> { %474 = vst [vmem:[%s7779_s29 + $0x230] sm:$0xff] %v473_v38  ;;  %v479_v41 = vld [vmem:[%s7783_s30 + $0x2a8] sm:$0xff]  ;;  %476 = vst [vmem:[%s7779_s29 + $0x238] sm:$0xff] %v475_v39  ;;  %v481_v42 = vld [vmem:[%s7783_s30 + $0x2b0] sm:$0xff] }
  0x56   : >> { %478 = vst [vmem:[%s7779_s29 + $0x240] sm:$0xff] %v477_v40  ;;  %480 = vst [vmem:[%s7779_s29 + $0x248] sm:$0xff] %v479_v41  ;;  %v483_v43 = vld [vmem:[%s7783_s30 + $0x2b8] sm:$0xff]  ;;  %v485_v44 = vld [vmem:[%s7783_s30 + $0x2c0] sm:$0xff] }
  0x57   : >> { %482 = vst [vmem:[%s7779_s29 + $0x250] sm:$0xff] %v481_v42  ;;  %484 = vst [vmem:[%s7779_s29 + $0x258] sm:$0xff] %v483_v43  ;;  %v487_v45 = vld [vmem:[%s7783_s30 + $0x2c8] sm:$0xff]  ;;  %v489_v46 = vld [vmem:[%s7783_s30 + $0x2d0] sm:$0xff] }
  0x58   : >> { %486 = vst [vmem:[%s7779_s29 + $0x260] sm:$0xff] %v485_v44  ;;  %v491_v47 = vld [vmem:[%s7783_s30 + $0x2d8] sm:$0xff]  ;;  %488 = vst [vmem:[%s7779_s29 + $0x268] sm:$0xff] %v487_v45  ;;  %v493_v48 = vld [vmem:[%s7783_s30 + $0x390] sm:$0xff] }
  0x59   : >> { %490 = vst [vmem:[%s7779_s29 + $0x270] sm:$0xff] %v489_v46  ;;  %492 = vst [vmem:[%s7779_s29 + $0x278] sm:$0xff] %v491_v47  ;;  %v495_v49 = vld [vmem:[%s7783_s30 + $0x398] sm:$0xff]  ;;  %v497_v50 = vld [vmem:[%s7783_s30 + $0x3a0] sm:$0xff] }
  0x5a   : >> { %494 = vst [vmem:[%s7779_s29 + $0x300] sm:$0xff] %v493_v48  ;;  %496 = vst [vmem:[%s7779_s29 + $0x308] sm:$0xff] %v495_v49  ;;  %v499_v51 = vld [vmem:[%s7783_s30 + $0x3a8] sm:$0xff]  ;;  %v501_v52 = vld [vmem:[%s7783_s30 + $0x3b0] sm:$0xff] }
  0x5b   : >> { %498 = vst [vmem:[%s7779_s29 + $0x310] sm:$0xff] %v497_v50  ;;  %v503_v53 = vld [vmem:[%s7783_s30 + $0x3b8] sm:$0xff]  ;;  %500 = vst [vmem:[%s7779_s29 + $0x318] sm:$0xff] %v499_v51  ;;  %v505_v54 = vld [vmem:[%s7783_s30 + $0x3c0] sm:$0xff]  ;;  %393 = sbr.rel (!%p390_p1) target bundleno = 65 (0x41), region = 147 }
  0x5c   : >> { %502 = vst [vmem:[%s7779_s29 + $0x320] sm:$0xff] %v501_v52  ;;  %504 = vst [vmem:[%s7779_s29 + $0x328] sm:$0xff] %v503_v53  ;;  %v507_v55 = vld [vmem:[%s7783_s30 + $0x3c8] sm:$0xff]  ;;  %v509_v56 = vld [vmem:[%s7783_s30 + $0x3d0] sm:$0xff] }
  0x5d   : >> { %506 = vst [vmem:[%s7779_s29 + $0x330] sm:$0xff] %v505_v54  ;;  %508 = vst [vmem:[%s7779_s29 + $0x338] sm:$0xff] %v507_v55  ;;  %v511_v57 = vld [vmem:[%s7783_s30 + $0x3d8] sm:$0xff]  ;;  %v513_v58 = vld [vmem:[%s7783_s30 + $0x3e0] sm:$0xff] }
  0x5e   : >> { %510 = vst [vmem:[%s7779_s29 + $0x340] sm:$0xff] %v509_v56  ;;  %v515_v59 = vld [vmem:[%s7783_s30 + $0x3e8] sm:$0xff]  ;;  %512 = vst [vmem:[%s7779_s29 + $0x348] sm:$0xff] %v511_v57  ;;  %v517_v60 = vld [vmem:[%s7783_s30 + $0x3f0] sm:$0xff] }
  0x5f   : >> { %514 = vst [vmem:[%s7779_s29 + $0x350] sm:$0xff] %v513_v58  ;;  %516 = vst [vmem:[%s7779_s29 + $0x358] sm:$0xff] %v515_v59  ;;  %v519_v61 = vld [vmem:[%s7783_s30 + $0x3f8] sm:$0xff]  ;;  %v521_v62 = vld [vmem:[%s7783_s30 + $0x400] sm:$0xff] }
  0x60   : >> { %518 = vst [vmem:[%s7779_s29 + $0x360] sm:$0xff] %v517_v60  ;;  %520 = vst [vmem:[%s7779_s29 + $0x368] sm:$0xff] %v519_v61  ;;  %v523_v63 = vld [vmem:[%s7783_s30 + $0x408] sm:$0xff]  ;;  %s11126_s30 = smov %s7989_s9 }
  0x61   : >> { %522 = vst [vmem:[%s7779_s29 + $0x370] sm:$0xff] %v521_v62  ;;  %524 = vst [vmem:[%s7779_s29 + $0x378] sm:$0xff] %v523_v63  ;;  %s11125_s29 = smov %s7992_s10 }
  0x62 PF: > { %s8097_s12 = sand.u32 15, %s11387_s11   ;;  %s6870_s13 = sshll.u32 %s7922_s25, 7 }
  0x63   : > { %s8101_s14 = scalar_lea.vmem %s7916_s20, %s6870_s13   ;;  %s8104_s22 = scalar_lea.vmem %s7919_s23, %s6870_s13 [#allocation2]  }
  0x64   : > { %p6687_p2 = scmp.le.s32.totalorder %s8097_s12, 0 }
  0x65   : > { %s11128_s6 = smov (!%p6687_p2), %s8104_s22  ;;  %s11129_s29 = smov (!%p6687_p2), %s8101_s14 }
  0x66   : > { %6620 = sbr.rel (%p6687_p2) target bundleno = 119 (0x77), region = 152  ;;  %s7801_s30 = smov (!%p6687_p2), 0  }
  0x67   : > { %s7805_s5 = smov (!%p6687_p2), 0  }
  0x6d LB: >> { %v548_v0 = vld [vmem:[%s7799_s29] sm:$0xff]  ;;  %v550_v1 = vld [vmem:[%s7799_s29 + $0x130] sm:$0xff]  ;;  %s556_s11 = sadd.s32 1, %s7803_s30  ;;  %s542_s5 = sadd.s32 1, %s7807_s5   ;;  %s7807_s5 = sphi %s7805_s5, %s542_s5   ;;  %s7803_s30 = sphi %s7801_s30, %s7802_s30   ;;  %s7799_s29 = sphi %s11129_s29, %s561_s29   ;;  %s7795_s6 = sphi %s11128_s6, %s562_s6  }
  0x6e   : >> { %v552_v2 = vld [vmem:[%s7799_s29 + $0x260] sm:$0xff]  ;;  %549 = vst [vmem:[%s7795_s6] sm:$0xff] %v548_v0  ;;  %551 = vst [vmem:[%s7795_s6 + $0x100] sm:$0xff] %v550_v1  ;;  %v554_v3 = vld [vmem:[%s7799_s29 + $0x390] sm:$0xff]  ;;  %p557_p3 = scmp.ge.s32.totalorder %s556_s11, %s8097_s12  ;;  %p541_p4 = scmp.ge.s32.totalorder %s542_s5, %s8097_s12 }
  0x6f   : >> { %553 = vst [vmem:[%s7795_s6 + $0x200] sm:$0xff] %v552_v2  ;;  %555 = vst [vmem:[%s7795_s6 + $0x300] sm:$0xff] %v554_v3 }
  0x70   : >> { %s11391_s11 = smov (%p557_p3, %s556_s11), 0  ;;  %544 = sbr.rel (!%p541_p4) target bundleno = 109 (0x6d), region = 158 }
  0x71   : >> { %s6688_s20 = sshll.u32 %s11391_s11, 3  ;;  %s7802_s30 = smov %s11391_s11  }
  0x72   : >> { %s561_s29 = scalar_lea.vmem %s8101_s14, %s6688_s20   ;;  %s562_s6 = scalar_lea.vmem %s8104_s22, %s6688_s20 [#allocation2]  }
  0x77 PF: > { %588 = sbr.rel (%p7892_p12) target bundleno = 890 (0x37a), region = 84 }
  0x7e   : > { %s8126_s23 = sand.u32 1, %s7767_s16  }
  0x7f   : > { %s6691_s25 = sshll.u32 %s8126_s23, 10 }
  0x80   : > { %s8129_s7 = scalar_lea.vmem [#allocation2], %s6691_s25 }
  0x81   : > { %7754 = dma.done.wait (%p6886_p11), [#allocation5], 16  }
  0x82   : > { %7756 = vsyncadd (%p6886_p11), [#allocation5], 4294967280 }
  0x83   : > { %601 = sfence }
  0x84   : > { %s6694_s8 = sshll.u32 %s7859_s19, 5  ;;  %vm904_vm0 = vcmask 392192   ;;  %s8426_s6 = sld [smem:[#allocation3]]  ;;  %vm4630_vm1 = vcmask 130112   ;;  %vm4637_vm2 = vcmask 195712   ;;  %vm11118_vm3 = vcmask 261312  }
  0x85   : > { %p644_p7 = scmp.lt.s32.totalorder %s6694_s8, 37  ;;  %s8498_s29 = sld [smem:[#allocation3 + $0x1]]  ;;  %vm11117_vm4 = vcmask 326912   ;;  %vm4658_vm5 = vcmask 392512   ;;  %vm4665_vm6 = vcmask 458112   ;;  %vm4672_vm7 = vcmask 523712  }
  0x86   : > { %s8692_s30 = sld [smem:[#allocation3 + $0x2]]  ;;  %vm4679_vm8 = vcmask 589312   ;;  %vm4686_vm9 = vcmask 654912   ;;  %vm4693_vm10 = vcmask 720512   ;;  %vm4700_vm11 = vcmask 786112   ;;  %s6693_s5 = sshll.u32 %s8126_s23, 4 }
  0x87   : > { %s11393_s8 = smov (!%p644_p7, %s6694_s8), 37  ;;  %vm4707_vm12 = vcmask 851712   ;;  %vm4714_vm13 = vcmask 917312   ;;  %vm4721_vm14 = vcmask 982912   ;;  %vm4728_vm15 = vcmask 1048512   ;;  %s10887_s11 = scalar_lea.vmem [#allocation6], %s6693_s5 }
  0x88   : > { %s6695_s28 = sshll.u32 %s11393_s8, 3  ;;  %s6502_s20 = scalar_lea.sflag [#allocation4], %s8126_s23 }
  0x89   : > { %s8139_s12 = scalar_lea.vmem %s11040_s0, %s6695_s28  ;;  %s8144_s22 = scalar_lea.vmem %s11042_s2, %s6695_s28 }
  0x8a   : > { %v8147_v4 = vld [vmem:[%s8144_s22 + $0x10] sm:$0xff]  ;;  %v8151_v6 = vld [vmem:[%s8144_s22] sm:$0xff]  ;;  %v8156_v9 = vld [vmem:[%s8144_s22 + $0x18] sm:$0xff]  ;;  %p11380_p11 = scmp.ne.s32.totalorder %s11120_s26, 0 }
  0x8b   : > { %v714_v5 = vld [vmem:[%s8139_s12 + $0x10] sm:$0xff]  ;;  %v712_v8 = vld [vmem:[%s8139_s12] sm:$0xff]  ;;  %v715_v10 = vld [vmem:[%s8139_s12 + $0x18] sm:$0xff]  ;;  %s6861_s25 = sshll.u32 (%p11380_p11), %s7859_s19, 1 }
  0x8c   : > { %v874_v7 = vmul.f32 %v714_v5, %v8147_v4  ;;  %v872_v11 = vmul.f32 %v712_v8, %v8151_v6  ;;  %v875_v12 = vmul.f32 %v715_v10, %v8156_v9  ;;  %v8162_v13 = vld [vmem:[%s8144_s22 + $0x8] sm:$0xff]  ;;  %v8172_v19 = vld [vmem:[%s8144_s22 + $0x20] sm:$0xff]  ;;  %v8181_v26 = vld [vmem:[%s8144_s22 + $0x38] sm:$0xff] }
  0x8d   : > { %v713_v14 = vld [vmem:[%s8139_s12 + $0x8] sm:$0xff]  ;;  %v716_v20 = vld [vmem:[%s8139_s12 + $0x20] sm:$0xff]  ;;  %v719_v27 = vld [vmem:[%s8139_s12 + $0x38] sm:$0xff] }
  0x8e   : > { %v8166_v15 = vld [vmem:[%s8144_s22 + $0x28] sm:$0xff]  ;;  %v911_v16 = vsel %vm904_vm0, %v874_v7, 0.0  ;;  %v873_v17 = vmul.f32 %v713_v14, %v8162_v13  ;;  %v905_v21 = vsel %vm904_vm0, %v872_v11, 0.0  ;;  %v914_v22 = vsel %vm904_vm0, %v875_v12, 0.0  ;;  %v8185_v28 = vld [vmem:[%s8144_s22 + $0x30] sm:$0xff]  ;;  %v8197_v36 = vld [vmem:[%s8144_s22 + $0x40] sm:$0xff] }
  0x8f   : > { %v717_v18 = vld [vmem:[%s8139_s12 + $0x28] sm:$0xff]  ;;  %912 = vadd.xlane.f32.xlu1 %v911_v16  ;;  %906 = vadd.xlane.f32.xlu0 %v905_v21  ;;  %v876_v25 = vmul.f32 %v716_v20, %v8172_v19  ;;  %v718_v29 = vld [vmem:[%s8139_s12 + $0x30] sm:$0xff]  ;;  %v879_v31 = vmul.f32 %v719_v27, %v8181_v26  ;;  %v720_v37 = vld [vmem:[%s8139_s12 + $0x40] sm:$0xff] }
  0x90   : > { %v877_v23 = vmul.f32 %v717_v18, %v8166_v15  ;;  %v908_v24 = vsel %vm904_vm0, %v873_v17, 0.0  ;;  %v878_v33 = vmul.f32 %v718_v29, %v8185_v28  ;;  %v8193_v34 = vld [vmem:[%s8144_s22 + $0x48] sm:$0xff]  ;;  %v880_v41 = vmul.f32 %v720_v37, %v8197_v36  ;;  %v8205_v42 = vld [vmem:[%s8144_s22 + $0x58] sm:$0xff]  ;;  %v8209_v44 = vld [vmem:[%s8144_s22 + $0x50] sm:$0xff] }
  0x91   : > { %v917_v32 = vsel %vm904_vm0, %v876_v25, 0.0  ;;  %v721_v35 = vld [vmem:[%s8139_s12 + $0x48] sm:$0xff]  ;;  %v926_v38 = vsel %vm904_vm0, %v879_v31, 0.0  ;;  %v723_v43 = vld [vmem:[%s8139_s12 + $0x58] sm:$0xff]  ;;  %v722_v45 = vld [vmem:[%s8139_s12 + $0x50] sm:$0xff] }
  0x92   : > { %v920_v30 = vsel %vm904_vm0, %v877_v23, 0.0  ;;  %v881_v39 = vmul.f32 %v721_v35, %v8193_v34  ;;  %v923_v40 = vsel %vm904_vm0, %v878_v33, 0.0  ;;  %v883_v47 = vmul.f32 %v723_v43, %v8205_v42  ;;  %v8217_v50 = vld [vmem:[%s8144_s22 + $0x68] sm:$0xff]  ;;  %v8221_v52 = vld [vmem:[%s8144_s22 + $0x60] sm:$0xff]  ;;  %v8229_v58 = vld [vmem:[%s8144_s22 + $0x78] sm:$0xff] }
  0x93   : > { %915 = vadd.xlane.f32.xlu1 %v914_v22  ;;  %909 = vadd.xlane.f32.xlu0 %v908_v24  ;;  %v929_v48 = vsel %vm904_vm0, %v880_v41, 0.0  ;;  %v882_v49 = vmul.f32 %v722_v45, %v8209_v44  ;;  %v725_v51 = vld [vmem:[%s8139_s12 + $0x68] sm:$0xff]  ;;  %v724_v53 = vld [vmem:[%s8139_s12 + $0x60] sm:$0xff]  ;;  %11130 = vst [vmem:[#allocation9_spill] sm:$0xff] %v8229_v58  ;;  %v727_v59 = vld [vmem:[%s8139_s12 + $0x78] sm:$0xff] }
  0x94   : > { %v932_v46 = vsel %vm904_vm0, %v881_v39, 0.0  ;;  %v938_v54 = vsel %vm904_vm0, %v883_v47, 0.0  ;;  %v885_v55 = vmul.f32 %v725_v51, %v8217_v50  ;;  %v884_v57 = vmul.f32 %v724_v53, %v8221_v52  ;;  %v8233_v60 = vld [vmem:[%s8144_s22 + $0x70] sm:$0xff]  ;;  %v8241_v2 = vld [vmem:[%s8144_s22 + $0x88] sm:$0xff]  ;;  %v8245_v5 = vld [vmem:[%s8144_s22 + $0x80] sm:$0xff] }
  0x95   : > { %v935_v56 = vsel %vm904_vm0, %v882_v49, 0.0  ;;  %v726_v61 = vld [vmem:[%s8139_s12 + $0x70] sm:$0xff]  ;;  %v887_v63 = vmul.f32 %v727_v59, %v8229_v58  ;;  %v729_v3 = vld [vmem:[%s8139_s12 + $0x88] sm:$0xff]  ;;  %v728_v7 = vld [vmem:[%s8139_s12 + $0x80] sm:$0xff] }
  0x96   : > { %v944_v62 = vsel %vm904_vm0, %v885_v55, 0.0  ;;  %v941_v0 = vsel %vm904_vm0, %v884_v57, 0.0  ;;  %v886_v1 = vmul.f32 %v726_v61, %v8233_v60  ;;  %v889_v10 = vmul.f32 %v729_v3, %v8241_v2  ;;  %v8253_v14 = vld [vmem:[%s8144_s22 + $0x98] sm:$0xff]  ;;  %v8257_v17 = vld [vmem:[%s8144_s22 + $0x90] sm:$0xff]  ;;  %v8265_v24 = vld [vmem:[%s8144_s22 + $0xa8] sm:$0xff] }
  0x97   : > { %921 = vadd.xlane.f32.xlu1 %v920_v30  ;;  %918 = vadd.xlane.f32.xlu0 %v917_v32  ;;  %v950_v8 = vsel %vm904_vm0, %v887_v63, 0.0  ;;  %v888_v12 = vmul.f32 %v728_v7, %v8245_v5  ;;  %v731_v16 = vld [vmem:[%s8139_s12 + $0x98] sm:$0xff]  ;;  %v730_v18 = vld [vmem:[%s8139_s12 + $0x90] sm:$0xff]  ;;  %v733_v25 = vld [vmem:[%s8139_s12 + $0xa8] sm:$0xff] }
  0x98   : > { %v947_v11 = vsel %vm904_vm0, %v886_v1, 0.0  ;;  %v956_v20 = vsel %vm904_vm0, %v889_v10, 0.0  ;;  %v891_v21 = vmul.f32 %v731_v16, %v8253_v14  ;;  %v890_v23 = vmul.f32 %v730_v18, %v8257_v17  ;;  %v8269_v27 = vld [vmem:[%s8144_s22 + $0xa0] sm:$0xff]  ;;  %v8277_v35 = vld [vmem:[%s8144_s22 + $0xb8] sm:$0xff]  ;;  %v734_v39 = vld [vmem:[%s8139_s12 + $0xb0] sm:$0xff] }
  0x99   : > { %v953_v22 = vsel %vm904_vm0, %v888_v12, 0.0  ;;  %v732_v29 = vld [vmem:[%s8139_s12 + $0xa0] sm:$0xff]  ;;  %v893_v31 = vmul.f32 %v733_v25, %v8265_v24  ;;  %v735_v37 = vld [vmem:[%s8139_s12 + $0xb8] sm:$0xff]  ;;  %v737_v47 = vld [vmem:[%s8139_s12 + $0xc8] sm:$0xff] }
  0x9a   : > { %v962_v30 = vsel %vm904_vm0, %v891_v21, 0.0  ;;  %v959_v32 = vsel %vm904_vm0, %v890_v23, 0.0  ;;  %v892_v33 = vmul.f32 %v732_v29, %v8269_v27  ;;  %v895_v41 = vmul.f32 %v735_v37, %v8277_v35  ;;  %v736_v49 = vld [vmem:[%s8139_s12 + $0xc0] sm:$0xff]  ;;  %v739_v57 = vld [vmem:[%s8139_s12 + $0xd8] sm:$0xff]  ;;  %v8305_v59 = vld [vmem:[%s8144_s22 + $0xd0] sm:$0xff] }
  0x9b   : > { %927 = vadd.xlane.f32.xlu1 %v926_v38  ;;  %924 = vadd.xlane.f32.xlu0 %v923_v40  ;;  %v8281_v38 = vld [vmem:[%s8144_s22 + $0xb0] sm:$0xff]  ;;  %v968_v40 = vsel %vm904_vm0, %v893_v31, 0.0  ;;  %v8313_v3 = vld [vmem:[%s8144_s22 + $0xe8] sm:$0xff]  ;;  %v740_v10 = vld [vmem:[%s8139_s12 + $0xe0] sm:$0xff] }
  0x9c   : > { %v965_v43 = vsel %vm904_vm0, %v892_v33, 0.0  ;;  %v894_v45 = vmul.f32 %v734_v39, %v8281_v38  ;;  %v974_v51 = vsel %vm904_vm0, %v895_v41, 0.0  ;;  %v738_v61 = vld [vmem:[%s8139_s12 + $0xd0] sm:$0xff]  ;;  %v741_v7 = vld [vmem:[%s8139_s12 + $0xe8] sm:$0xff]  ;;  %v743_v21 = vld [vmem:[%s8139_s12 + $0xf8] sm:$0xff] }
  0x9d   : > { %v898_v1 = vmul.f32 %v738_v61, %v8305_v59  ;;  %v901_v12 = vmul.f32 %v741_v7, %v8313_v3  ;;  %v742_v23 = vld [vmem:[%s8139_s12 + $0xf0] sm:$0xff]  ;;  %v744_v33 = vld [vmem:[%s8129_s7] sm:$0xff] }
  0x9e   : > { %v1034_v41 = vmul.f32 %v744_v33, %v8151_v6 }
  0x9f   : > { %933 = vadd.xlane.f32.xlu1 %v932_v46  ;;  %930 = vadd.xlane.f32.xlu0 %v929_v48  ;;  %v8289_v46 = vld [vmem:[%s8144_s22 + $0xc8] sm:$0xff]  ;;  %v8293_v48 = vld [vmem:[%s8144_s22 + $0xc0] sm:$0xff]  ;;  %v983_v16 = vsel %vm904_vm0, %v898_v1, 0.0  ;;  %v992_v25 = vsel %vm904_vm0, %v901_v12, 0.0  ;;  %v750_v1 = vld [vmem:[%s8129_s7 + $0x30] sm:$0xff] }
  0xa0   : > { %v897_v53 = vmul.f32 %v737_v47, %v8289_v46  ;;  %v896_v55 = vmul.f32 %v736_v49, %v8293_v48  ;;  %v1040_v12 = vmul.f32 %v750_v1, %v8185_v28 }
  0xa3   : > { %939 = vadd.xlane.f32.xlu1 %v938_v54  ;;  %936 = vadd.xlane.f32.xlu0 %v935_v56  ;;  %v971_v54 = vsel %vm904_vm0, %v894_v45, 0.0  ;;  %v8301_v56 = vld [vmem:[%s8144_s22 + $0xd8] sm:$0xff]  ;;  %v746_v45 = vld [vmem:[%s8129_s7 + $0x10] sm:$0xff] }
  0xa4   : > { %v899_v63 = vmul.f32 %v739_v57, %v8301_v56 }
  0xa7   : > { %945 = vadd.xlane.f32.xlu1 %v944_v62  ;;  %942 = vadd.xlane.f32.xlu0 %v941_v0  ;;  %v980_v62 = vsel %vm904_vm0, %v897_v53, 0.0  ;;  %v977_v0 = vsel %vm904_vm0, %v896_v55, 0.0  ;;  %v1036_v53 = vmul.f32 %v746_v45, %v8147_v4  ;;  %v748_v55 = vld [vmem:[%s8129_s7 + $0x20] sm:$0xff] }
  0xab   : > { %951 = vadd.xlane.f32.xlu1 %v950_v8  ;;  %948 = vadd.xlane.f32.xlu0 %v947_v11  ;;  %v8317_v8 = vld [vmem:[%s8144_s22 + $0xe0] sm:$0xff]  ;;  %v986_v11 = vsel %vm904_vm0, %v899_v63, 0.0  ;;  %v1038_v63 = vmul.f32 %v748_v55, %v8172_v19 }
  0xac   : > { %v900_v18 = vmul.f32 %v740_v10, %v8317_v8 }
  0xaf   : > { %957 = vadd.xlane.f32.xlu1 %v956_v20  ;;  %954 = vadd.xlane.f32.xlu0 %v953_v22  ;;  %v8325_v20 = vld [vmem:[%s8144_s22 + $0xf8] sm:$0xff]  ;;  %v8329_v22 = vld [vmem:[%s8144_s22 + $0xf0] sm:$0xff] }
  0xb0   : > { %v903_v29 = vmul.f32 %v743_v21, %v8325_v20  ;;  %v902_v31 = vmul.f32 %v742_v23, %v8329_v22 }
  0xb2   : > { %v998_v37 = vsel %vm904_vm0, %v903_v29, 0.0 }
  0xb3   : > { %963 = vadd.xlane.f32.xlu1 %v962_v30  ;;  %960 = vadd.xlane.f32.xlu0 %v959_v32  ;;  %v989_v30 = vsel %vm904_vm0, %v900_v18, 0.0  ;;  %v745_v32 = vld [vmem:[%s8129_s7 + $0x8] sm:$0xff]  ;;  %v752_v18 = vld [vmem:[%s8129_s7 + $0x40] sm:$0xff] }
  0xb4   : > { %v1035_v39 = vmul.f32 %v745_v32, %v8162_v13  ;;  %v1042_v29 = vmul.f32 %v752_v18, %v8197_v36 }
  0xb6   : > { %v1165_v47 = vsel %vm904_vm0, %v1035_v39, 0.0 }
  0xb7   : > { %969 = vadd.xlane.f32.xlu1 %v968_v40  ;;  %966 = vadd.xlane.f32.xlu0 %v965_v43  ;;  %v995_v40 = vsel %vm904_vm0, %v902_v31, 0.0  ;;  %v747_v43 = vld [vmem:[%s8129_s7 + $0x18] sm:$0xff]  ;;  %v754_v31 = vld [vmem:[%s8129_s7 + $0x50] sm:$0xff] }
  0xb8   : > { %v1037_v49 = vmul.f32 %v747_v43, %v8156_v9  ;;  %v1044_v39 = vmul.f32 %v754_v31, %v8209_v44 }
  0xba   : > { %v1171_v57 = vsel %vm904_vm0, %v1037_v49, 0.0 }
  0xbb   : > { %975 = vadd.xlane.f32.xlu1 %v974_v51  ;;  %972 = vadd.xlane.f32.xlu0 %v971_v54  ;;  %v1162_v51 = vsel %vm904_vm0, %v1034_v41, 0.0  ;;  %v749_v54 = vld [vmem:[%s8129_s7 + $0x28] sm:$0xff]  ;;  %v756_v41 = vld [vmem:[%s8129_s7 + $0x60] sm:$0xff] }
  0xbc   : > { %v1039_v61 = vmul.f32 %v749_v54, %v8166_v15  ;;  %v1046_v49 = vmul.f32 %v756_v41, %v8221_v52 }
  0xbe   : > { %v1177_v7 = vsel %vm904_vm0, %v1039_v61, 0.0 }
  0xbf   : > { %981 = vadd.xlane.f32.xlu1 %v980_v62  ;;  %978 = vadd.xlane.f32.xlu0 %v977_v0  ;;  %v1168_v62 = vsel %vm904_vm0, %v1036_v53, 0.0  ;;  %v751_v0 = vld [vmem:[%s8129_s7 + $0x38] sm:$0xff]  ;;  %v758_v53 = vld [vmem:[%s8129_s7 + $0x70] sm:$0xff] }
  0xc0   : > { %v1041_v10 = vmul.f32 %v751_v0, %v8181_v26  ;;  %v1048_v61 = vmul.f32 %v758_v53, %v8233_v60  ;;  %v770_v53 = vld [vmem:[%s8129_s7 + $0xd0] sm:$0xff] }
  0xc2   : > { %v1183_v21 = vsel %vm904_vm0, %v1041_v10, 0.0 }
  0xc3   : > { %987 = vadd.xlane.f32.xlu1 %v986_v11  ;;  %984 = vadd.xlane.f32.xlu0 %v983_v16  ;;  %v1174_v11 = vsel %vm904_vm0, %v1038_v63, 0.0  ;;  %v753_v16 = vld [vmem:[%s8129_s7 + $0x48] sm:$0xff]  ;;  %v760_v63 = vld [vmem:[%s8129_s7 + $0x80] sm:$0xff] }
  0xc4   : > { %v1043_v23 = vmul.f32 %v753_v16, %v8193_v34  ;;  %v1050_v10 = vmul.f32 %v760_v63, %v8245_v5 }
  0xc6   : > { %v1189_v32 = vsel %vm904_vm0, %v1043_v23, 0.0 }
  0xc7   : > { %993 = vadd.xlane.f32.xlu1 %v992_v25  ;;  %990 = vadd.xlane.f32.xlu0 %v989_v30  ;;  %v1180_v25 = vsel %vm904_vm0, %v1040_v12, 0.0  ;;  %v755_v30 = vld [vmem:[%s8129_s7 + $0x58] sm:$0xff]  ;;  %v762_v12 = vld [vmem:[%s8129_s7 + $0x90] sm:$0xff] }
  0xc8   : > { %v1045_v33 = vmul.f32 %v755_v30, %v8205_v42  ;;  %v1052_v23 = vmul.f32 %v762_v12, %v8257_v17  ;;  %v777_v12 = vld [vmem:[%s8129_s7 + $0x108] sm:$0xff] }
  0xca   : > { %v1195_v43 = vsel %vm904_vm0, %v1045_v33, 0.0 }
  0xcb   : > { %999 = vadd.xlane.f32.xlu1 %v998_v37  ;;  %996 = vadd.xlane.f32.xlu0 %v995_v40  ;;  %v1186_v37 = vsel %vm904_vm0, %v1042_v29, 0.0  ;;  %v757_v40 = vld [vmem:[%s8129_s7 + $0x68] sm:$0xff]  ;;  %v764_v29 = vld [vmem:[%s8129_s7 + $0xa0] sm:$0xff] }
  0xcc   : > { %v1047_v45 = vmul.f32 %v757_v40, %v8217_v50  ;;  %v1054_v33 = vmul.f32 %v764_v29, %v8269_v27  ;;  %v780_v29 = vld [vmem:[%s8129_s7 + $0x120] sm:$0xff] }
  0xce   : > { %v1201_v54 = vsel %vm904_vm0, %v1047_v45, 0.0 }
  0xcf   : > { %1166 = vadd.xlane.f32.xlu1 %v1165_v47  ;;  %1163 = vadd.xlane.f32.xlu0 %v1162_v51  ;;  %v1192_v47 = vsel %vm904_vm0, %v1044_v39, 0.0  ;;  %v759_v51 = vld [vmem:[%s8129_s7 + $0x78] sm:$0xff]  ;;  %v766_v39 = vld [vmem:[%s8129_s7 + $0xb0] sm:$0xff] }
  0xd0   : > { %v1049_v55 = vmul.f32 %v759_v51, %v8229_v58  ;;  %v1056_v45 = vmul.f32 %v766_v39, %v8281_v38  ;;  %v771_v51 = vld [vmem:[%s8129_s7 + $0xd8] sm:$0xff]  ;;  %v782_v39 = vld [vmem:[%s8129_s7 + $0x130] sm:$0xff] }
  0xd1   : > { %v1061_v63 = vmul.f32 %v771_v51, %v8301_v56 }
  0xd2   : > { %v1207_v0 = vsel %vm904_vm0, %v1049_v55, 0.0 }
  0xd3   : > { %1172 = vadd.xlane.f32.xlu1 %v1171_v57  ;;  %1169 = vadd.xlane.f32.xlu0 %v1168_v62  ;;  %v1198_v57 = vsel %vm904_vm0, %v1046_v49, 0.0  ;;  %v761_v62 = vld [vmem:[%s8129_s7 + $0x88] sm:$0xff]  ;;  %v768_v49 = vld [vmem:[%s8129_s7 + $0xc0] sm:$0xff] }
  0xd4   : > { %v1051_v1 = vmul.f32 %v761_v62, %v8241_v2  ;;  %v1058_v62 = vmul.f32 %v768_v49, %v8293_v48  ;;  %v784_v49 = vld [vmem:[%s8129_s7 + $0x140] sm:$0xff] }
  0xd6   : > { %v1213_v16 = vsel %vm904_vm0, %v1051_v1, 0.0  ;;  %v772_v1 = vld [vmem:[%s8129_s7 + $0xe0] sm:$0xff] }
  0xd7   : > { %1178 = vadd.xlane.f32.xlu1 %v1177_v7  ;;  %1175 = vadd.xlane.f32.xlu0 %v1174_v11  ;;  %v1204_v7 = vsel %vm904_vm0, %v1048_v61, 0.0  ;;  %v763_v11 = vld [vmem:[%s8129_s7 + $0x98] sm:$0xff]  ;;  %v1228_v61 = vsel %vm904_vm0, %v1056_v45, 0.0  ;;  %v1067_v45 = vmul.f32 %v777_v12, %v8162_v13  ;;  %v1074_v12 = vmul.f32 %v784_v49, %v8197_v36 }
  0xd8   : > { %v1053_v18 = vmul.f32 %v763_v11, %v8253_v14 }
  0xda   : > { %v1219_v30 = vsel %vm904_vm0, %v1053_v18, 0.0  ;;  %v779_v18 = vld [vmem:[%s8129_s7 + $0x118] sm:$0xff] }
  0xdb   : > { %1184 = vadd.xlane.f32.xlu1 %v1183_v21  ;;  %1181 = vadd.xlane.f32.xlu0 %v1180_v25  ;;  %v1210_v21 = vsel %vm904_vm0, %v1050_v10, 0.0  ;;  %v765_v25 = vld [vmem:[%s8129_s7 + $0xa8] sm:$0xff]  ;;  %v774_v10 = vld [vmem:[%s8129_s7 + $0xf0] sm:$0xff] }
  0xdc   : > { %v1055_v31 = vmul.f32 %v765_v25, %v8265_v24  ;;  %v781_v25 = vld [vmem:[%s8129_s7 + $0x128] sm:$0xff] }
  0xde   : > { %v1225_v40 = vsel %vm904_vm0, %v1055_v31, 0.0  ;;  %v1062_v31 = vmul.f32 %v772_v1, %v8317_v8 }
  0xdf   : > { %1190 = vadd.xlane.f32.xlu1 %v1189_v32  ;;  %1187 = vadd.xlane.f32.xlu0 %v1186_v37  ;;  %v1216_v32 = vsel %vm904_vm0, %v1052_v23, 0.0  ;;  %v767_v37 = vld [vmem:[%s8129_s7 + $0xb8] sm:$0xff]  ;;  %v778_v23 = vld [vmem:[%s8129_s7 + $0x110] sm:$0xff] }
  0xe0   : > { %v1057_v41 = vmul.f32 %v767_v37, %v8277_v35  ;;  %v783_v37 = vld [vmem:[%s8129_s7 + $0x138] sm:$0xff] }
  0xe3   : > { %1196 = vadd.xlane.f32.xlu1 %v1195_v43  ;;  %1193 = vadd.xlane.f32.xlu0 %v1192_v47  ;;  %v1222_v43 = vsel %vm904_vm0, %v1054_v33, 0.0  ;;  %v769_v47 = vld [vmem:[%s8129_s7 + $0xc8] sm:$0xff]  ;;  %v1064_v33 = vmul.f32 %v774_v10, %v8329_v22 }
  0xe4   : > { %v1059_v55 = vmul.f32 %v769_v47, %v8289_v46 }
  0xe7   : > { %1202 = vadd.xlane.f32.xlu1 %v1201_v54  ;;  %1199 = vadd.xlane.f32.xlu0 %v1198_v57  ;;  %v1231_v54 = vsel %vm904_vm0, %v1057_v41, 0.0  ;;  %v773_v57 = vld [vmem:[%s8129_s7 + $0xe8] sm:$0xff]  ;;  %v1243_v41 = vsel %vm904_vm0, %v1061_v63, 0.0  ;;  %v1073_v63 = vmul.f32 %v783_v37, %v8181_v26  ;;  %v8479_v37 = vstv %s8426_s6 }
  0xe8   : > { %v1063_v11 = vmul.f32 %v773_v57, %v8313_v3  ;;  %v787_v57 = vld [vmem:[%s8129_s7 + $0x158] sm:$0xff]  ;;  %11131 = vst [vmem:[#allocation10_spill] sm:$0xff] %v8479_v37 }
  0xe9   : > { %v799_v37 = vld [vmem:[%s8129_s7 + $0x1b8] sm:$0xff] }
  0xea   : > { %v1249_v51 = vsel %vm904_vm0, %v1063_v11, 0.0  ;;  %v1252_v11 = vsel %vm904_vm0, %v1064_v33, 0.0 }
  0xeb   : > { %1208 = vadd.xlane.f32.xlu1 %v1207_v0  ;;  %1205 = vadd.xlane.f32.xlu0 %v1204_v7  ;;  %v1060_v0 = vmul.f32 %v770_v53, %v8305_v59  ;;  %v775_v7 = vld [vmem:[%s8129_s7 + $0xf8] sm:$0xff]  ;;  %v1069_v53 = vmul.f32 %v779_v18, %v8156_v9 }
  0xef   : > { %1214 = vadd.xlane.f32.xlu1 %v1213_v16  ;;  %1211 = vadd.xlane.f32.xlu0 %v1210_v21  ;;  %v776_v16 = vld [vmem:[%s8129_s7 + $0x100] sm:$0xff]  ;;  %v1237_v21 = vsel %vm904_vm0, %v1059_v55, 0.0  ;;  %v1071_v55 = vmul.f32 %v781_v25, %v8166_v15  ;;  %v789_v25 = vld [vmem:[%s8129_s7 + $0x168] sm:$0xff] }
  0xf0   : > { %v1066_v47 = vmul.f32 %v776_v16, %v8151_v6  ;;  %v8459_v16 = vsel %vm904_vm0, %v1067_v45, 0.0  ;;  %v792_v45 = vld [vmem:[%s8129_s7 + $0x180] sm:$0xff] }
  0xf1   : > { %v8476_v33 = vsel %vm904_vm0, %v1071_v55, 0.0  ;;  %v794_v55 = vld [vmem:[%s8129_s7 + $0x190] sm:$0xff] }
  0xf2   : > { %v8462_v18 = vsel %vm904_vm0, %v1066_v47, 0.0  ;;  %v8488_v47 = vsel %vm904_vm0, %v1073_v63, 0.0  ;;  %v797_v63 = vld [vmem:[%s8129_s7 + $0x1a8] sm:$0xff] }
  0xf3   : > { %1220 = vadd.xlane.f32.xlu1 %v1219_v30  ;;  %1217 = vadd.xlane.f32.xlu0 %v1216_v32  ;;  %v1234_v30 = vsel %vm904_vm0, %v1058_v62, 0.0  ;;  %v1065_v32 = vmul.f32 %v775_v7, %v8325_v20  ;;  %v1070_v62 = vmul.f32 %v780_v29, %v8172_v19  ;;  %v1246_v7 = vsel %vm904_vm0, %v1062_v31, 0.0  ;;  %v788_v29 = vld [vmem:[%s8129_s7 + $0x160] sm:$0xff]  ;;  %11133 = vst [vmem:[#allocation12_spill] sm:$0xff] %v8488_v47  ;;  %v798_v47 = vld [vmem:[%s8129_s7 + $0x1b0] sm:$0xff] }
  0xf4   : > { %v8470_v31 = vsel %vm904_vm0, %v1069_v53, 0.0 }
  0xf5   : > { %v1255_v10 = vsel %vm904_vm0, %v1065_v32, 0.0 }
  0xf7   : > { %1226 = vadd.xlane.f32.xlu1 %v1225_v40  ;;  %1223 = vadd.xlane.f32.xlu0 %v1222_v43  ;;  %v785_v40 = vld [vmem:[%s8129_s7 + $0x148] sm:$0xff]  ;;  %v1240_v43 = vsel %vm904_vm0, %v1060_v0, 0.0  ;;  %v1072_v0 = vmul.f32 %v782_v39, %v8185_v28  ;;  %v790_v39 = vld [vmem:[%s8129_s7 + $0x170] sm:$0xff] }
  0xf8   : > { %v1075_v1 = vmul.f32 %v785_v40, %v8193_v34  ;;  %v793_v40 = vld [vmem:[%s8129_s7 + $0x188] sm:$0xff] }
  0xf9   : > { %v8491_v49 = vsel %vm904_vm0, %v1072_v0, 0.0  ;;  %v796_v0 = vld [vmem:[%s8129_s7 + $0x1a0] sm:$0xff] }
  0xfa   : > { %11134 = vst [vmem:[#allocation13_spill] sm:$0xff] %v8491_v49  ;;  %v8494_v53 = vsel %vm904_vm0, %v1075_v1, 0.0  ;;  %v1080_v49 = vmul.f32 %v790_v39, %v8233_v60  ;;  %v1089_v39 = vmul.f32 %v799_v37, %v8277_v35 }
  0xfb   : > { %1232 = vadd.xlane.f32.xlu1 %v1231_v54  ;;  %1229 = vadd.xlane.f32.xlu0 %v1228_v61  ;;  %v1068_v54 = vmul.f32 %v778_v23, %v8147_v4  ;;  %v786_v61 = vld [vmem:[%s8129_s7 + $0x150] sm:$0xff]  ;;  %11135 = vst [vmem:[#allocation14_spill] sm:$0xff] %v8494_v53 }
  0xfc   : > { %v1076_v23 = vmul.f32 %v786_v61, %v8209_v44  ;;  %v1078_v61 = vmul.f32 %v788_v29, %v8221_v52  ;;  %v1082_v29 = vmul.f32 %v792_v45, %v8245_v5 }
  0xfd   : > { %v8473_v32 = vsel %vm904_vm0, %v1068_v54, 0.0  ;;  %v795_v54 = vld [vmem:[%s8129_s7 + $0x198] sm:$0xff] }
  0xfe   : > { %v8513_v53 = vsel %vm904_vm0, %v1076_v23, 0.0  ;;  %v1086_v23 = vmul.f32 %v796_v0, %v8269_v27 }
  0xff   : > { %1238 = vadd.xlane.f32.xlu1 %v1237_v21  ;;  %1235 = vadd.xlane.f32.xlu0 %v1234_v30  ;;  %v1077_v21 = vmul.f32 %v787_v57, %v8205_v42  ;;  %v791_v30 = vld [vmem:[%s8129_s7 + $0x178] sm:$0xff]  ;;  %v1079_v57 = vmul.f32 %v789_v25, %v8217_v50  ;;  %11137 = vst [vmem:[#allocation16_spill] sm:$0xff] %v8513_v53 }
 0x100   : > { %v1083_v25 = vmul.f32 %v793_v40, %v8241_v2  ;;  %v8561_v0 = vsel %vm904_vm0, %v1086_v23, 0.0  ;;  %v804_v23 = vld [vmem:[%s8129_s7 + $0x1e0] sm:$0xff] }
 0x101   : > { %v8510_v1 = vsel %vm904_vm0, %v1077_v21, 0.0  ;;  %v1087_v21 = vmul.f32 %v797_v63, %v8265_v24  ;;  %v8527_v53 = vsel %vm904_vm0, %v1079_v57, 0.0  ;;  %11141 = vst [vmem:[#allocation20_spill] sm:$0xff] %v8561_v0 }
 0x103   : > { %1244 = vadd.xlane.f32.xlu1 %v1243_v41  ;;  %1241 = vadd.xlane.f32.xlu0 %v1240_v43  ;;  %v8485_v41 = vsel %vm904_vm0, %v1070_v62, 0.0  ;;  %v8501_v43 = vsel %vm904_vm0, %v1074_v12, 0.0  ;;  %v1081_v62 = vmul.f32 %v791_v30, %v8229_v58  ;;  %v801_v12 = vld [vmem:[%s8129_s7 + $0x1c8] sm:$0xff]  ;;  %v1085_v30 = vmul.f32 %v795_v54, %v8253_v14 }
 0x104   : > { %11132 = vst [vmem:[#allocation11_spill] sm:$0xff] %v8485_v41  ;;  %11136 = vst [vmem:[#allocation15_spill] sm:$0xff] %v8501_v43  ;;  %v800_v43 = vld [vmem:[%s8129_s7 + $0x1c0] sm:$0xff]  ;;  %v11047_v41 = vlaneseq  ;;  %v1084_v58 = vmul.f32 %v794_v55, %v8257_v17  ;;  %v1091_v40 = vmul.f32 %v801_v12, %v8289_v46  ;;  %v8533_v54 = vsel %vm904_vm0, %v1078_v61, 0.0  ;;  %v803_v61 = vld [vmem:[%s8129_s7 + $0x1d8] sm:$0xff] }
 0x105   : > { %v1090_v45 = vmul.f32 %v800_v43, %v8293_v48  ;;  %v8539_v55 = vsel %vm904_vm0, %v1080_v49, 0.0  ;;  %v8548_v43 = vsel %vm904_vm0, %v1082_v29, 0.0  ;;  %v8551_v57 = vsel %vm904_vm0, %v1085_v30, 0.0 }
 0x106   : > { %v8542_v37 = vshrl.u32 %v11047_v41, 7  ;;  %11138 = vst [vmem:[#allocation17_spill] sm:$0xff] %v8551_v57  ;;  %v8558_v63 = vsel %vm904_vm0, %v1087_v21, 0.0  ;;  %v8564_v12 = vsel %vm904_vm0, %v1089_v39, 0.0  ;;  %v8568_v29 = vstv %s8498_s29  ;;  %v805_v21 = vld [vmem:[%s8129_s7 + $0x1e8] sm:$0xff]  ;;  %v806_v41 = vld [vmem:[%s8129_s7 + $0x1f0] sm:$0xff] }
 0x107   : > { %1250 = vadd.xlane.f32.xlu1 %v1249_v51  ;;  %1247 = vadd.xlane.f32.xlu0 %v1246_v7  ;;  %v1088_v51 = vmul.f32 %v798_v47, %v8281_v38  ;;  %v8536_v7 = vsel %vm904_vm0, %v1081_v62, 0.0  ;;  %v8545_v47 = vsel %vm904_vm0, %v1083_v25, 0.0  ;;  %v7810_v62 = vmov 1966171168   ;;  %11140 = vst [vmem:[#allocation19_spill] sm:$0xff] %v8558_v63  ;;  %11142 = vst [vmem:[#allocation21_spill] sm:$0xff] %v8564_v12 }
 0x108   : > { %v2960_v49 = vunpack.c.l.s4 %v7810_v62  ;;  %v802_v25 = vld [vmem:[%s8129_s7 + $0x1d0] sm:$0xff]  ;;  %11143 = vst [vmem:[#allocation22_spill] sm:$0xff] %v8568_v29  ;;  %v807_v62 = vld [vmem:[%s8129_s7 + $0x1f8] sm:$0xff]  ;;  %v1093_v39 = vmul.f32 %v803_v61, %v8301_v56  ;;  %v809_v12 = vld [vmem:[%s8129_s7 + $0x208] sm:$0xff]  ;;  %v8603_v0 = vsub.s32 4, %v8542_v37 }
 0x109   : > { %v8571_v30 = vsel %vm904_vm0, %v1088_v51, 0.0  ;;  %v808_v29 = vld [vmem:[%s8129_s7 + $0x200] sm:$0xff]  ;;  %v8587_v51 = vsub.s32 0, %v8542_v37  ;;  %v811_v61 = vld [vmem:[%s8129_s7 + $0x218] sm:$0xff] }
 0x10a   : > { %11144 = vst [vmem:[#allocation23_spill] sm:$0xff] %v8571_v30  ;;  %v8590_v30 = vsub.s32 1, %v8542_v37  ;;  %11151 = vst [vmem:[#allocation30_spill] sm:$0xff] %v8603_v0  ;;  %v812_v63 = vld [vmem:[%s8129_s7 + $0x220] sm:$0xff]  ;;  %v1098_v0 = vmul.f32 %v808_v29, %v8151_v6 }
 0x10b   : > { %1256 = vadd.xlane.f32.xlu1 %v1255_v10  ;;  %1253 = vadd.xlane.f32.xlu0 %v1252_v11  ;;  %v8555_v10 = vsel %vm904_vm0, %v1084_v58, 0.0  ;;  %v8574_v58 = vsel %vm904_vm0, %v1091_v40, 0.0  ;;  %v8577_v11 = vsel %vm904_vm0, %v1090_v45, 0.0  ;;  %11147 = vst [vmem:[#allocation26_spill] sm:$0xff] %v8587_v51  ;;  %v8593_v40 = vsub.s32 2, %v8542_v37  ;;  %v816_v29 = vld [vmem:[%s8129_s7 + $0x240] sm:$0xff] }
 0x10c   : > { %11139 = vst [vmem:[#allocation18_spill] sm:$0xff] %v8555_v10  ;;  %11145 = vst [vmem:[#allocation24_spill] sm:$0xff] %v8574_v58  ;;  %v1092_v45 = vmul.f32 %v802_v25, %v8305_v59  ;;  %v8600_v58 = vsub.s32 3, %v8542_v37  ;;  %v2961_v51 = vunpack.c.0.s8 %v2960_v49  ;;  %v813_v25 = vld [vmem:[%s8129_s7 + $0x228] sm:$0xff]  ;;  %v8612_v10 = vsub.s32 5, %v8542_v37 }
 0x10d   : > { %11146 = vst [vmem:[#allocation25_spill] sm:$0xff] %v8577_v11  ;;  %11148 = vst [vmem:[#allocation27_spill] sm:$0xff] %v8590_v30  ;;  %v810_v11 = vld [vmem:[%s8129_s7 + $0x210] sm:$0xff]  ;;  %v1095_v30 = vmul.f32 %v805_v21, %v8313_v3  ;;  %v1099_v49 = vmul.f32 %v809_v12, %v8162_v13  ;;  %v8619_v21 = vsub.s32 6, %v8542_v37  ;;  %v1103_v13 = vmul.f32 %v813_v25, %v8166_v15 }
 0x10e   : > { %11149 = vst [vmem:[#allocation28_spill] sm:$0xff] %v8593_v40  ;;  %11150 = vst [vmem:[#allocation29_spill] sm:$0xff] %v8600_v58  ;;  %v1094_v40 = vmul.f32 %v804_v23, %v8317_v8  ;;  %v1096_v58 = vmul.f32 %v806_v41, %v8329_v22  ;;  %v8622_v23 = vsel %vm904_vm0, %v1093_v39, 0.0  ;;  %v1100_v57 = vmul.f32 %v810_v11, %v8147_v4  ;;  %v818_v39 = vld [vmem:[%s8129_s7 + $0x250] sm:$0xff] }
 0x10f   : > { %1262 = vadd.xlane.f32.xlu1 %v8459_v16  ;;  %1259 = vadd.xlane.f32.xlu0 %v8462_v18  ;;  %v1097_v16 = vmul.f32 %v807_v62, %v8325_v20  ;;  %11152 = vst [vmem:[#allocation31_spill] sm:$0xff] %v8612_v10  ;;  %v815_v18 = vld [vmem:[%s8129_s7 + $0x238] sm:$0xff]  ;;  %11153 = vst [vmem:[#allocation32_spill] sm:$0xff] %v8619_v21  ;;  %v1101_v62 = vmul.f32 %v811_v61, %v8156_v9  ;;  %v814_v10 = vld [vmem:[%s8129_s7 + $0x230] sm:$0xff]  ;;  %v8628_v41 = vsub.s32 7, %v8542_v37 }
 0x110   : > { %v8632_v6 = vsel %vm904_vm0, %v1092_v45, 0.0  ;;  %v1102_v12 = vmul.f32 %v812_v63, %v8172_v19  ;;  %v817_v9 = vld [vmem:[%s8129_s7 + $0x248] sm:$0xff]  ;;  %v8639_v4 = vsub.s32 %v2961_v51, %v8542_v37  ;;  %v8643_v11 = vsel %vm904_vm0, %v1095_v30, 0.0  ;;  %v819_v63 = vld [vmem:[%s8129_s7 + $0x258] sm:$0xff]  ;;  %v820_v61 = vld [vmem:[%s8129_s7 + $0x260] sm:$0xff] }
 0x111   : > { %11154 = vst [vmem:[#allocation33_spill] sm:$0xff] %v8628_v41  ;;  %v8649_v15 = vsel %vm904_vm0, %v1097_v16, 0.0  ;;  %v1105_v19 = vmul.f32 %v815_v18, %v8181_v26  ;;  %v8655_v51 = vsel %vm904_vm0, %v1096_v58, 0.0  ;;  %v8661_v30 = vsel %vm904_vm0, %v1098_v0, 0.0  ;;  %v821_v45 = vld [vmem:[%s8129_s7 + $0x268] sm:$0xff]  ;;  %v823_v16 = vld [vmem:[%s8129_s7 + $0x278] sm:$0xff] }
 0x112   : > { %11155 = vst [vmem:[#allocation34_spill] sm:$0xff] %v8639_v4  ;;  %v8668_v26 = vsel %vm904_vm0, %v1101_v62, 0.0  ;;  %v8671_v25 = vsel %vm904_vm0, %v1100_v57, 0.0  ;;  %v1107_v58 = vmul.f32 %v817_v9, %v8193_v34  ;;  %v822_v0 = vld [vmem:[%s8129_s7 + $0x270] sm:$0xff]  ;;  %v825_v18 = vld [vmem:[%s8129_s7 + $0x288] sm:$0xff]  ;;  %v1109_v62 = vmul.f32 %v819_v63, %v8205_v42  ;;  %v824_v34 = vld [vmem:[%s8129_s7 + $0x280] sm:$0xff] }
 0x113   : > { %1268 = vadd.xlane.f32.xlu1 %v8470_v31  ;;  %1265 = vadd.xlane.f32.xlu0 %v8473_v32  ;;  %v8646_v31 = vsel %vm904_vm0, %v1094_v40, 0.0  ;;  %v8658_v32 = vsel %vm904_vm0, %v1099_v49, 0.0  ;;  %v1104_v40 = vmul.f32 %v814_v10, %v8185_v28  ;;  %v1106_v49 = vmul.f32 %v816_v29, %v8197_v36  ;;  %v827_v9 = vld [vmem:[%s8129_s7 + $0x298] sm:$0xff]  ;;  %v11156_v36 = vld [vmem:[#allocation11_spill] sm:$0xff]  ;;  %v829_v42 = vld [vmem:[%s8129_s7 + $0x2a8] sm:$0xff] }
 0x114   : > { %v8679_v28 = vsel %vm904_vm0, %v1103_v13, 0.0  ;;  %v8682_v10 = vsel %vm904_vm0, %v1102_v12, 0.0  ;;  %v1108_v57 = vmul.f32 %v818_v39, %v8209_v44  ;;  %v8690_v29 = vsel %vm904_vm0, %v1105_v19, 0.0  ;;  %v11157_v12 = vld [vmem:[#allocation9_spill] sm:$0xff]  ;;  %v826_v41 = vld [vmem:[%s8129_s7 + $0x290] sm:$0xff] }
 0x115   : > { %v1110_v13 = vmul.f32 %v820_v61, %v8221_v52  ;;  %v1113_v4 = vmul.f32 %v823_v16, %v11157_v12  ;;  %v8700_v44 = vsel %vm904_vm0, %v1104_v40, 0.0  ;;  %v11158_v63 = vlaneseq  ;;  %v828_v21 = vld [vmem:[%s8129_s7 + $0x2a0] sm:$0xff]  ;;  %v11159_v61 = vld [vmem:[#allocation12_spill] sm:$0xff] }
 0x116   : > { %v1112_v19 = vmul.f32 %v822_v0, %v8233_v60  ;;  %v8712_v52 = vsel %vm904_vm0, %v1106_v49, 0.0  ;;  %v1117_v40 = vmul.f32 %v827_v9, %v8253_v14  ;;  %v8718_v16 = vsel %vm904_vm0, %v1109_v62, 0.0  ;;  %v831_v0 = vld [vmem:[%s8129_s7 + $0x2b8] sm:$0xff]  ;;  %v11161_v9 = vld [vmem:[#allocation10_spill] sm:$0xff] }
 0x117   : > { %1274 = vadd.xlane.f32.xlu1 %v8476_v33  ;;  %1271 = vadd.xlane.f32.xlu0 %v11156_v36  ;;  %v1111_v33 = vmul.f32 %v821_v45, %v8217_v50  ;;  %v8703_v39 = vand.u32 127, %v11158_v63  ;;  %v1115_v36 = vmul.f32 %v825_v18, %v8241_v2  ;;  %v8709_v50 = vsel %vm904_vm0, %v1107_v58, 0.0  ;;  %v11160_v18 = vld [vmem:[#allocation13_spill] sm:$0xff]  ;;  %v835_v63 = vld [vmem:[%s8129_s7 + $0x2d8] sm:$0xff] }
 0x118   : > { %v1114_v45 = vmul.f32 %v824_v34, %v8245_v5  ;;  %v8721_v60 = vsel %vm904_vm0, %v1108_v57, 0.0  ;;  %v1116_v2 = vmul.f32 %v826_v41, %v8257_v17  ;;  %v1119_v58 = vmul.f32 %v829_v42, %v8265_v24  ;;  %v830_v34 = vld [vmem:[%s8129_s7 + $0x2b0] sm:$0xff] }
 0x119   : > { %v8728_v5 = vsel %vm904_vm0, %v1111_v33, 0.0  ;;  %v8731_v14 = vsel %vm904_vm0, %v1110_v13, 0.0  ;;  %v8734_v62 = vsel %vm904_vm0, %v1113_v4, 0.0  ;;  %v1118_v57 = vmul.f32 %v828_v21, %v8269_v27 }
 0x11a   : > { %v4625_v24 = vadd.s32 4294967288, %v8703_v39  ;;  %v8741_v12 = vsel %vm904_vm0, %v1112_v19, 0.0  ;;  %v8744_v33 = vsel %vm904_vm0, %v1115_v36, 0.0  ;;  %v8748_v4 = vsel %vm904_vm0, %v1114_v45, 0.0 }
 0x11b   : > { %1280 = vadd.xlane.f32.xlu1 %v11159_v61  ;;  %1277 = vadd.xlane.f32.xlu0 %v11160_v18  ;;  %v8751_v27 = vsel %vm904_vm0, %v1117_v40, 0.0  ;;  %v1121_v21 = vmul.f32 %v831_v0, %v8277_v35  ;;  %v11162_v61 = vld [vmem:[#allocation14_spill] sm:$0xff]  ;;  %v8756_v19 = vsel %vm904_vm0, %v1116_v2, 0.0  ;;  %v8759_v36 = vsel %vm904_vm0, %v1119_v58, 0.0  ;;  %v832_v2 = vld [vmem:[%s8129_s7 + $0x2c0] sm:$0xff] }
 0x11c   : > { %v913_v49 = vpop.xlane.xlu1 %912  ;;  %v907_v41 = vpop.xlane.xlu0 %906  ;;  %v1120_v18 = vmul.f32 %v830_v34, %v8281_v38  ;;  %v8764_v40 = vstv %s8692_s30  ;;  %v4639_v35 = vadd.s32 4294967272, %v8703_v39  ;;  %v8768_v0 = vsel %vm904_vm0, %v1118_v57, 0.0 }
 0x11d   : > { %v1004_v17 = vadd.f32 %v11161_v9, %v913_v49  ;;  %v1002_v13 = vadd.f32 %v11161_v9, %v907_v41  ;;  %v11163_v41 = vld [vmem:[#allocation15_spill] sm:$0xff]  ;;  %11164 = vst [vmem:[#allocation11_spill] sm:$0xff] %v8764_v40  ;;  %v8774_v38 = vsub.s32 %v4625_v24, %v8542_v37  ;;  %v4632_v34 = vadd.s32 4294967280, %v8703_v39  ;;  %v11168_v40 = vld [vmem:[#allocation16_spill] sm:$0xff] }
 0x11e   : > { %v8783_v57 = vsel %vm904_vm0, %v1121_v21, 0.0  ;;  %v8788_v24 = vsel %vm904_vm0, %v1120_v18, 0.0  ;;  %v8795_v21 = vsub.s32 %v4639_v35, %v8542_v37  ;;  %v4667_v35 = vadd.s32 4294967240, %v8703_v39 }
 0x11f   : > { %v6702_v42 = vmul.f32 -1.442695, %v1004_v17  ;;  %1286 = vadd.xlane.f32.xlu1 %v11162_v61  ;;  %v6700_v49 = vmul.f32 -1.442695, %v1002_v13  ;;  %1283 = vadd.xlane.f32.xlu0 %v11163_v41  ;;  %v833_v17 = vld [vmem:[%s8129_s7 + $0x2c8] sm:$0xff]  ;;  %11165 = vst [vmem:[#allocation9_spill] sm:$0xff] %v8774_v38  ;;  %v8780_v41 = vsub.s32 %v8703_v39, %v8542_v37 }
 0x120   : > { %v916_v45 = vpop.xlane.xlu1 %915  ;;  %v910_v61 = vpop.xlane.xlu0 %909  ;;  %11167 = vst [vmem:[#allocation13_spill] sm:$0xff] %v8788_v24  ;;  %11169 = vst [vmem:[#allocation10_spill] sm:$0xff] %v8795_v21 }
 0x121   : > { %6990 = vpow2.f32 %v6702_v42  ;;  %v1005_v58 = vadd.f32 %v11161_v9, %v916_v45  ;;  %v1003_v13 = vadd.f32 %v11161_v9, %v910_v61  ;;  %11166 = vst [vmem:[#allocation12_spill] sm:$0xff] %v8780_v41  ;;  %v1123_v45 = vmul.f32 %v833_v17, %v8289_v46  ;;  %v834_v61 = vld [vmem:[%s8129_s7 + $0x2d0] sm:$0xff]  ;;  %v837_v17 = vld [vmem:[%s8129_s7 + $0x2e8] sm:$0xff] }
 0x122   : > { %6992 = vpow2.f32 %v6700_v49  ;;  %v1122_v49 = vmul.f32 %v832_v2, %v8293_v48  ;;  %v8801_v46 = vsub.s32 %v4632_v34, %v8542_v37  ;;  %v1125_v48 = vmul.f32 %v835_v63, %v8301_v56 }
 0x123   : > { %v6703_v42 = vmul.f32 -1.442695, %v1005_v58  ;;  %1292 = vadd.xlane.f32.xlu1 %v8510_v1  ;;  %v6701_v38 = vmul.f32 -1.442695, %v1003_v13  ;;  %1289 = vadd.xlane.f32.xlu0 %v11168_v40  ;;  %v4653_v58 = vadd.s32 4294967256, %v8703_v39  ;;  %v4646_v1 = vadd.s32 4294967264, %v8703_v39 }
 0x124   : > { %v922_v41 = vpop.xlane.xlu1 %921  ;;  %v919_v24 = vpop.xlane.xlu0 %918  ;;  %11170 = vst [vmem:[#allocation14_spill] sm:$0xff] %v8801_v46  ;;  %v1124_v2 = vmul.f32 %v834_v61, %v8305_v59  ;;  %v836_v13 = vld [vmem:[%s8129_s7 + $0x2e0] sm:$0xff]  ;;  %v8812_v34 = vsel %vm904_vm0, %v1123_v45, 0.0  ;;  %v8815_v56 = vsel %vm904_vm0, %v1122_v49, 0.0  ;;  %v8827_v49 = vsel %vm904_vm0, %v1125_v48, 0.0 }
 0x125   : > { %6994 = vpow2.f32 %v6703_v42  ;;  %v1007_v18 = vadd.f32 %v11161_v9, %v922_v41  ;;  %v1006_v40 = vadd.f32 %v11161_v9, %v919_v24  ;;  %v4660_v41 = vadd.s32 4294967248, %v8703_v39 }
 0x126   : > { %6996 = vpow2.f32 %v6701_v38  ;;  %v8819_v59 = vsub.s32 %v4653_v58, %v8542_v37  ;;  %v8822_v42 = vsub.s32 %v4646_v1, %v8542_v37  ;;  %v1126_v61 = vmul.f32 %v836_v13, %v8317_v8 }
 0x127   : > { %v6705_v21 = vmul.f32 -1.442695, %v1007_v18  ;;  %1298 = vadd.xlane.f32.xlu1 %v8527_v53  ;;  %v6704_v63 = vmul.f32 -1.442695, %v1006_v40  ;;  %1295 = vadd.xlane.f32.xlu0 %v8533_v54  ;;  %v1127_v53 = vmul.f32 %v837_v17, %v8313_v3  ;;  %v839_v18 = vld [vmem:[%s8129_s7 + $0x2f8] sm:$0xff]  ;;  %v8833_v58 = vsub.s32 %v4667_v35, %v8542_v37  ;;  %v838_v3 = vld [vmem:[%s8129_s7 + $0x2f0] sm:$0xff] }
 0x128   : > { %v928_v38 = vpop.xlane.xlu1 %927  ;;  %11171 = vst [vmem:[#allocation15_spill] sm:$0xff] %v8819_v59  ;;  %11172 = vst [vmem:[#allocation16_spill] sm:$0xff] %v8822_v42  ;;  %v925_v45 = vpop.xlane.xlu0 %924  ;;  %v4681_v1 = vadd.s32 4294967224, %v8703_v39  ;;  %v8837_v40 = vsel %vm904_vm0, %v1124_v2, 0.0  ;;  %v8842_v48 = vsub.s32 %v4660_v41, %v8542_v37  ;;  %v4674_v8 = vadd.s32 4294967232, %v8703_v39 }
 0x129   : > { %6998 = vpow2.f32 %v6705_v21  ;;  %v1009_v24 = vadd.f32 %v11161_v9, %v928_v38  ;;  %v1008_v54 = vadd.f32 %v11161_v9, %v925_v45  ;;  %11173 = vst [vmem:[#allocation35_spill] sm:$0xff] %v8833_v58  ;;  %v8847_v2 = vsel %vm904_vm0, %v1127_v53, 0.0  ;;  %v7637_v58 = vld [vmem:[%s8144_s22 + $0x30] sm:$0xff] }
 0x12a   : > { %7000 = vpow2.f32 %v6704_v63  ;;  %11174 = vst [vmem:[#allocation36_spill] sm:$0xff] %v8842_v48  ;;  %11175 = vst [vmem:[#allocation37_spill] sm:$0xff] %v8847_v2  ;;  %v1129_v63 = vmul.f32 %v839_v18, %v8325_v20  ;;  %v1128_v48 = vmul.f32 %v838_v3, %v8329_v22  ;;  %v4695_v53 = vadd.s32 4294967208, %v8703_v39  ;;  %v841_v2 = vld [vmem:[%s8129_s7 + $0x308] sm:$0xff]  ;;  %v840_v3 = vld [vmem:[%s8129_s7 + $0x300] sm:$0xff] }
 0x12b   : > { %v6991_v21 = vpop.eup %6990  ;;  %v6707_v17 = vmul.f32 -1.442695, %v1009_v24  ;;  %1304 = vadd.xlane.f32.xlu1 %v8536_v7  ;;  %v6706_v38 = vmul.f32 -1.442695, %v1008_v54  ;;  %1301 = vadd.xlane.f32.xlu0 %v8539_v55  ;;  %v8852_v24 = vsel %vm904_vm0, %v1126_v61, 0.0  ;;  %v8857_v55 = vsub.s32 %v4681_v1, %v8542_v37 }
 0x12c   : > { %v6993_v13 = vpop.eup %6992  ;;  %v1772_v35 = vadd.f32 1.0, %v6991_v21  ;;  %v934_v45 = vpop.xlane.xlu1 %933  ;;  %11176 = vst [vmem:[#allocation38_spill] sm:$0xff] %v8852_v24  ;;  %v8863_v61 = vsub.s32 %v4674_v8, %v8542_v37  ;;  %v4688_v22 = vadd.s32 4294967216, %v8703_v39 }
 0x12d   : > { %7002 = vpow2.f32 %v6707_v17  ;;  %v1011_v7 = vadd.f32 %v11161_v9, %v934_v45  ;;  %v931_v41 = vpop.xlane.xlu0 %930  ;;  %v1770_v21 = vadd.f32 1.0, %v6993_v13  ;;  %11177 = vst [vmem:[#allocation39_spill] sm:$0xff] %v8857_v55  ;;  %v11182_v55 = vld [vmem:[#allocation17_spill] sm:$0xff] }
 0x12e   : > { %v1010_v54 = vadd.f32 %v11161_v9, %v931_v41  ;;  %7004 = vrcp.f32 %v1772_v35  ;;  %11178 = vst [vmem:[#allocation40_spill] sm:$0xff] %v8863_v61  ;;  %v8869_v35 = vsel %vm904_vm0, %v1129_v63, 0.0  ;;  %v7630_v41 = vld [vmem:[%s8144_s22 + $0x8] sm:$0xff] }
 0x12f   : > { %v6995_v20 = vpop.eup %6994  ;;  %v6709_v18 = vmul.f32 -1.442695, %v1011_v7  ;;  %1310 = vadd.xlane.f32.xlu1 %v8545_v47  ;;  %7006 = vpow2.f32 %v6706_v38  ;;  %1307 = vadd.xlane.f32.xlu0 %v8548_v43  ;;  %11179 = vst [vmem:[#allocation41_spill] sm:$0xff] %v8869_v35  ;;  %v8873_v7 = vsel %vm904_vm0, %v1128_v48, 0.0  ;;  %v1131_v61 = vmul.f32 %v7630_v41, %v841_v2  ;;  %v7631_v43 = vld [vmem:[%s8144_s22] sm:$0xff] }
 0x130   : > { %v6997_v17 = vpop.eup %6996  ;;  %v1773_v13 = vadd.f32 1.0, %v6995_v20  ;;  %v6708_v1 = vmul.f32 -1.442695, %v1010_v54  ;;  %v940_v45 = vpop.xlane.xlu1 %939  ;;  %11180 = vst [vmem:[#allocation42_spill] sm:$0xff] %v8873_v7  ;;  %v8878_v54 = vsub.s32 %v4695_v53, %v8542_v37  ;;  %v1130_v63 = vmul.f32 %v7631_v43, %v840_v3  ;;  %v843_v7 = vld [vmem:[%s8129_s7 + $0x318] sm:$0xff]  ;;  %v842_v3 = vld [vmem:[%s8129_s7 + $0x310] sm:$0xff] }
 0x131   : > { %7008 = vpow2.f32 %v6709_v18  ;;  %v1013_v47 = vadd.f32 %v11161_v9, %v940_v45  ;;  %v937_v8 = vpop.xlane.xlu0 %936  ;;  %v1771_v18 = vadd.f32 1.0, %v6997_v17  ;;  %v4709_v48 = vadd.s32 4294967192, %v8703_v39 }
 0x132   : > { %7010 = vrcp.f32 %v1770_v21  ;;  %v1012_v38 = vadd.f32 %v11161_v9, %v937_v8  ;;  %11181 = vst [vmem:[#allocation43_spill] sm:$0xff] %v8878_v54  ;;  %v11183_v21 = vld [vmem:[#allocation18_spill] sm:$0xff]  ;;  %v8886_v8 = vsub.s32 %v4688_v22, %v8542_v37  ;;  %v7632_v22 = vld [vmem:[%s8144_s22 + $0x18] sm:$0xff] }
 0x133   : > { %v6999_v20 = vpop.eup %6998  ;;  %7012 = vrcp.f32 %v1773_v13  ;;  %v6711_v45 = vmul.f32 -1.442695, %v1013_v47  ;;  %1316 = vadd.xlane.f32.xlu1 %v11182_v55  ;;  %1313 = vadd.xlane.f32.xlu0 %v11183_v21  ;;  %v4702_v13 = vadd.s32 4294967200, %v8703_v39  ;;  %v8892_v47 = vsel %vm904_vm0, %v1131_v61, 0.0 }
 0x134   : > { %v1775_v35 = vadd.f32 1.0, %v6999_v20  ;;  %7014 = vpow2.f32 %v6708_v1  ;;  %v6710_v2 = vmul.f32 -1.442695, %v1012_v38  ;;  %v946_v53 = vpop.xlane.xlu1 %945  ;;  %11184 = vst [vmem:[#allocation17_spill] sm:$0xff] %v8886_v8  ;;  %v7001_v41 = vpop.eup %7000  ;;  %11185 = vst [vmem:[#allocation18_spill] sm:$0xff] %v8892_v47  ;;  %v8896_v38 = vsel %vm904_vm0, %v1130_v63, 0.0 }
 0x135   : > { %7016 = vpow2.f32 %v6711_v45  ;;  %v1015_v17 = vadd.f32 %v11161_v9, %v946_v53  ;;  %v943_v55 = vpop.xlane.xlu0 %942  ;;  %11186 = vst [vmem:[#allocation44_spill] sm:$0xff] %v8896_v38  ;;  %v1133_v43 = vmul.f32 %v7632_v22, %v843_v7  ;;  %v11187_v45 = vld [vmem:[#allocation19_spill] sm:$0xff]  ;;  %v8901_v53 = vsub.s32 %v4709_v48, %v8542_v37  ;;  %v11189_v63 = vld [vmem:[#allocation20_spill] sm:$0xff]  ;;  %v7635_v47 = vld [vmem:[%s8144_s22 + $0x20] sm:$0xff] }
 0x136   : > { %7018 = vrcp.f32 %v1775_v35  ;;  %v1014_v1 = vadd.f32 %v11161_v9, %v943_v55  ;;  %v7633_v8 = vld [vmem:[%s8144_s22 + $0x10] sm:$0xff]  ;;  %v1774_v54 = vadd.f32 1.0, %v7001_v41  ;;  %v8909_v48 = vsub.s32 %v4702_v13, %v8542_v37 }
 0x137   : > { %v7003_v20 = vpop.eup %7002  ;;  %7020 = vrcp.f32 %v1771_v18  ;;  %v6713_v21 = vmul.f32 -1.442695, %v1015_v17  ;;  %1322 = vadd.xlane.f32.xlu1 %v11187_v45  ;;  %11188 = vst [vmem:[#allocation19_spill] sm:$0xff] %v8901_v53  ;;  %v1132_v61 = vmul.f32 %v7633_v8, %v842_v3  ;;  %1319 = vadd.xlane.f32.xlu0 %v11189_v63  ;;  %v4723_v8 = vadd.s32 4294967176, %v8703_v39  ;;  %v845_v3 = vld [vmem:[%s8129_s7 + $0x328] sm:$0xff]  ;;  %v11192_v45 = vld [vmem:[#allocation21_spill] sm:$0xff] }
 0x138   : > { %v1777_v35 = vadd.f32 1.0, %v7003_v20  ;;  %7022 = vpow2.f32 %v6710_v2  ;;  %v6712_v55 = vmul.f32 -1.442695, %v1014_v1  ;;  %v952_v38 = vpop.xlane.xlu1 %951  ;;  %v8905_v7 = vpop.eup %7004  ;;  %11190 = vst [vmem:[#allocation20_spill] sm:$0xff] %v8909_v48  ;;  %v4716_v1 = vadd.s32 4294967184, %v8703_v39  ;;  %v846_v48 = vld [vmem:[%s8129_s7 + $0x330] sm:$0xff] }
 0x139   : > { %7024 = vpow2.f32 %v6713_v21  ;;  %v1017_v18 = vadd.f32 %v11161_v9, %v952_v38  ;;  %v949_v17 = vpop.xlane.xlu0 %948  ;;  %v7007_v2 = vpop.eup %7006  ;;  %v8916_v22 = vsel %vm904_vm0, %v1133_v43, 0.0  ;;  %v844_v38 = vld [vmem:[%s8129_s7 + $0x320] sm:$0xff]  ;;  %v8921_v63 = vsel %vm904_vm0, %v1132_v61, 0.0  ;;  %v11194_v53 = vld [vmem:[#allocation23_spill] sm:$0xff] }
 0x13a   : > { %7026 = vrcp.f32 %v1777_v35  ;;  %v1016_v41 = vadd.f32 %v11161_v9, %v949_v17  ;;  %11191 = vst [vmem:[#allocation45_spill] sm:$0xff] %v8916_v22  ;;  %v1776_v21 = vadd.f32 1.0, %v7007_v2  ;;  %11193 = vst [vmem:[#allocation21_spill] sm:$0xff] %v8921_v63  ;;  %v847_v35 = vld [vmem:[%s8129_s7 + $0x338] sm:$0xff]  ;;  %v8933_v63 = vsub.s32 %v4723_v8, %v8542_v37 }
 0x13b   : > { %v7009_v20 = vpop.eup %7008  ;;  %7028 = vpow2.f32 %v6712_v55  ;;  %v6715_v13 = vmul.f32 -1.442695, %v1017_v18  ;;  %1328 = vadd.xlane.f32.xlu1 %v11192_v45  ;;  %1325 = vadd.xlane.f32.xlu0 %v11194_v53  ;;  %v7634_v55 = vld [vmem:[%s8144_s22 + $0x28] sm:$0xff]  ;;  %v7636_v53 = vld [vmem:[%s8144_s22 + $0x38] sm:$0xff]  ;;  %v8941_v8 = vsub.s32 %v4716_v1, %v8542_v37 }
 0x13c   : > { %v8925_v17 = vpop.eup %7010  ;;  %7030 = vrcp.f32 %v1774_v54  ;;  %v1779_v39 = vadd.f32 1.0, %v7009_v20  ;;  %v6714_v43 = vmul.f32 -1.442695, %v1016_v41  ;;  %v958_v2 = vpop.xlane.xlu1 %957  ;;  %v1135_v18 = vmul.f32 %v7634_v55, %v845_v3  ;;  %11195 = vst [vmem:[#allocation23_spill] sm:$0xff] %v8933_v63 }
 0x13d   : > { %v8929_v22 = vpop.eup %7012  ;;  %7032 = vrcp.f32 %v1776_v21  ;;  %v1019_v61 = vadd.f32 %v11161_v9, %v958_v2  ;;  %v955_v45 = vpop.xlane.xlu0 %954  ;;  %v1134_v54 = vmul.f32 %v7635_v47, %v844_v38  ;;  %v1137_v24 = vmul.f32 %v7636_v53, %v847_v35  ;;  %v11196_v2 = vld [vmem:[#allocation24_spill] sm:$0xff] }
 0x13e   : > { %v7015_v20 = vpop.eup %7014  ;;  %7034 = vrcp.f32 %v1779_v39  ;;  %v1018_v41 = vadd.f32 %v11161_v9, %v955_v45  ;;  %v1136_v3 = vmul.f32 %v7637_v58, %v846_v48  ;;  %11197 = vst [vmem:[#allocation24_spill] sm:$0xff] %v8941_v8  ;;  %v11198_v45 = vld [vmem:[#allocation25_spill] sm:$0xff]  ;;  %v8945_v58 = vsel %vm904_vm0, %v1135_v18, 0.0  ;;  %v849_v48 = vld [vmem:[%s8129_s7 + $0x348] sm:$0xff]  ;;  %v851_v53 = vld [vmem:[%s8129_s7 + $0x358] sm:$0xff] }
 0x13f   : > { %v7017_v55 = vpop.eup %7016  ;;  %v1778_v42 = vadd.f32 1.0, %v7015_v20  ;;  %7036 = vpow2.f32 %v6715_v13  ;;  %v6717_v21 = vmul.f32 -1.442695, %v1019_v61  ;;  %1334 = vadd.xlane.f32.xlu1 %v11196_v2  ;;  %1331 = vadd.xlane.f32.xlu0 %v11198_v45  ;;  %v11199_v61 = vld [vmem:[#allocation22_spill] sm:$0xff]  ;;  %v8961_v2 = vsel %vm904_vm0, %v1137_v24, 0.0 }
 0x140   : > { %v7019_v47 = vpop.eup %7018  ;;  %v1781_v38 = vadd.f32 1.0, %v7017_v55  ;;  %7038 = vpow2.f32 %v6714_v43  ;;  %v6716_v39 = vmul.f32 -1.442695, %v1018_v41  ;;  %v964_v35 = vpop.xlane.xlu1 %963  ;;  %v8955_v43 = vsel %vm904_vm0, %v1134_v54, 0.0  ;;  %v848_v41 = vld [vmem:[%s8129_s7 + $0x340] sm:$0xff]  ;;  %11202 = vst [vmem:[#allocation47_spill] sm:$0xff] %v8961_v2 }
 0x141   : > { %v8948_v13 = vpop.eup %7020  ;;  %v8951_v20 = vadd.f32 %v7019_v47, %v11199_v61  ;;  %7040 = vrcp.f32 %v1778_v42  ;;  %v1021_v37 = vadd.f32 %v11161_v9, %v964_v35  ;;  %v961_v1 = vpop.xlane.xlu0 %960  ;;  %11201 = vst [vmem:[#allocation46_spill] sm:$0xff] %v8955_v43  ;;  %v8964_v42 = vsel %vm904_vm0, %v1136_v3, 0.0  ;;  %v7638_v35 = vld [vmem:[%s8144_s22 + $0x48] sm:$0xff]  ;;  %v7639_v3 = vld [vmem:[%s8144_s22 + $0x40] sm:$0xff]  ;;  %v7640_v2 = vld [vmem:[%s8144_s22 + $0x58] sm:$0xff] }
 0x142   : > { %v7023_v55 = vpop.eup %7022  ;;  %7042 = vrcp.f32 %v1781_v38  ;;  %v1020_v18 = vadd.f32 %v11161_v9, %v961_v1  ;;  %11203 = vst [vmem:[#allocation48_spill] sm:$0xff] %v8964_v42  ;;  %v850_v38 = vld [vmem:[%s8129_s7 + $0x350] sm:$0xff]  ;;  %v1138_v42 = vmul.f32 %v7639_v3, %v848_v41  ;;  %v853_v43 = vld [vmem:[%s8129_s7 + $0x368] sm:$0xff] }
 0x143   : > { %11200 = vst [vmem:[#allocation25_spill] sm:$0xff] %v8951_v20  ;;  %v7025_v47 = vpop.eup %7024  ;;  %v1780_v45 = vadd.f32 1.0, %v7023_v55  ;;  %7044 = vpow2.f32 %v6717_v21  ;;  %v6719_v54 = vmul.f32 -1.442695, %v1021_v37  ;;  %1340 = vadd.xlane.f32.xlu1 %v8622_v23  ;;  %v1139_v20 = vmul.f32 %v7638_v35, %v849_v48  ;;  %1337 = vadd.xlane.f32.xlu0 %v8632_v6 }
 0x144   : > { %v7027_v8 = vpop.eup %7026  ;;  %v1783_v1 = vadd.f32 1.0, %v7025_v47  ;;  %7046 = vpow2.f32 %v6716_v39  ;;  %v970_v24 = vpop.xlane.xlu1 %969  ;;  %v1141_v55 = vmul.f32 %v7640_v2, %v851_v53  ;;  %v6718_v23 = vmul.f32 -1.442695, %v1020_v18  ;;  %v852_v39 = vld [vmem:[%s8129_s7 + $0x360] sm:$0xff]  ;;  %v7641_v53 = vld [vmem:[%s8144_s22 + $0x50] sm:$0xff] }
 0x145   : > { %v7029_v21 = vpop.eup %7028  ;;  %v8974_v37 = vadd.f32 %v7027_v8, %v11199_v61  ;;  %7048 = vrcp.f32 %v1780_v45  ;;  %v1023_v48 = vadd.f32 %v11161_v9, %v970_v24  ;;  %v967_v47 = vpop.xlane.xlu0 %966  ;;  %v1140_v2 = vmul.f32 %v7641_v53, %v850_v38  ;;  %v7642_v45 = vld [vmem:[%s8144_s22 + $0x68] sm:$0xff] }
 0x146   : > { %v8978_v35 = vpop.eup %7030  ;;  %7050 = vrcp.f32 %v1783_v1  ;;  %v1782_v6 = vadd.f32 1.0, %v7029_v21  ;;  %v1022_v41 = vadd.f32 %v11161_v9, %v967_v47  ;;  %v8984_v18 = vsel %vm904_vm0, %v1139_v20, 0.0 }
 0x147   : > { %11204 = vst [vmem:[#allocation49_spill] sm:$0xff] %v8974_v37  ;;  %v7033_v3 = vpop.eup %7032  ;;  %7052 = vpow2.f32 %v6719_v54  ;;  %v6721_v8 = vmul.f32 -1.442695, %v1023_v48  ;;  %1346 = vadd.xlane.f32.xlu1 %v8643_v11  ;;  %v1143_v24 = vmul.f32 %v7642_v45, %v853_v43  ;;  %1343 = vadd.xlane.f32.xlu0 %v8646_v31  ;;  %v7643_v54 = vld [vmem:[%s8144_s22 + $0x60] sm:$0xff]  ;;  %v8996_v43 = vsel %vm904_vm0, %v1138_v42, 0.0 }
 0x148   : > { %v8987_v37 = vpop.eup %7034  ;;  %v8990_v1 = vadd.f32 %v7033_v3, %v11199_v61  ;;  %7054 = vrcp.f32 %v1782_v6  ;;  %v6720_v21 = vmul.f32 -1.442695, %v1022_v41  ;;  %v976_v38 = vpop.xlane.xlu1 %975  ;;  %v1142_v48 = vmul.f32 %v7643_v54, %v852_v39 }
 0x149   : > { %11205 = vst [vmem:[#allocation50_spill] sm:$0xff] %v8987_v37  ;;  %v7037_v47 = vpop.eup %7036  ;;  %7056 = vpow2.f32 %v6718_v23  ;;  %v1025_v11 = vadd.f32 %v11161_v9, %v976_v38  ;;  %v973_v20 = vpop.xlane.xlu0 %972  ;;  %v8999_v53 = vsel %vm904_vm0, %v1141_v55, 0.0  ;;  %v9003_v3 = vsel %vm904_vm0, %v1140_v2, 0.0  ;;  %v855_v23 = vld [vmem:[%s8129_s7 + $0x378] sm:$0xff]  ;;  %v854_v55 = vld [vmem:[%s8129_s7 + $0x370] sm:$0xff] }
 0x14a   : > { %11206 = vst [vmem:[#allocation51_spill] sm:$0xff] %v8990_v1  ;;  %v7039_v6 = vpop.eup %7038  ;;  %v1785_v41 = vadd.f32 1.0, %v7037_v47  ;;  %7058 = vpow2.f32 %v6721_v8  ;;  %v1024_v31 = vadd.f32 %v11161_v9, %v973_v20  ;;  %v9008_v42 = vsel %vm904_vm0, %v1143_v24, 0.0 }
 0x14b   : > { %v7041_v39 = vpop.eup %7040  ;;  %v1784_v45 = vadd.f32 1.0, %v7039_v6  ;;  %7060 = vpow2.f32 %v6720_v21  ;;  %v6723_v38 = vmul.f32 -1.442695, %v1025_v11  ;;  %1352 = vadd.xlane.f32.xlu1 %v8649_v15  ;;  %11207 = vst [vmem:[#allocation52_spill] sm:$0xff] %v9008_v42  ;;  %1349 = vadd.xlane.f32.xlu0 %v8655_v51  ;;  %v9016_v21 = vsel %vm904_vm0, %v1142_v48, 0.0  ;;  %v857_v15 = vld [vmem:[%s8129_s7 + $0x388] sm:$0xff] }
 0x14c   : > { %v7043_v8 = vpop.eup %7042  ;;  %v9012_v54 = vadd.f32 %v7041_v39, %v11199_v61  ;;  %7062 = vrcp.f32 %v1785_v41  ;;  %v6722_v2 = vmul.f32 -1.442695, %v1024_v31  ;;  %v982_v47 = vpop.xlane.xlu1 %981  ;;  %11209 = vst [vmem:[#allocation54_spill] sm:$0xff] %v9016_v21  ;;  %v7644_v39 = vld [vmem:[%s8144_s22 + $0x78] sm:$0xff]  ;;  %v856_v31 = vld [vmem:[%s8129_s7 + $0x380] sm:$0xff]  ;;  %v7645_v48 = vld [vmem:[%s8144_s22 + $0x70] sm:$0xff] }
 0x14d   : > { %v7045_v11 = vpop.eup %7044  ;;  %v9020_v24 = vadd.f32 %v7043_v8, %v11199_v61  ;;  %7064 = vrcp.f32 %v1784_v45  ;;  %v1027_v20 = vadd.f32 %v11161_v9, %v982_v47  ;;  %v979_v6 = vpop.xlane.xlu0 %978  ;;  %v1145_v41 = vmul.f32 %v7644_v39, %v855_v23  ;;  %v7646_v47 = vld [vmem:[%s8144_s22 + $0x88] sm:$0xff]  ;;  %v859_v39 = vld [vmem:[%s8129_s7 + $0x398] sm:$0xff] }
 0x14e   : > { %11208 = vst [vmem:[#allocation53_spill] sm:$0xff] %v9012_v54  ;;  %v7047_v54 = vpop.eup %7046  ;;  %v1787_v51 = vadd.f32 1.0, %v7045_v11  ;;  %7066 = vpow2.f32 %v6723_v38  ;;  %v1026_v1 = vadd.f32 %v11161_v9, %v979_v6  ;;  %v1144_v37 = vmul.f32 %v7645_v48, %v854_v55  ;;  %v7647_v6 = vld [vmem:[%s8144_s22 + $0x80] sm:$0xff] }
 0x14f   : > { %11210 = vst [vmem:[#allocation55_spill] sm:$0xff] %v9020_v24  ;;  %v7049_v21 = vpop.eup %7048  ;;  %v1786_v8 = vadd.f32 1.0, %v7047_v54  ;;  %7068 = vpow2.f32 %v6722_v2  ;;  %v6725_v45 = vmul.f32 -1.442695, %v1027_v20  ;;  %1358 = vadd.xlane.f32.xlu1 %v8658_v32  ;;  %v1147_v24 = vmul.f32 %v7646_v47, %v857_v15  ;;  %1355 = vadd.xlane.f32.xlu0 %v8661_v30  ;;  %v858_v47 = vld [vmem:[%s8129_s7 + $0x390] sm:$0xff] }
 0x150   : > { %v7051_v42 = vpop.eup %7050  ;;  %v9030_v23 = vadd.f32 %v7049_v21, %v11199_v61  ;;  %7070 = vrcp.f32 %v1787_v51  ;;  %v6724_v38 = vmul.f32 -1.442695, %v1026_v1  ;;  %v988_v11 = vpop.xlane.xlu1 %987  ;;  %v1146_v55 = vmul.f32 %v7647_v6, %v856_v31 }
 0x151   : > { %v7053_v48 = vpop.eup %7052  ;;  %v9036_v54 = vadd.f32 %v7051_v42, %v11199_v61  ;;  %7072 = vrcp.f32 %v1786_v8  ;;  %v1029_v32 = vadd.f32 %v11161_v9, %v988_v11  ;;  %v985_v2 = vpop.xlane.xlu0 %984  ;;  %v9040_v21 = vsel %vm904_vm0, %v1145_v41, 0.0  ;;  %v7648_v8 = vld [vmem:[%s8144_s22 + $0x98] sm:$0xff] }
 0x152   : > { %11211 = vst [vmem:[#allocation56_spill] sm:$0xff] %v9030_v23  ;;  %v7055_v1 = vpop.eup %7054  ;;  %v1789_v15 = vadd.f32 1.0, %v7053_v48  ;;  %7074 = vpow2.f32 %v6725_v45  ;;  %v1028_v30 = vadd.f32 %v11161_v9, %v985_v2  ;;  %v9044_v20 = vsel %vm904_vm0, %v1144_v37, 0.0 }
 0x153   : > { %11212 = vst [vmem:[#allocation57_spill] sm:$0xff] %v9036_v54  ;;  %v7057_v31 = vpop.eup %7056  ;;  %v9047_v42 = vadd.f32 %v7055_v1, %v11199_v61  ;;  %7076 = vpow2.f32 %v6724_v38  ;;  %v6727_v51 = vmul.f32 -1.442695, %v1029_v32  ;;  %1364 = vadd.xlane.f32.xlu1 %v8668_v26  ;;  %v1149_v41 = vmul.f32 %v7648_v8, %v859_v39  ;;  %1361 = vadd.xlane.f32.xlu0 %v8671_v25  ;;  %v861_v1 = vld [vmem:[%s8129_s7 + $0x3a8] sm:$0xff]  ;;  %v7649_v8 = vld [vmem:[%s8144_s22 + $0x90] sm:$0xff] }
 0x154   : > { %v7059_v11 = vpop.eup %7058  ;;  %7078 = vrcp.f32 %v1789_v15  ;;  %v1788_v45 = vadd.f32 1.0, %v7057_v31  ;;  %v994_v37 = vpop.xlane.xlu1 %993  ;;  %v9054_v6 = vsel %vm904_vm0, %v1147_v24, 0.0  ;;  %v9057_v48 = vsel %vm904_vm0, %v1146_v55, 0.0 }
 0x155   : > { %11213 = vst [vmem:[#allocation58_spill] sm:$0xff] %v9047_v42  ;;  %v7061_v38 = vpop.eup %7060  ;;  %v1791_v32 = vadd.f32 1.0, %v7059_v11  ;;  %7080 = vpow2.f32 %v6727_v51  ;;  %v6726_v26 = vmul.f32 -1.442695, %v1028_v30  ;;  %v1031_v39 = vadd.f32 %v11161_v9, %v994_v37  ;;  %v991_v2 = vpop.xlane.xlu0 %990 }
 0x156   : > { %v7063_v15 = vpop.eup %7062  ;;  %7082 = vrcp.f32 %v1788_v45  ;;  %v1790_v31 = vadd.f32 1.0, %v7061_v38  ;;  %v1030_v25 = vadd.f32 %v11161_v9, %v991_v2  ;;  %v1148_v24 = vmul.f32 %v7649_v8, %v858_v47  ;;  %v7650_v38 = vld [vmem:[%s8144_s22 + $0xa8] sm:$0xff] }
 0x157   : > { %v7065_v54 = vpop.eup %7064  ;;  %v9064_v55 = vadd.f32 %v7063_v15, %v11199_v61  ;;  %7084 = vrcp.f32 %v1791_v32  ;;  %v6729_v51 = vmul.f32 -1.442695, %v1031_v39  ;;  %1370 = vadd.xlane.f32.xlu1 %v8679_v28  ;;  %v9068_v30 = vsel %vm904_vm0, %v1149_v41, 0.0  ;;  %1367 = vadd.xlane.f32.xlu0 %v8682_v10  ;;  %v860_v39 = vld [vmem:[%s8129_s7 + $0x3a0] sm:$0xff] }
 0x158   : > { %v7067_v11 = vpop.eup %7066  ;;  %v9072_v45 = vadd.f32 %v8905_v7, %v11199_v61  ;;  %v9075_v37 = vadd.f32 %v7065_v54, %v11199_v61  ;;  %7086 = vrcp.f32 %v1790_v31  ;;  %v1000_v47 = vpop.xlane.xlu1 %999  ;;  %v1151_v32 = vmul.f32 %v7650_v38, %v861_v1 }
 0x159   : > { %11214 = vst [vmem:[#allocation59_spill] sm:$0xff] %v9064_v55  ;;  %v7069_v2 = vpop.eup %7068  ;;  %v1793_v28 = vadd.f32 1.0, %v7067_v11  ;;  %7088 = vpow2.f32 %v6726_v26  ;;  %v6728_v41 = vmul.f32 -1.442695, %v1030_v25  ;;  %v1033_v15 = vadd.f32 %v11161_v9, %v1000_v47  ;;  %v997_v8 = vpop.xlane.xlu0 %996  ;;  %v7651_v25 = vld [vmem:[%s8144_s22 + $0xa0] sm:$0xff] }
 0x15a   : > { %11215 = vst [vmem:[#allocation60_spill] sm:$0xff] %v9075_v37  ;;  %v9081_v7 = vpop.eup %7070  ;;  %v1792_v55 = vadd.f32 1.0, %v7069_v2  ;;  %7090 = vpow2.f32 %v6729_v51  ;;  %v1032_v54 = vadd.f32 %v11161_v9, %v997_v8  ;;  %v9085_v10 = vsel %vm904_vm0, %v1148_v24, 0.0  ;;  %v862_v37 = vld [vmem:[%s8129_s7 + $0x3b0] sm:$0xff] }
 0x15b   : > { %11216 = vst [vmem:[#allocation61_spill] sm:$0xff] %v9081_v7  ;;  %v7073_v31 = vpop.eup %7072  ;;  %v9089_v1 = vadd.f32 %v8925_v17, %v11199_v61  ;;  %7092 = vrcp.f32 %v1793_v28  ;;  %v6731_v26 = vmul.f32 -1.442695, %v1033_v15  ;;  %1376 = vadd.xlane.f32.xlu1 %v8690_v29  ;;  %v1150_v11 = vmul.f32 %v7651_v25, %v860_v39  ;;  %1373 = vadd.xlane.f32.xlu0 %v8700_v44  ;;  %v11220_v17 = vld [vmem:[#allocation26_spill] sm:$0xff] }
 0x15c   : > { %v7075_v47 = vpop.eup %7074  ;;  %v9094_v51 = vadd.f32 %v7073_v31, %v11199_v61  ;;  %7094 = vrcp.f32 %v1792_v55  ;;  %v1167_v24 = vpop.xlane.xlu1 %1166  ;;  %v9098_v38 = vsel %vm904_vm0, %v1151_v32, 0.0  ;;  %v6730_v15 = vmul.f32 -1.442695, %v1032_v54  ;;  %v863_v31 = vld [vmem:[%s8129_s7 + $0x3b8] sm:$0xff] }
 0x15d   : > { %11217 = vst [vmem:[#allocation62_spill] sm:$0xff] %v9089_v1  ;;  %11219 = vst [vmem:[#allocation64_spill] sm:$0xff] %v9098_v38  ;;  %v7077_v28 = vpop.eup %7076  ;;  %v1795_v29 = vadd.f32 1.0, %v7075_v47  ;;  %7096 = vpow2.f32 %v6728_v41  ;;  %v1547_v39 = vadd.f32 %v1167_v24, %v11161_v9  ;;  %v1164_v8 = vpop.xlane.xlu0 %1163  ;;  %v9106_v44 = vadd.f32 %v8929_v22, %v11199_v61  ;;  %v11253_v1 = vld [vmem:[#allocation11_spill] sm:$0xff] }
 0x15e   : > { %11218 = vst [vmem:[#allocation63_spill] sm:$0xff] %v9094_v51  ;;  %v7079_v25 = vpop.eup %7078  ;;  %v1794_v55 = vadd.f32 1.0, %v7077_v28  ;;  %7098 = vpow2.f32 %v6731_v26  ;;  %v1546_v32 = vadd.f32 %v1164_v8, %v11161_v9  ;;  %v9115_v54 = vsel %vm904_vm0, %v1150_v11, 0.0  ;;  %v7652_v8 = vld [vmem:[%s8144_s22 + $0xb8] sm:$0xff]  ;;  %v7653_v11 = vld [vmem:[%s8144_s22 + $0xb0] sm:$0xff] }
 0x15f   : > { %11221 = vst [vmem:[#allocation26_spill] sm:$0xff] %v9106_v44  ;;  %v7081_v2 = vpop.eup %7080  ;;  %v9111_v47 = vadd.f32 %v7079_v25, %v11199_v61  ;;  %7100 = vrcp.f32 %v1795_v29  ;;  %v6733_v41 = vmul.f32 -1.442695, %v1547_v39  ;;  %1382 = vadd.xlane.f32.xlu1 %v8709_v50  ;;  %11223 = vst [vmem:[#allocation66_spill] sm:$0xff] %v9115_v54  ;;  %1379 = vadd.xlane.f32.xlu0 %v8712_v52 }
 0x160   : > { %v7083_v22 = vpop.eup %7082  ;;  %7102 = vrcp.f32 %v1794_v55  ;;  %v1797_v24 = vadd.f32 1.0, %v7081_v2  ;;  %v6732_v28 = vmul.f32 -1.442695, %v1546_v32  ;;  %v1173_v26 = vpop.xlane.xlu1 %1172  ;;  %v1153_v42 = vmul.f32 %v7652_v8, %v863_v31  ;;  %v865_v55 = vld [vmem:[%s8129_s7 + $0x3c8] sm:$0xff] }
 0x161   : > { %11222 = vst [vmem:[#allocation65_spill] sm:$0xff] %v9111_v47  ;;  %v7085_v25 = vpop.eup %7084  ;;  %v9120_v29 = vadd.f32 %v7083_v22, %v11199_v61  ;;  %7104 = vpow2.f32 %v6730_v15  ;;  %v1549_v50 = vadd.f32 %v1173_v26, %v11161_v9  ;;  %v1170_v39 = vpop.xlane.xlu0 %1169  ;;  %v1152_v23 = vmul.f32 %v7653_v11, %v862_v37  ;;  %v7654_v11 = vld [vmem:[%s8144_s22 + $0xc8] sm:$0xff] }
 0x162   : > { %v7087_v51 = vpop.eup %7086  ;;  %v9125_v2 = vadd.f32 %v7085_v25, %v11199_v61  ;;  %7106 = vrcp.f32 %v1797_v24  ;;  %v1548_v52 = vadd.f32 %v1170_v39, %v11161_v9  ;;  %v9131_v32 = vadd.f32 %v8948_v13, %v11199_v61  ;;  %v864_v39 = vld [vmem:[%s8129_s7 + $0x3c0] sm:$0xff] }
 0x163   : > { %11224 = vst [vmem:[#allocation67_spill] sm:$0xff] %v9120_v29  ;;  %v7089_v31 = vpop.eup %7088  ;;  %v9134_v15 = vadd.f32 %v7087_v51, %v11199_v61  ;;  %7108 = vpow2.f32 %v6733_v41  ;;  %v6735_v22 = vmul.f32 -1.442695, %v1549_v50  ;;  %1388 = vadd.xlane.f32.xlu1 %v8718_v16  ;;  %v7811_v37 = vmov 0   ;;  %1385 = vadd.xlane.f32.xlu0 %v8721_v60  ;;  %v869_v29 = vld [vmem:[%s8129_s7 + $0x3e8] sm:$0xff] }
 0x164   : > { %11225 = vst [vmem:[#allocation68_spill] sm:$0xff] %v9125_v2  ;;  %6988 = vset.pattern.permute.xlu0 %v7811_v37  ;;  %v7091_v24 = vpop.eup %7090  ;;  %v1796_v26 = vadd.f32 1.0, %v7089_v31  ;;  %7110 = vpow2.f32 %v6732_v28  ;;  %v6734_v8 = vmul.f32 -1.442695, %v1548_v52  ;;  %v1179_v25 = vpop.xlane.xlu1 %1178  ;;  %v9139_v13 = vsel %vm904_vm0, %v1153_v42, 0.0  ;;  %6989 = vset.pattern.permute.xlu1 %v7811_v37 }
 0x165   : > { %11226 = vst [vmem:[#allocation69_spill] sm:$0xff] %v9134_v15  ;;  %11227 = vst [vmem:[#allocation70_spill] sm:$0xff] %v9139_v13  ;;  %v7093_v51 = vpop.eup %7092  ;;  %v1799_v41 = vadd.f32 1.0, %v7091_v24  ;;  %7112 = vpow2.f32 %v6735_v22  ;;  %v1551_v16 = vadd.f32 %v1179_v25, %v11161_v9  ;;  %v1176_v50 = vpop.xlane.xlu0 %1175  ;;  %v1155_v31 = vmul.f32 %v7654_v11, %v865_v55  ;;  %v7655_v25 = vld [vmem:[%s8144_s22 + $0xc0] sm:$0xff]  ;;  %v867_v11 = vld [vmem:[%s8129_s7 + $0x3d8] sm:$0xff] }
 0x166   : > { %v7095_v28 = vpop.eup %7094  ;;  %v9145_v52 = vadd.f32 %v7093_v51, %v11199_v61  ;;  %7114 = vrcp.f32 %v1796_v26  ;;  %v1550_v60 = vadd.f32 %v1176_v50, %v11161_v9  ;;  %v9149_v42 = vsel %vm904_vm0, %v1152_v23, 0.0  ;;  %v11276_v13 = vld [vmem:[#allocation45_spill] sm:$0xff] }
 0x167   : > { %11229 = vst [vmem:[#allocation72_spill] sm:$0xff] %v9149_v42  ;;  %v7097_v37 = vpop.eup %7096  ;;  %v9152_v24 = vadd.f32 %v7095_v28, %v11199_v61  ;;  %7116 = vrcp.f32 %v1799_v41  ;;  %v6737_v22 = vmul.f32 -1.442695, %v1551_v16  ;;  %1394 = vadd.xlane.f32.xlu1 %v8728_v5  ;;  %v1154_v55 = vmul.f32 %v7655_v25, %v864_v39  ;;  %1391 = vadd.xlane.f32.xlu0 %v8731_v14  ;;  %v866_v25 = vld [vmem:[%s8129_s7 + $0x3d0] sm:$0xff]  ;;  %v7656_v14 = vld [vmem:[%s8144_s22 + $0xd8] sm:$0xff]  ;;  %v11275_v42 = vld [vmem:[#allocation17_spill] sm:$0xff] }
 0x168   : > { %11228 = vst [vmem:[#allocation71_spill] sm:$0xff] %v9145_v52  ;;  %v7099_v51 = vpop.eup %7098  ;;  %v9159_v26 = vadd.f32 %v8978_v35, %v11199_v61  ;;  %v1798_v50 = vadd.f32 1.0, %v7097_v37  ;;  %7118 = vpow2.f32 %v6734_v8  ;;  %v6736_v23 = vmul.f32 -1.442695, %v1550_v60  ;;  %v1185_v28 = vpop.xlane.xlu1 %1184 }
 0x169   : > { %11230 = vst [vmem:[#allocation73_spill] sm:$0xff] %v9152_v24  ;;  %v7101_v41 = vpop.eup %7100  ;;  %v1801_v16 = vadd.f32 1.0, %v7099_v51  ;;  %7120 = vpow2.f32 %v6737_v22  ;;  %v1553_v5 = vadd.f32 %v1185_v28, %v11161_v9  ;;  %v1182_v24 = vpop.xlane.xlu0 %1181  ;;  %v9164_v39 = vsel %vm904_vm0, %v1155_v31, 0.0 }
 0x16a   : > { %11231 = vst [vmem:[#allocation74_spill] sm:$0xff] %v9159_v26  ;;  %11232 = vst [vmem:[#allocation75_spill] sm:$0xff] %v9164_v39  ;;  %v7103_v15 = vpop.eup %7102  ;;  %v9168_v35 = vadd.f32 %v7101_v41, %v11199_v61  ;;  %7122 = vrcp.f32 %v1798_v50  ;;  %v1552_v8 = vadd.f32 %v1182_v24, %v11161_v9  ;;  %v1157_v60 = vmul.f32 %v7656_v14, %v867_v11  ;;  %v7657_v11 = vld [vmem:[%s8144_s22 + $0xd0] sm:$0xff]  ;;  %v11252_v26 = vld [vmem:[#allocation33_spill] sm:$0xff] }
 0x16b   : > { %v7105_v37 = vpop.eup %7104  ;;  %v9173_v22 = vadd.f32 %v7103_v15, %v11199_v61  ;;  %7124 = vrcp.f32 %v1801_v16  ;;  %v6739_v51 = vmul.f32 -1.442695, %v1553_v5  ;;  %1400 = vadd.xlane.f32.xlu1 %v8734_v62  ;;  %v9177_v31 = vsel %vm904_vm0, %v1154_v55, 0.0  ;;  %1397 = vadd.xlane.f32.xlu0 %v8741_v12  ;;  %v868_v5 = vld [vmem:[%s8129_s7 + $0x3e0] sm:$0xff] }
 0x16c   : > { %11233 = vst [vmem:[#allocation76_spill] sm:$0xff] %v9168_v35  ;;  %11235 = vst [vmem:[#allocation78_spill] sm:$0xff] %v9177_v31  ;;  %v7107_v28 = vpop.eup %7106  ;;  %v1800_v50 = vadd.f32 1.0, %v7105_v37  ;;  %7126 = vpow2.f32 %v6736_v23  ;;  %v6738_v41 = vmul.f32 -1.442695, %v1552_v8  ;;  %v1191_v24 = vpop.xlane.xlu1 %1190  ;;  %v1156_v14 = vmul.f32 %v7657_v11, %v866_v25 }
 0x16d   : > { %11234 = vst [vmem:[#allocation77_spill] sm:$0xff] %v9173_v22  ;;  %v7109_v15 = vpop.eup %7108  ;;  %v9183_v16 = vadd.f32 %v7107_v28, %v11199_v61  ;;  %7128 = vpow2.f32 %v6739_v51  ;;  %v1555_v62 = vadd.f32 %v1191_v24, %v11161_v9  ;;  %v1188_v55 = vpop.xlane.xlu0 %1187  ;;  %v9191_v37 = vsel %vm904_vm0, %v1157_v60, 0.0  ;;  %v7658_v24 = vld [vmem:[%s8144_s22 + $0xe8] sm:$0xff] }
 0x16e   : > { %v7111_v8 = vpop.eup %7110  ;;  %7130 = vrcp.f32 %v1800_v50  ;;  %v5216_v12 = vadd.f32 1.0, %v7109_v15  ;;  %v1554_v25 = vadd.f32 %v1188_v55, %v11161_v9  ;;  %11237 = vst [vmem:[#allocation80_spill] sm:$0xff] %v9191_v37  ;;  %v1159_v22 = vmul.f32 %v7658_v24, %v869_v29  ;;  %v7659_v15 = vld [vmem:[%s8144_s22 + $0xe0] sm:$0xff] }
 0x16f   : > { %11236 = vst [vmem:[#allocation79_spill] sm:$0xff] %v9183_v16  ;;  %v7113_v28 = vpop.eup %7112  ;;  %v5215_v11 = vadd.f32 1.0, %v7111_v8  ;;  %7132 = vpow2.f32 %v6738_v41  ;;  %v6741_v51 = vmul.f32 -1.442695, %v1555_v62  ;;  %1406 = vadd.xlane.f32.xlu1 %v8744_v33  ;;  %1403 = vadd.xlane.f32.xlu0 %v8748_v4  ;;  %v1158_v55 = vmul.f32 %v7659_v15, %v868_v5 }
 0x170   : > { %v7115_v16 = vpop.eup %7114  ;;  %7134 = vrcp.f32 %v5216_v12  ;;  %v5218_v23 = vadd.f32 1.0, %v7113_v28  ;;  %v6740_v35 = vmul.f32 -1.442695, %v1554_v25  ;;  %v1197_v50 = vpop.xlane.xlu1 %1196  ;;  %v9202_v33 = vsel %vm904_vm0, %v1156_v14, 0.0  ;;  %v11241_v12 = vld [vmem:[#allocation27_spill] sm:$0xff] }
 0x171   : > { %v7117_v52 = vpop.eup %7116  ;;  %v9198_v60 = vadd.f32 %v7115_v16, %v11199_v61  ;;  %7136 = vrcp.f32 %v5215_v11  ;;  %v1557_v41 = vadd.f32 %v1197_v50, %v11161_v9  ;;  %v1194_v62 = vpop.xlane.xlu0 %1193  ;;  %11239 = vst [vmem:[#allocation82_spill] sm:$0xff] %v9202_v33  ;;  %v1970_v5 = vrot.slane %v9131_v32, %v11241_v12  ;;  %v11264_v33 = vld [vmem:[#allocation36_spill] sm:$0xff] }
 0x172   : > { %v7119_v29 = vpop.eup %7118  ;;  %v9205_v8 = vadd.f32 %v7117_v52, %v11199_v61  ;;  %7138 = vrcp.f32 %v5218_v23  ;;  %v1556_v4 = vadd.f32 %v1194_v62, %v11161_v9  ;;  %v9212_v11 = vsel %vm904_vm0, %v1159_v22, 0.0 }
 0x173   : > { %11238 = vst [vmem:[#allocation81_spill] sm:$0xff] %v9198_v60  ;;  %v7121_v25 = vpop.eup %7120  ;;  %v5217_v16 = vadd.f32 1.0, %v7119_v29  ;;  %7140 = vpow2.f32 %v6741_v51  ;;  %v6743_v28 = vmul.f32 -1.442695, %v1557_v41  ;;  %1412 = vadd.xlane.f32.xlu1 %v8751_v27  ;;  %11242 = vst [vmem:[#allocation27_spill] sm:$0xff] %v9212_v11  ;;  %1409 = vadd.xlane.f32.xlu0 %v8756_v19  ;;  %v9216_v50 = vsel %vm904_vm0, %v1158_v55, 0.0 }
 0x174   : > { %11240 = vst [vmem:[#allocation83_spill] sm:$0xff] %v9205_v8  ;;  %v7123_v14 = vpop.eup %7122  ;;  %v5220_v24 = vadd.f32 1.0, %v7121_v25  ;;  %7142 = vpow2.f32 %v6740_v35  ;;  %v6742_v52 = vmul.f32 -1.442695, %v1556_v4  ;;  %v1203_v23 = vpop.xlane.xlu1 %1202  ;;  %11243 = vst [vmem:[#allocation84_spill] sm:$0xff] %v9216_v50  ;;  %v11245_v51 = vld [vmem:[#allocation28_spill] sm:$0xff] }
 0x175   : > { %v7125_v15 = vpop.eup %7124  ;;  %v9219_v62 = vadd.f32 %v7123_v14, %v11199_v61  ;;  %7144 = vrcp.f32 %v5217_v16  ;;  %v1559_v27 = vadd.f32 %v1203_v23, %v11161_v9  ;;  %v1200_v22 = vpop.xlane.xlu0 %1199  ;;  %v1974_v41 = vrot.slane %v9131_v32, %v11245_v51  ;;  %v11247_v55 = vld [vmem:[#allocation29_spill] sm:$0xff]  ;;  %v11248_v23 = vld [vmem:[#allocation30_spill] sm:$0xff]  ;;  %v11257_v11 = vld [vmem:[#allocation12_spill] sm:$0xff] }
 0x176   : > { %v7127_v35 = vpop.eup %7126  ;;  %v9225_v29 = vadd.f32 %v7125_v15, %v11199_v61  ;;  %7146 = vrcp.f32 %v5220_v24  ;;  %v1558_v19 = vadd.f32 %v1200_v22, %v11161_v9  ;;  %v1978_v4 = vrot.slane %v9131_v32, %v11247_v55  ;;  %v11249_v15 = vld [vmem:[#allocation31_spill] sm:$0xff] }
 0x177   : > { %11244 = vst [vmem:[#allocation85_spill] sm:$0xff] %v9219_v62  ;;  %v7129_v25 = vpop.eup %7128  ;;  %v5219_v14 = vadd.f32 1.0, %v7127_v35  ;;  %7148 = vpow2.f32 %v6743_v28  ;;  %v6745_v16 = vmul.f32 -1.442695, %v1559_v27  ;;  %1418 = vadd.xlane.f32.xlu1 %v8759_v36  ;;  %v1982_v8 = vrot.slane %v9131_v32, %v11248_v23  ;;  %1415 = vadd.xlane.f32.xlu0 %v8768_v0 }
 0x178   : > { %11246 = vst [vmem:[#allocation28_spill] sm:$0xff] %v9225_v29  ;;  %v7131_v62 = vpop.eup %7130  ;;  %v5222_v60 = vadd.f32 1.0, %v7129_v25  ;;  %7150 = vpow2.f32 %v6742_v52  ;;  %v1209_v24 = vpop.xlane.xlu1 %1208  ;;  %v1986_v22 = vrot.slane %v9131_v32, %v11249_v15  ;;  %v11250_v29 = vld [vmem:[#allocation32_spill] sm:$0xff]  ;;  %v6744_v36 = vmul.f32 -1.442695, %v1558_v19 }
 0x179   : > { %v7133_v35 = vpop.eup %7132  ;;  %v9239_v28 = vadd.f32 %v7131_v62, %v11199_v61  ;;  %7152 = vrcp.f32 %v5219_v14  ;;  %v1561_v27 = vadd.f32 %v1209_v24, %v11161_v9  ;;  %v1206_v25 = vpop.xlane.xlu0 %1205  ;;  %v11254_v19 = vrot.slane %v9131_v32, %v11220_v17  ;;  %v11263_v61 = vld [vmem:[#allocation38_spill] sm:$0xff] }
 0x17a   : > { %v7135_v52 = vpop.eup %7134  ;;  %7154 = vrcp.f32 %v5222_v60  ;;  %v5221_v0 = vadd.f32 1.0, %v7133_v35  ;;  %v1560_v47 = vadd.f32 %v1206_v25, %v11161_v9  ;;  %v11255_v25 = vld [vmem:[#allocation13_spill] sm:$0xff] }
 0x17b   : > { %11251 = vst [vmem:[#allocation29_spill] sm:$0xff] %v9239_v28  ;;  %v7137_v2 = vpop.eup %7136  ;;  %v5601_v7 = vadd.f32 %v7135_v52, %v11253_v1  ;;  %7156 = vpow2.f32 %v6745_v16  ;;  %v6747_v62 = vmul.f32 -1.442695, %v1561_v27  ;;  %1424 = vadd.xlane.f32.xlu1 %v8783_v57  ;;  %v9250_v14 = vcombine.low %v11254_v19, %v1970_v5  ;;  %1421 = vadd.xlane.f32.xlu0 %v11255_v25  ;;  %v11256_v16 = vld [vmem:[#allocation9_spill] sm:$0xff] }
 0x17c   : > { %v7139_v24 = vpop.eup %7138  ;;  %v5600_v60 = vadd.f32 %v7137_v2, %v11253_v1  ;;  %7158 = vrcp.f32 %v5221_v0  ;;  %v6746_v35 = vmul.f32 -1.442695, %v1560_v47  ;;  %v1215_v44 = vpop.xlane.xlu1 %1214  ;;  %v9254_v28 = vcombine.low %v1974_v41, %v1978_v4 }
 0x17d   : > { %v7141_v52 = vpop.eup %7140  ;;  %v5863_v27 = vrot.slane %v5601_v7, %v11256_v16  ;;  %v5603_v57 = vadd.f32 %v7139_v24, %v11253_v1  ;;  %7160 = vpow2.f32 %v6744_v36  ;;  %v1563_v5 = vadd.f32 %v1215_v44, %v11161_v9  ;;  %v1212_v19 = vpop.xlane.xlu0 %1211 }
 0x17e   : > { %v7143_v50 = vpop.eup %7142  ;;  %v5859_v2 = vrot.slane %v5600_v60, %v11257_v11  ;;  %v5224_v47 = vadd.f32 1.0, %v7141_v52  ;;  %7162 = vpow2.f32 %v6747_v62  ;;  %v1562_v0 = vadd.f32 %v1212_v19, %v11161_v9  ;;  %v11259_v19 = vld [vmem:[#allocation10_spill] sm:$0xff] }
 0x17f   : > { %v7145_v41 = vpop.eup %7144  ;;  %v5223_v4 = vadd.f32 1.0, %v7143_v50  ;;  %7164 = vpow2.f32 %v6746_v35  ;;  %v6749_v25 = vmul.f32 -1.442695, %v1563_v5  ;;  %1430 = vadd.xlane.f32.xlu1 %v8812_v34  ;;  %v9262_v7 = vcombine.low %v1982_v8, %v1986_v22  ;;  %1427 = vadd.xlane.f32.xlu0 %v8815_v56 }
 0x180   : > { %v7147_v36 = vpop.eup %7146  ;;  %v5864_v44 = vsel %vm4630_vm1, %v5863_v27, %v5859_v2  ;;  %v5602_v24 = vadd.f32 %v7145_v41, %v11253_v1  ;;  %7166 = vrcp.f32 %v5224_v47  ;;  %v6748_v60 = vmul.f32 -1.442695, %v1562_v0  ;;  %v1221_v62 = vpop.xlane.xlu1 %1220 }
 0x181   : > { %11258 = vst [vmem:[#allocation30_spill] sm:$0xff] %v9262_v7  ;;  %v7149_v52 = vpop.eup %7148  ;;  %v5873_v50 = vrot.slane %v5603_v57, %v11259_v19  ;;  %v5605_v35 = vadd.f32 %v7147_v36, %v11253_v1  ;;  %7168 = vrcp.f32 %v5223_v4  ;;  %v1565_v34 = vadd.f32 %v1221_v62, %v11161_v9  ;;  %v1218_v8 = vpop.xlane.xlu0 %1217 }
 0x182   : > { %v7151_v22 = vpop.eup %7150  ;;  %v5868_v27 = vrot.slane %v5602_v24, %v8801_v46  ;;  %v5226_v5 = vadd.f32 1.0, %v7149_v52  ;;  %7170 = vpow2.f32 %v6749_v25  ;;  %v1564_v2 = vadd.f32 %v1218_v8, %v11161_v9  ;;  %v11260_v8 = vld [vmem:[#allocation16_spill] sm:$0xff] }
 0x183   : > { %v7153_v47 = vpop.eup %7152  ;;  %v5883_v56 = vrot.slane %v5605_v35, %v8819_v59  ;;  %v5225_v0 = vadd.f32 1.0, %v7151_v22  ;;  %7172 = vpow2.f32 %v6748_v60  ;;  %v6751_v57 = vmul.f32 -1.442695, %v1565_v34  ;;  %1436 = vadd.xlane.f32.xlu1 %v8827_v49  ;;  %1433 = vadd.xlane.f32.xlu0 %v8837_v40 }
 0x184   : > { %v7155_v41 = vpop.eup %7154  ;;  %v5869_v4 = vsel %vm4637_vm2, %v5868_v27, %v5864_v44  ;;  %v5604_v36 = vadd.f32 %v7153_v47, %v11253_v1  ;;  %7174 = vrcp.f32 %v5226_v5  ;;  %v6750_v62 = vmul.f32 -1.442695, %v1564_v2  ;;  %v1227_v25 = vpop.xlane.xlu1 %1226  ;;  %v11261_v5 = vld [vmem:[#allocation35_spill] sm:$0xff] }
 0x185   : > { %v7157_v24 = vpop.eup %7156  ;;  %v5874_v52 = vsel %vm11118_vm3, %v5873_v50, %v5869_v4  ;;  %v5607_v35 = vadd.f32 %v7155_v41, %v11253_v1  ;;  %7176 = vrcp.f32 %v5225_v0  ;;  %v1567_v60 = vadd.f32 %v1227_v25, %v11161_v9  ;;  %v1224_v49 = vpop.xlane.xlu0 %1223  ;;  %v11262_v41 = vld [vmem:[#allocation37_spill] sm:$0xff] }
 0x186   : > { %v7159_v34 = vpop.eup %7158  ;;  %v5878_v44 = vrot.slane %v5604_v36, %v11260_v8  ;;  %v5228_v22 = vadd.f32 1.0, %v7157_v24  ;;  %7178 = vpow2.f32 %v6751_v57  ;;  %v1566_v27 = vadd.f32 %v1224_v49, %v11161_v9 }
 0x187   : > { %v7161_v40 = vpop.eup %7160  ;;  %v5893_v2 = vrot.slane %v5607_v35, %v11261_v5  ;;  %v5606_v50 = vadd.f32 %v7159_v34, %v11253_v1  ;;  %7180 = vpow2.f32 %v6750_v62  ;;  %v6753_v47 = vmul.f32 -1.442695, %v1567_v60  ;;  %1442 = vadd.xlane.f32.xlu1 %v11262_v41  ;;  %1439 = vadd.xlane.f32.xlu0 %v11263_v61 }
 0x188   : > { %v7163_v0 = vpop.eup %7162  ;;  %v5879_v4 = vsel %vm11117_vm4, %v5878_v44, %v5874_v52  ;;  %7182 = vrcp.f32 %v5228_v22  ;;  %v5227_v25 = vadd.f32 1.0, %v7161_v40  ;;  %v6752_v36 = vmul.f32 -1.442695, %v1566_v27  ;;  %v1233_v57 = vpop.xlane.xlu1 %1232 }
 0x189   : > { %v7165_v24 = vpop.eup %7164  ;;  %v5884_v49 = vsel %vm4658_vm5, %v5883_v56, %v5879_v4  ;;  %v5888_v35 = vrot.slane %v5606_v50, %v11264_v33  ;;  %v5230_v34 = vadd.f32 1.0, %v7163_v0  ;;  %7184 = vpow2.f32 %v6753_v47  ;;  %v1230_v62 = vpop.xlane.xlu0 %1229  ;;  %v11265_v56 = vld [vmem:[#allocation41_spill] sm:$0xff] }
 0x18a   : > { %v7167_v60 = vpop.eup %7166  ;;  %7186 = vrcp.f32 %v5227_v25  ;;  %v5229_v41 = vadd.f32 1.0, %v7165_v24  ;;  %v1569_v52 = vadd.f32 %v1233_v57, %v11161_v9  ;;  %v1568_v44 = vadd.f32 %v1230_v62, %v11161_v9  ;;  %v11268_v24 = vld [vmem:[#allocation42_spill] sm:$0xff] }
 0x18b   : > { %v7169_v22 = vpop.eup %7168  ;;  %v5889_v61 = vsel %vm4665_vm6, %v5888_v35, %v5884_v49  ;;  %v5609_v27 = vadd.f32 %v7167_v60, %v11253_v1  ;;  %7188 = vrcp.f32 %v5230_v34  ;;  %1448 = vadd.xlane.f32.xlu1 %v11265_v56  ;;  %v11266_v40 = vrot.slane %v9131_v32, %v11252_v26  ;;  %1445 = vadd.xlane.f32.xlu0 %v11268_v24  ;;  %v11269_v34 = vld [vmem:[#allocation39_spill] sm:$0xff]  ;;  %v11273_v24 = vld [vmem:[#allocation44_spill] sm:$0xff] }
 0x18c   : > { %v11267_v50 = vrot.slane %v9131_v32, %v11250_v29  ;;  %v7171_v0 = vpop.eup %7170  ;;  %v5894_v4 = vsel %vm4672_vm7, %v5893_v2, %v5889_v61  ;;  %v5608_v25 = vadd.f32 %v7169_v22, %v11253_v1  ;;  %7190 = vrcp.f32 %v5229_v41  ;;  %v1239_v49 = vpop.xlane.xlu1 %1238  ;;  %v11271_v61 = vld [vmem:[#allocation18_spill] sm:$0xff] }
 0x18d   : > { %v6755_v57 = vmul.f32 -1.442695, %v1569_v52  ;;  %v7173_v35 = vpop.eup %7172  ;;  %v5903_v62 = vrot.slane %v5609_v27, %v11269_v34  ;;  %v5232_v60 = vadd.f32 1.0, %v7171_v0  ;;  %7192 = vpow2.f32 %v6752_v36  ;;  %v1236_v37 = vpop.xlane.xlu0 %1235  ;;  %v11272_v36 = vld [vmem:[#allocation34_spill] sm:$0xff] }
 0x18e   : > { %v9300_v47 = vcombine.low %v11267_v50, %v11266_v40  ;;  %v6754_v56 = vmul.f32 -1.442695, %v1568_v44  ;;  %v7175_v32 = vpop.eup %7174  ;;  %v11270_v40 = vld [vmem:[#allocation40_spill] sm:$0xff]  ;;  %v5231_v31 = vadd.f32 1.0, %v7173_v35  ;;  %v1571_v2 = vadd.f32 %v1239_v49, %v11161_v9 }
 0x18f   : > { %v5898_v50 = vrot.slane %v5608_v25, %v11270_v40  ;;  %7194 = vpow2.f32 %v6755_v57  ;;  %v7177_v41 = vpop.eup %7176  ;;  %v5611_v52 = vadd.f32 %v7175_v32, %v11253_v1  ;;  %v1570_v22 = vadd.f32 %v1236_v37, %v11161_v9  ;;  %1454 = vadd.xlane.f32.xlu1 %v11271_v61  ;;  %1451 = vadd.xlane.f32.xlu0 %v11273_v24 }
 0x190   : > { %7196 = vrcp.f32 %v5232_v60  ;;  %v7179_v27 = vpop.eup %7178  ;;  %v5610_v25 = vadd.f32 %v7177_v41, %v11253_v1  ;;  %v6757_v57 = vmul.f32 -1.442695, %v1571_v2  ;;  %v1245_v49 = vpop.xlane.xlu1 %1244  ;;  %v11274_v60 = vld [vmem:[#allocation43_spill] sm:$0xff] }
 0x191   : > { %v5899_v0 = vsel %vm4679_vm8, %v5898_v50, %v5894_v4  ;;  %7198 = vrcp.f32 %v5231_v31  ;;  %v7181_v35 = vpop.eup %7180  ;;  %v5913_v32 = vrot.slane %v5611_v52, %v11274_v60  ;;  %v5234_v61 = vadd.f32 1.0, %v7179_v27  ;;  %v1242_v44 = vpop.xlane.xlu0 %1241 }
 0x192   : > { %v5904_v37 = vsel %vm4686_vm9, %v5903_v62, %v5899_v0  ;;  %7200 = vpow2.f32 %v6754_v56  ;;  %v7183_v39 = vpop.eup %7182  ;;  %v5908_v4 = vrot.slane %v5610_v25, %v11275_v42  ;;  %v5233_v50 = vadd.f32 1.0, %v7181_v35  ;;  %v11277_v0 = vld [vmem:[#allocation21_spill] sm:$0xff] }
 0x193   : > { %7202 = vpow2.f32 %v6757_v57  ;;  %v6756_v41 = vmul.f32 -1.442695, %v1570_v22  ;;  %v7185_v31 = vpop.eup %7184  ;;  %v5613_v2 = vadd.f32 %v7183_v39, %v11253_v1  ;;  %v1573_v24 = vadd.f32 %v1245_v49, %v11161_v9  ;;  %1460 = vadd.xlane.f32.xlu1 %v11276_v13  ;;  %1457 = vadd.xlane.f32.xlu0 %v11277_v0  ;;  %v11278_v39 = vld [vmem:[#allocation19_spill] sm:$0xff]  ;;  %v11279_v0 = vld [vmem:[#allocation20_spill] sm:$0xff] }
 0x194   : > { %7204 = vrcp.f32 %v5234_v61  ;;  %v1572_v52 = vadd.f32 %v1242_v44, %v11161_v9  ;;  %v7187_v62 = vpop.eup %7186  ;;  %v5909_v56 = vsel %vm4693_vm10, %v5908_v4, %v5904_v37  ;;  %v5236_v27 = vadd.f32 1.0, %v7185_v31  ;;  %v1251_v25 = vpop.xlane.xlu1 %1250 }
 0x195   : > { %7206 = vrcp.f32 %v5233_v50  ;;  %v7189_v57 = vpop.eup %7188  ;;  %v5923_v35 = vrot.slane %v5613_v2, %v11278_v39  ;;  %v5914_v49 = vsel %vm4700_vm11, %v5913_v32, %v5909_v56  ;;  %v5612_v44 = vadd.f32 %v7187_v62, %v11253_v1  ;;  %v1248_v13 = vpop.xlane.xlu0 %1247  ;;  %v11280_v56 = vld [vmem:[#allocation46_spill] sm:$0xff] }
 0x196   : > { %7208 = vpow2.f32 %v6756_v41  ;;  %v7191_v61 = vpop.eup %7190  ;;  %v5615_v37 = vadd.f32 %v7189_v57, %v11253_v1  ;;  %v6759_v4 = vmul.f32 -1.442695, %v1573_v24  ;;  %v6758_v50 = vmul.f32 -1.442695, %v1572_v52 }
 0x197   : > { %7210 = vrcp.f32 %v5236_v27  ;;  %v7193_v31 = vpop.eup %7192  ;;  %v5918_v54 = vrot.slane %v5612_v44, %v11279_v0  ;;  %v5614_v22 = vadd.f32 %v7191_v61, %v11253_v1  ;;  %v1575_v38 = vadd.f32 %v1251_v25, %v11161_v9  ;;  %1466 = vadd.xlane.f32.xlu1 %v8945_v58  ;;  %1463 = vadd.xlane.f32.xlu0 %v11280_v56  ;;  %v11281_v44 = vld [vmem:[#allocation24_spill] sm:$0xff] }
 0x198   : > { %v1574_v2 = vadd.f32 %v1248_v13, %v11161_v9  ;;  %v5933_v41 = vrot.slane %v5615_v37, %v8933_v63  ;;  %v5235_v62 = vadd.f32 1.0, %v7193_v31  ;;  %7212 = vpow2.f32 %v6759_v4  ;;  %v1257_v24 = vpop.xlane.xlu1 %1256 }
 0x199   : > { %v7195_v32 = vpop.eup %7194  ;;  %v5919_v57 = vsel %vm4707_vm12, %v5918_v54, %v5914_v49  ;;  %v5928_v25 = vrot.slane %v5614_v22, %v11281_v44  ;;  %7214 = vpow2.f32 %v6758_v50  ;;  %v1254_v13 = vpop.xlane.xlu0 %1253  ;;  %v6761_v4 = vmul.f32 -1.442695, %v1575_v38  ;;  %v11282_v54 = vld [vmem:[#allocation47_spill] sm:$0xff] }
 0x19a   : > { %v7197_v27 = vpop.eup %7196  ;;  %v5238_v61 = vadd.f32 1.0, %v7195_v32  ;;  %v5924_v0 = vsel %vm4714_vm13, %v5923_v35, %v5919_v57  ;;  %7216 = vrcp.f32 %v5235_v62  ;;  %v6760_v7 = vmul.f32 -1.442695, %v1574_v2  ;;  %v11284_v32 = vld [vmem:[#allocation48_spill] sm:$0xff] }
 0x19b   : > { %v7199_v58 = vpop.eup %7198  ;;  %v5617_v37 = vadd.f32 %v7197_v27, %v11253_v1  ;;  %v5929_v56 = vsel %vm4721_vm14, %v5928_v25, %v5924_v0  ;;  %1472 = vadd.xlane.f32.xlu1 %v11282_v54  ;;  %1469 = vadd.xlane.f32.xlu0 %v11284_v32  ;;  %v1577_v2 = vadd.f32 %v1257_v24, %v11161_v9 }
 0x19c   : > { %v7201_v31 = vpop.eup %7200  ;;  %v5616_v52 = vadd.f32 %v7199_v58, %v11253_v1  ;;  %7218 = vrcp.f32 %v5238_v61  ;;  %v9348_v49 = vsel %vm4728_vm15, %v5933_v41, %v5929_v56  ;;  %v1263_v38 = vpop.xlane.xlu1 %1262  ;;  %v1576_v41 = vadd.f32 %v1254_v13, %v11161_v9 }
 0x19d   : > { %v7203_v22 = vpop.eup %7202  ;;  %11283 = vst [vmem:[#allocation31_spill] sm:$0xff] %v9348_v49  ;;  %v5942_v50 = vrot.slane %v5617_v37, %v11256_v16  ;;  %v5237_v35 = vadd.f32 1.0, %v7201_v31  ;;  %7220 = vpow2.f32 %v6761_v4  ;;  %v1260_v57 = vpop.xlane.xlu0 %1259  ;;  %v1579_v58 = vadd.f32 %v1263_v38, %v11161_v9 }
 0x19e   : > { %v7205_v62 = vpop.eup %7204  ;;  %v5938_v0 = vrot.slane %v5616_v52, %v11257_v11  ;;  %v5240_v27 = vadd.f32 1.0, %v7203_v22  ;;  %7222 = vpow2.f32 %v6760_v7  ;;  %v6763_v52 = vmul.f32 -1.442695, %v1577_v2 }
 0x19f   : > { %v7207_v25 = vpop.eup %7206  ;;  %v5619_v61 = vadd.f32 %v7205_v62, %v11253_v1  ;;  %7224 = vrcp.f32 %v5237_v35  ;;  %1478 = vadd.xlane.f32.xlu1 %v8984_v18  ;;  %v6762_v54 = vmul.f32 -1.442695, %v1576_v41  ;;  %v6765_v22 = vmul.f32 -1.442695, %v1579_v58  ;;  %1475 = vadd.xlane.f32.xlu0 %v8996_v43 }
 0x1a0   : > { %v7209_v37 = vpop.eup %7208  ;;  %v5943_v4 = vsel %vm4630_vm1, %v5942_v50, %v5938_v0  ;;  %v5618_v31 = vadd.f32 %v7207_v25, %v11253_v1  ;;  %7226 = vrcp.f32 %v5240_v27  ;;  %v1269_v13 = vpop.xlane.xlu1 %1268  ;;  %v1578_v50 = vadd.f32 %v1260_v57, %v11161_v9 }
 0x1a1   : > { %v7211_v7 = vpop.eup %7210  ;;  %v5952_v24 = vrot.slane %v5619_v61, %v11259_v19  ;;  %v5239_v56 = vadd.f32 1.0, %v7209_v37  ;;  %7228 = vpow2.f32 %v6763_v52  ;;  %v1266_v38 = vpop.xlane.xlu0 %1265  ;;  %v1581_v18 = vadd.f32 %v1269_v13, %v11161_v9 }
 0x1a2   : > { %v5947_v35 = vrot.slane %v5618_v31, %v8801_v46  ;;  %v5621_v32 = vadd.f32 %v7211_v7, %v11253_v1  ;;  %v7213_v62 = vpop.eup %7212  ;;  %v3035_v0 = vrot.slane %v9300_v47, %v11272_v36  ;;  %v11285_v27 = vrot.slane %v9254_v28, %v11272_v36 }
 0x1a3   : > { %7230 = vrcp.f32 %v5239_v56  ;;  %v11286_v43 = vrot.slane %v9250_v14, %v11272_v36  ;;  %v7215_v25 = vpop.eup %7214  ;;  %v5242_v57 = vadd.f32 1.0, %v7213_v62  ;;  %v1580_v41 = vadd.f32 %v1266_v38, %v11161_v9  ;;  %1484 = vadd.xlane.f32.xlu1 %v8999_v53  ;;  %1481 = vadd.xlane.f32.xlu0 %v9003_v3 }
 0x1a4   : > { %v5948_v61 = vsel %vm4637_vm2, %v5947_v35, %v5943_v4  ;;  %7232 = vpow2.f32 %v6762_v54  ;;  %v7217_v58 = vpop.eup %7216  ;;  %v5241_v31 = vadd.f32 1.0, %v7215_v25  ;;  %v6764_v28 = vmul.f32 -1.442695, %v1578_v50  ;;  %v1275_v14 = vpop.xlane.xlu1 %1274  ;;  %v11288_v25 = vld [vmem:[#allocation54_spill] sm:$0xff] }
 0x1a5   : > { %v9374_v2 = vcombine.low %v11286_v43, %v11285_v27  ;;  %v5953_v37 = vsel %vm11118_vm3, %v5952_v24, %v5948_v61  ;;  %7234 = vpow2.f32 %v6765_v22  ;;  %v5962_v7 = vrot.slane %v5621_v32, %v8819_v59  ;;  %v1272_v54 = vpop.xlane.xlu0 %1271  ;;  %v11287_v32 = vld [vmem:[#allocation52_spill] sm:$0xff] }
 0x1a6   : > { %v7219_v52 = vpop.eup %7218  ;;  %v5620_v4 = vadd.f32 %v7217_v58, %v11253_v1  ;;  %7236 = vrcp.f32 %v5242_v57  ;;  %v6767_v56 = vmul.f32 -1.442695, %v1581_v18  ;;  %v1583_v24 = vadd.f32 %v1275_v14, %v11161_v9 }
 0x1a7   : > { %v7221_v13 = vpop.eup %7220  ;;  %v5623_v53 = vadd.f32 %v7219_v52, %v11253_v1  ;;  %7238 = vrcp.f32 %v5241_v31  ;;  %v1582_v22 = vadd.f32 %v1272_v54, %v11161_v9  ;;  %v6766_v38 = vmul.f32 -1.442695, %v1580_v41  ;;  %1490 = vadd.xlane.f32.xlu1 %v11287_v32  ;;  %1487 = vadd.xlane.f32.xlu0 %v11288_v25 }
 0x1a8   : > { %v7223_v35 = vpop.eup %7222  ;;  %v5957_v3 = vrot.slane %v5620_v4, %v11260_v8  ;;  %v5244_v50 = vadd.f32 1.0, %v7221_v13  ;;  %7240 = vpow2.f32 %v6764_v28  ;;  %v6769_v43 = vmul.f32 -1.442695, %v1583_v24  ;;  %v1281_v61 = vpop.xlane.xlu1 %1280 }
 0x1a9   : > { %v7225_v62 = vpop.eup %7224  ;;  %v5972_v18 = vrot.slane %v5623_v53, %v11261_v5  ;;  %v5243_v27 = vadd.f32 1.0, %v7223_v35  ;;  %7242 = vpow2.f32 %v6767_v56  ;;  %v6768_v14 = vmul.f32 -1.442695, %v1582_v22  ;;  %v1278_v28 = vpop.xlane.xlu0 %1277 }
 0x1aa   : > { %v7227_v57 = vpop.eup %7226  ;;  %v5958_v58 = vsel %vm11117_vm4, %v5957_v3, %v5953_v37  ;;  %v5622_v31 = vadd.f32 %v7225_v62, %v11253_v1  ;;  %7244 = vrcp.f32 %v5244_v50  ;;  %v1585_v4 = vadd.f32 %v1281_v61, %v11161_v9 }
 0x1ab   : > { %v5963_v41 = vsel %vm4658_vm5, %v5962_v7, %v5958_v58  ;;  %v5625_v52 = vadd.f32 %v7227_v57, %v11253_v1  ;;  %7246 = vrcp.f32 %v5243_v27  ;;  %v7229_v56 = vpop.eup %7228  ;;  %v1584_v13 = vadd.f32 %v1278_v28, %v11161_v9  ;;  %1496 = vadd.xlane.f32.xlu1 %v9040_v21  ;;  %1493 = vadd.xlane.f32.xlu0 %v9044_v20 }
 0x1ac   : > { %v5967_v54 = vrot.slane %v5622_v31, %v11264_v33  ;;  %7248 = vpow2.f32 %v6766_v38  ;;  %v2002_v37 = vrot.slane %v9072_v45, %v11241_v12  ;;  %v5246_v7 = vadd.f32 1.0, %v7229_v56  ;;  %v1287_v35 = vpop.xlane.xlu1 %1286 }
 0x1ad   : > { %v7231_v53 = vpop.eup %7230  ;;  %v5982_v24 = vrot.slane %v5625_v52, %v11269_v34  ;;  %7250 = vpow2.f32 %v6769_v43  ;;  %v6771_v22 = vmul.f32 -1.442695, %v1585_v4  ;;  %v6770_v32 = vmul.f32 -1.442695, %v1584_v13  ;;  %v1284_v21 = vpop.xlane.xlu0 %1283 }
 0x1ae   : > { %v7233_v3 = vpop.eup %7232  ;;  %v5968_v50 = vsel %vm4665_vm6, %v5967_v54, %v5963_v41  ;;  %v5624_v38 = vadd.f32 %v7231_v53, %v11253_v1  ;;  %7252 = vpow2.f32 %v6768_v14  ;;  %v1587_v61 = vadd.f32 %v1287_v35, %v11161_v9 }
 0x1af   : > { %v7235_v62 = vpop.eup %7234  ;;  %v5973_v27 = vsel %vm4672_vm7, %v5972_v18, %v5968_v50  ;;  %7254 = vrcp.f32 %v5246_v7  ;;  %v5245_v25 = vadd.f32 1.0, %v7233_v3  ;;  %1502 = vadd.xlane.f32.xlu1 %v9054_v6  ;;  %v2006_v20 = vrot.slane %v9072_v45, %v11245_v51  ;;  %1499 = vadd.xlane.f32.xlu0 %v9057_v48 }
 0x1b0   : > { %v7237_v43 = vpop.eup %7236  ;;  %v5977_v57 = vrot.slane %v5624_v38, %v11270_v40  ;;  %7256 = vpow2.f32 %v6771_v22  ;;  %v2010_v58 = vrot.slane %v9072_v45, %v11247_v55  ;;  %v6773_v18 = vmul.f32 -1.442695, %v1587_v61  ;;  %v1293_v28 = vpop.xlane.xlu1 %1292 }
 0x1b1   : > { %v7239_v31 = vpop.eup %7238  ;;  %v5627_v14 = vadd.f32 %v7237_v43, %v11253_v1  ;;  %7258 = vrcp.f32 %v5245_v25  ;;  %v2014_v41 = vrot.slane %v9072_v45, %v11248_v23  ;;  %v1290_v56 = vpop.xlane.xlu0 %1289  ;;  %v2018_v54 = vrot.slane %v9072_v45, %v11249_v15 }
 0x1b2   : > { %v7241_v52 = vpop.eup %7240  ;;  %v5978_v6 = vsel %vm4679_vm8, %v5977_v57, %v5973_v27  ;;  %v5626_v4 = vadd.f32 %v7239_v31, %v11253_v1  ;;  %v2022_v13 = vrot.slane %v9072_v45, %v11250_v29  ;;  %7260 = vpow2.f32 %v6770_v32 }
 0x1b3   : > { %v7243_v53 = vpop.eup %7242  ;;  %v5992_v7 = vrot.slane %v5627_v14, %v11274_v60  ;;  %v5983_v48 = vsel %vm4686_vm9, %v5982_v24, %v5978_v6  ;;  %v1586_v22 = vadd.f32 %v1284_v21, %v11161_v9  ;;  %v5248_v50 = vadd.f32 1.0, %v7235_v62  ;;  %1508 = vadd.xlane.f32.xlu1 %v9068_v30  ;;  %1505 = vadd.xlane.f32.xlu0 %v9085_v10 }
 0x1b4   : > { %v7245_v35 = vpop.eup %7244  ;;  %v5987_v3 = vrot.slane %v5626_v4, %v11275_v42  ;;  %7262 = vpow2.f32 %v6773_v18  ;;  %v1589_v38 = vadd.f32 %v1293_v28, %v11161_v9  ;;  %v5247_v61 = vadd.f32 1.0, %v7241_v52  ;;  %v1299_v43 = vpop.xlane.xlu1 %1298 }
 0x1b5   : > { %v7247_v27 = vpop.eup %7246  ;;  %v5629_v25 = vadd.f32 %v7245_v35, %v11253_v1  ;;  %v2026_v24 = vrot.slane %v9072_v45, %v11252_v26  ;;  %v11289_v32 = vrot.slane %v9072_v45, %v11220_v17  ;;  %v5250_v31 = vadd.f32 1.0, %v7243_v53  ;;  %v1296_v18 = vpop.xlane.xlu0 %1295 }
 0x1b6   : > { %v7249_v62 = vpop.eup %7248  ;;  %v5988_v57 = vsel %vm4693_vm10, %v5987_v3, %v5983_v48  ;;  %v5628_v30 = vadd.f32 %v7247_v27, %v11253_v1  ;;  %v1588_v14 = vadd.f32 %v1290_v56, %v11161_v9  ;;  %v6772_v6 = vmul.f32 -1.442695, %v1586_v22  ;;  %v11291_v48 = vld [vmem:[#allocation64_spill] sm:$0xff] }
 0x1b7   : > { %v9435_v21 = vcombine.low %v11289_v32, %v2002_v37  ;;  %v7251_v28 = vpop.eup %7250  ;;  %v6002_v10 = vrot.slane %v5629_v25, %v11278_v39  ;;  %v5993_v52 = vsel %vm4700_vm11, %v5992_v7, %v5988_v57  ;;  %v9442_v4 = vcombine.low %v2006_v20, %v2010_v58  ;;  %v11290_v37 = vld [vmem:[#allocation20_spill] sm:$0xff]  ;;  %1514 = vadd.xlane.f32.xlu1 %v11291_v48  ;;  %v11292_v25 = vld [vmem:[#allocation66_spill] sm:$0xff] }
 0x1b8   : > { %v7253_v45 = vpop.eup %7252  ;;  %v5997_v35 = vrot.slane %v5628_v30, %v11290_v37  ;;  %7264 = vrcp.f32 %v5248_v50  ;;  %v6775_v32 = vmul.f32 -1.442695, %v1589_v38  ;;  %v9446_v3 = vcombine.low %v2014_v41, %v2018_v54  ;;  %1511 = vadd.xlane.f32.xlu0 %v11292_v25  ;;  %v1305_v7 = vpop.xlane.xlu1 %1304 }
 0x1b9   : > { %v7255_v53 = vpop.eup %7254  ;;  %7266 = vrcp.f32 %v5247_v61  ;;  %v5249_v56 = vadd.f32 1.0, %v7249_v62  ;;  %v1591_v27 = vadd.f32 %v1299_v43, %v11161_v9  ;;  %v9450_v22 = vcombine.low %v2022_v13, %v2026_v24  ;;  %v1302_v57 = vpop.xlane.xlu0 %1301  ;;  %v11293_v13 = vld [vmem:[#allocation70_spill] sm:$0xff] }
 0x1ba   : > { %v7257_v20 = vpop.eup %7256  ;;  %v5998_v58 = vsel %vm4707_vm12, %v5997_v35, %v5993_v52  ;;  %v5631_v50 = vadd.f32 %v7255_v53, %v11253_v1  ;;  %7268 = vrcp.f32 %v5250_v31  ;;  %v6774_v38 = vmul.f32 -1.442695, %v1588_v14  ;;  %v11294_v35 = vld [vmem:[#allocation72_spill] sm:$0xff] }
 0x1bb   : > { %v7259_v41 = vpop.eup %7258  ;;  %v6003_v54 = vsel %vm4714_vm13, %v6002_v10, %v5998_v58  ;;  %7270 = vpow2.f32 %v6772_v6  ;;  %v6777_v61 = vmul.f32 -1.442695, %v1591_v27  ;;  %v1590_v43 = vadd.f32 %v1296_v18, %v11161_v9  ;;  %1520 = vadd.xlane.f32.xlu1 %v11293_v13  ;;  %v871_v58 = vld [vmem:[%s8129_s7 + $0x3f8] sm:$0xff] }
 0x1bc   : > { %v5630_v62 = vadd.f32 %v7259_v41, %v11253_v1  ;;  %v5252_v30 = vadd.f32 1.0, %v7251_v28  ;;  %7272 = vpow2.f32 %v6775_v32  ;;  %v3063_v24 = vrot.slane %v9435_v21, %v11272_v36  ;;  %v7261_v52 = vpop.eup %7260  ;;  %1517 = vadd.xlane.f32.xlu0 %v11294_v35  ;;  %v1311_v10 = vpop.xlane.xlu1 %1310  ;;  %v11297_v41 = vld [vmem:[#allocation78_spill] sm:$0xff] }
 0x1bd   : > { %v6012_v31 = vrot.slane %v5631_v50, %v8933_v63  ;;  %7274 = vrcp.f32 %v5249_v56  ;;  %v5251_v14 = vadd.f32 1.0, %v7253_v45  ;;  %v3070_v18 = vrot.slane %v9442_v4, %v11272_v36  ;;  %v1308_v21 = vpop.xlane.xlu0 %1307 }
 0x1be   : > { %v7263_v6 = vpop.eup %7262  ;;  %v6007_v28 = vrot.slane %v5630_v62, %v11281_v44  ;;  %v5254_v32 = vadd.f32 1.0, %v7257_v20  ;;  %7276 = vpow2.f32 %v6774_v38  ;;  %v1595_v48 = vadd.f32 %v1311_v10, %v11161_v9  ;;  %v11295_v20 = vld [vmem:[#allocation75_spill] sm:$0xff]  ;;  %v7660_v10 = vld [vmem:[%s8144_s22 + $0xf8] sm:$0xff] }
 0x1bf   : > { %7278 = vpow2.f32 %v6777_v61  ;;  %v6776_v53 = vmul.f32 -1.442695, %v1590_v43  ;;  %v3077_v45 = vrot.slane %v9446_v3, %v11272_v36  ;;  %v3084_v56 = vrot.slane %v9450_v22, %v11272_v36  ;;  %1526 = vadd.xlane.f32.xlu1 %v11295_v20  ;;  %v870_v62 = vld [vmem:[%s8129_s7 + $0x3f0] sm:$0xff]  ;;  %s6510_s7 = ssub.s32 (%p11380_p11), 3, %s6861_s25 }
 0x1c0   : > { %v6008_v27 = vsel %vm4721_vm14, %v6007_v28, %v6003_v54  ;;  %7280 = vrcp.f32 %v5252_v30  ;;  %v5253_v4 = vadd.f32 1.0, %v7261_v52  ;;  %v1593_v25 = vadd.f32 %v1305_v7, %v11161_v9  ;;  %1523 = vadd.xlane.f32.xlu0 %v11297_v41  ;;  %v1317_v22 = vpop.xlane.xlu1 %1316  ;;  %v11298_v30 = vld [vmem:[#allocation30_spill] sm:$0xff]  ;;  %v7661_v41 = vld [vmem:[%s8144_s22 + $0xf0] sm:$0xff]  ;;  %p6511_p12 = scmp.lt.s32.totalorder (%p11380_p11), %s6510_s7, 2 }
 0x1c1   : > { %v9475_v50 = vsel %vm4728_vm15, %v6012_v31, %v6008_v27  ;;  %7282 = vrcp.f32 %v5251_v14  ;;  %v5256_v38 = vadd.f32 1.0, %v7263_v6  ;;  %v1594_v3 = vadd.f32 %v1308_v21, %v11161_v9  ;;  %v1314_v43 = vpop.xlane.xlu0 %1313 }
 0x1c2   : > { %11296 = vst [vmem:[#allocation32_spill] sm:$0xff] %v9475_v50  ;;  %v9479_v54 = vpop.eup %7264  ;;  %7284 = vrcp.f32 %v5254_v32  ;;  %v6781_v61 = vmul.f32 -1.442695, %v1595_v48  ;;  %v1597_v7 = vadd.f32 %v1317_v22, %v11161_v9  ;;  %v11299_v13 = vrot.slane %v11298_v30, %v11272_v36  ;;  %v11300_v48 = vld [vmem:[#allocation80_spill] sm:$0xff] }
 0x1c3   : > { %v9489_v31 = vpop.eup %7266  ;;  %7286 = vpow2.f32 %v6776_v53  ;;  %v1592_v14 = vadd.f32 %v1302_v57, %v11161_v9  ;;  %v6780_v35 = vmul.f32 -1.442695, %v1594_v3  ;;  %v1161_v6 = vmul.f32 %v7660_v10, %v871_v58  ;;  %1532 = vadd.xlane.f32.xlu1 %v11300_v48  ;;  %v11301_v53 = vld [vmem:[#allocation82_spill] sm:$0xff]  ;;  %v11305_v48 = vld [vmem:[#allocation84_spill] sm:$0xff] }
 0x1c4   : > { %v3037_v52 = vcombine.low %v11299_v13, %v3035_v0  ;;  %v9493_v28 = vpop.eup %7268  ;;  %7288 = vrcp.f32 %v5253_v4  ;;  %v6783_v32 = vmul.f32 -1.442695, %v1597_v7  ;;  %v3085_v47 = vcombine.low %v3063_v24, %v3070_v18  ;;  %1529 = vadd.xlane.f32.xlu0 %v11301_v53  ;;  %v1323_v57 = vpop.xlane.xlu1 %1322 }
 0x1c5   : > { %v3086_v21 = vcombine.low %v3077_v45, %v3084_v56  ;;  %v7271_v27 = vpop.eup %7270  ;;  %7290 = vrcp.f32 %v5256_v38  ;;  %v6779_v0 = vmul.f32 -1.442695, %v1593_v25  ;;  %v1596_v20 = vadd.f32 %v1314_v43, %v11161_v9  ;;  %v1320_v4 = vpop.xlane.xlu0 %1319  ;;  %v11302_v45 = vld [vmem:[#allocation22_spill] sm:$0xff] }
 0x1c6   : > { %v1160_v3 = vmul.f32 %v7661_v41, %v870_v62  ;;  %v7273_v22 = vpop.eup %7272  ;;  %7292 = vpow2.f32 %v6781_v61  ;;  %v1599_v58 = vadd.f32 %v1323_v57, %v11161_v9  ;;  %v3044_v7 = vrot.slane %v9374_v2, %v11272_v36  ;;  %v11303_v56 = vld [vmem:[#allocation50_spill] sm:$0xff]  ;;  %v11304_v61 = vld [vmem:[#allocation27_spill] sm:$0xff] }
 0x1c7   : > { %v3051_v24 = vrot.slane %v3037_v52, %v11272_v36  ;;  %v9503_v18 = vpop.eup %7274  ;;  %v9507_v25 = vadd.f32 %v11303_v56, %v11302_v45  ;;  %v6778_v38 = vmul.f32 -1.442695, %v1592_v14  ;;  %7294 = vpow2.f32 %v6780_v35  ;;  %1538 = vadd.xlane.f32.xlu1 %v11304_v61 }
 0x1c8   : > { %v6782_v43 = vmul.f32 -1.442695, %v1596_v20  ;;  %v7277_v62 = vpop.eup %7276  ;;  %v5255_v30 = vadd.f32 1.0, %v7271_v27  ;;  %7296 = vpow2.f32 %v6783_v32  ;;  %v3093_v13 = vrot.slane %v3085_v47, %v11272_v36  ;;  %1535 = vadd.xlane.f32.xlu0 %v11305_v48  ;;  %v1329_v53 = vpop.xlane.xlu1 %1328  ;;  %v11306_v32 = vld [vmem:[#allocation61_spill] sm:$0xff] }
 0x1c9   : > { %v3100_v2 = vrot.slane %v3086_v21, %v11272_v36  ;;  %v7279_v10 = vpop.eup %7278  ;;  %7298 = vpow2.f32 %v6779_v0  ;;  %v6785_v52 = vmul.f32 -1.442695, %v1599_v58  ;;  %v1543_v57 = vsel %vm904_vm0, %v1161_v6, 0.0  ;;  %v1326_v47 = vpop.xlane.xlu0 %1325  ;;  %v11308_v6 = vld [vmem:[#allocation62_spill] sm:$0xff] }
 0x1ca   : > { %v1540_v14 = vsel %vm904_vm0, %v1160_v3, 0.0  ;;  %v9515_v35 = vpop.eup %7280  ;;  %v9519_v27 = vadd.f32 %v11306_v32, %v11302_v45  ;;  %v5258_v20 = vadd.f32 1.0, %v7273_v22  ;;  %7300 = vpow2.f32 %v6782_v43 }
 0x1cb   : > { %v9521_v21 = vcombine.low %v3044_v7, %v3051_v24  ;;  %v9523_v0 = vpop.eup %7282  ;;  %v5257_v41 = vadd.f32 1.0, %v7277_v62  ;;  %7302 = vpow2.f32 %v6778_v38  ;;  %v1598_v58 = vadd.f32 %v1320_v4, %v11161_v9  ;;  %1544 = vadd.xlane.f32.xlu1 %v1543_v57 }
 0x1cc   : > { %11307 = vst [vmem:[#allocation33_spill] sm:$0xff] %v9519_v27  ;;  %v1934_v3 = vrot.slane %v11308_v6, %v11220_v17  ;;  %v9528_v56 = vpop.eup %7284  ;;  %7304 = vrcp.f32 %v5255_v30  ;;  %v5260_v61 = vadd.f32 1.0, %v7279_v10  ;;  %v1601_v45 = vadd.f32 %v1329_v53, %v11161_v9  ;;  %1541 = vadd.xlane.f32.xlu0 %v1540_v14  ;;  %v1335_v38 = vpop.xlane.xlu1 %1334 }
 0x1cd   : > { %v9531_v22 = vcombine.low %v3093_v13, %v3100_v2  ;;  %v9533_v7 = vpop.eup %7286  ;;  %7306 = vpow2.f32 %v6785_v52  ;;  %v6784_v24 = vmul.f32 -1.442695, %v1598_v58  ;;  %v1938_v4 = vrot.slane %v11308_v6, %v11241_v12  ;;  %v1332_v13 = vpop.xlane.xlu0 %1331 }
 0x1ce   : > { %v1942_v43 = vrot.slane %v11308_v6, %v11245_v51  ;;  %v9539_v62 = vpop.eup %7288  ;;  %7308 = vrcp.f32 %v5258_v20  ;;  %v6787_v30 = vmul.f32 -1.442695, %v1601_v45  ;;  %v1600_v10 = vadd.f32 %v1326_v47, %v11161_v9 }
 0x1cf   : > { %11309 = vst [vmem:[#allocation11_spill] sm:$0xff] %v9539_v62  ;;  %v1946_v2 = vrot.slane %v11308_v6, %v11247_v55  ;;  %v9544_v52 = vpop.eup %7290  ;;  %7310 = vrcp.f32 %v5257_v41  ;;  %v1950_v48 = vrot.slane %v11308_v6, %v11248_v23  ;;  %v1954_v53 = vrot.slane %v11308_v6, %v11249_v15 }
 0x1d0   : > { %11310 = vst [vmem:[#allocation13_spill] sm:$0xff] %v9544_v52  ;;  %v1958_v57 = vrot.slane %v11308_v6, %v11250_v29  ;;  %v7293_v14 = vpop.eup %7292  ;;  %v5633_v32 = vadd.f32 %v9479_v54, %v11253_v1  ;;  %7312 = vrcp.f32 %v5260_v61  ;;  %v1603_v20 = vadd.f32 %v1335_v38, %v11161_v9  ;;  %v1341_v49 = vpop.xlane.xlu1 %1340 }
 0x1d1   : > { %v1962_v47 = vrot.slane %v11308_v6, %v11252_v26  ;;  %v7295_v41 = vpop.eup %7294  ;;  %v5632_v58 = vadd.f32 %v9489_v31, %v11253_v1  ;;  %v5264_v45 = vadd.f32 1.0, %v7293_v14  ;;  %7314 = vpow2.f32 %v6784_v24  ;;  %v1338_v38 = vpop.xlane.xlu0 %1337 }
 0x1d2   : > { %v1602_v50 = vadd.f32 %v1332_v13, %v11161_v9  ;;  %v7297_v63 = vpop.eup %7296  ;;  %v5634_v52 = vadd.f32 %v9503_v18, %v11253_v1  ;;  %v5263_v54 = vadd.f32 1.0, %v7295_v41  ;;  %7316 = vpow2.f32 %v6787_v30 }
 0x1d3   : > { %v6786_v61 = vmul.f32 -1.442695, %v1600_v10  ;;  %v9562_v62 = vpop.eup %7298  ;;  %7318 = vrcp.f32 %v5264_v45  ;;  %v5266_v6 = vadd.f32 1.0, %v7297_v63  ;;  %v1605_v27 = vadd.f32 %v1341_v49, %v11161_v9 }
 0x1d4   : > { %v9565_v31 = vcombine.low %v1934_v3, %v1938_v4  ;;  %v7301_v24 = vpop.eup %7300  ;;  %7320 = vrcp.f32 %v5263_v54  ;;  %v6789_v13 = vmul.f32 -1.442695, %v1603_v20  ;;  %v1604_v14 = vadd.f32 %v1338_v38, %v11161_v9  ;;  %v1347_v45 = vpop.xlane.xlu1 %1346 }
 0x1d5   : > { %v9568_v44 = vcombine.low %v1942_v43, %v1946_v2  ;;  %v9570_v18 = vpop.eup %7302  ;;  %v6021_v30 = vrot.slane %v5633_v32, %v11256_v16  ;;  %7322 = vrcp.f32 %v5266_v6  ;;  %v5265_v10 = vadd.f32 1.0, %v7301_v24  ;;  %v1344_v43 = vpop.xlane.xlu0 %1343 }
 0x1d6   : > { %v6788_v41 = vmul.f32 -1.442695, %v1602_v50  ;;  %v9573_v63 = vpop.eup %7304  ;;  %v6017_v49 = vrot.slane %v5632_v58, %v11257_v11  ;;  %v5635_v3 = vadd.f32 %v9493_v28, %v11253_v1  ;;  %v6026_v4 = vrot.slane %v5634_v52, %v8801_v46 }
 0x1d7   : > { %7324 = vpow2.f32 %v6786_v61  ;;  %v7307_v2 = vpop.eup %7306  ;;  %v5636_v20 = vadd.f32 %v9523_v0, %v11253_v1  ;;  %v6791_v32 = vmul.f32 -1.442695, %v1605_v27  ;;  %v1607_v50 = vadd.f32 %v1347_v45, %v11161_v9 }
 0x1d8   : > { %7326 = vrcp.f32 %v5265_v10  ;;  %v9582_v54 = vpop.eup %7308  ;;  %v5268_v38 = vadd.f32 1.0, %v7307_v2  ;;  %v6790_v58 = vmul.f32 -1.442695, %v1604_v14  ;;  %v1606_v6 = vadd.f32 %v1344_v43, %v11161_v9  ;;  %v9591_v0 = vpop.xlane.xlu1 %1352 }
 0x1d9   : > { %11311 = vst [vmem:[#allocation35_spill] sm:$0xff] %v9582_v54  ;;  %7328 = vpow2.f32 %v6789_v13  ;;  %v9585_v28 = vpop.eup %7310  ;;  %v9589_v52 = vadd.f32 %v9515_v35, %v11253_v1  ;;  %v6793_v61 = vmul.f32 -1.442695, %v1607_v50  ;;  %v9593_v27 = vcombine.low %v1950_v48, %v1954_v53  ;;  %v1350_v14 = vpop.xlane.xlu0 %1349 }
 0x1da   : > { %7330 = vpow2.f32 %v6788_v41  ;;  %v9595_v24 = vpop.eup %7312  ;;  %v6022_v10 = vsel %vm4630_vm1, %v6021_v30, %v6017_v49  ;;  %v6031_v13 = vrot.slane %v5635_v3, %v11259_v19  ;;  %v9599_v45 = vcombine.low %v1958_v57, %v1962_v47 }
 0x1db   : > { %11312 = vst [vmem:[#allocation37_spill] sm:$0xff] %v9595_v24  ;;  %7332 = vrcp.f32 %v5268_v38  ;;  %v7315_v43 = vpop.eup %7314  ;;  %v6027_v35 = vsel %vm4637_vm2, %v6026_v4, %v6022_v10  ;;  %v6036_v41 = vrot.slane %v5636_v20, %v11260_v8  ;;  %v1608_v2 = vadd.f32 %v1350_v14, %v11161_v9 }
 0x1dc   : > { %7334 = vpow2.f32 %v6791_v32  ;;  %v7317_v48 = vpop.eup %7316  ;;  %v9606_v53 = vadd.f32 %v9528_v56, %v11253_v1  ;;  %v5267_v30 = vadd.f32 1.0, %v7315_v43  ;;  %v6792_v49 = vmul.f32 -1.442695, %v1606_v6  ;;  %v1359_v4 = vpop.xlane.xlu1 %1358  ;;  %4527 = vperm.xlu1 %6989, %v9521_v21  }
 0x1dd   : > { %7336 = vpow2.f32 %v6790_v58  ;;  %v7319_v3 = vpop.eup %7318  ;;  %v5270_v47 = vadd.f32 1.0, %v7317_v48  ;;  %v2965_v20 = vrot.slane %v9565_v31, %v11272_v36  ;;  %v6794_v56 = vmul.f32 -1.442695, %v1608_v2  ;;  %v1356_v58 = vpop.xlane.xlu0 %1355 }
 0x1de   : > { %7338 = vpow2.f32 %v6793_v61  ;;  %v7321_v32 = vpop.eup %7320  ;;  %v5649_v50 = vadd.f32 %v7319_v3, %v11253_v1  ;;  %v1611_v38 = vadd.f32 %v1359_v4, %v11161_v9  ;;  %v6032_v10 = vsel %vm11118_vm3, %v6031_v13, %v6027_v35 }
 0x1df   : > { %7340 = vrcp.f32 %v5267_v30  ;;  %v7323_v6 = vpop.eup %7322  ;;  %v5648_v14 = vadd.f32 %v7321_v32, %v11253_v1  ;;  %v1610_v61 = vadd.f32 %v1356_v58, %v11161_v9  ;;  %v9619_v43 = vsel %vm11117_vm4, %v6036_v41, %v6032_v10 }
 0x1e0   : > { %7342 = vrcp.f32 %v5270_v47  ;;  %v6100_v2 = vrot.slane %v5649_v50, %v11256_v16  ;;  %v5651_v13 = vadd.f32 %v7323_v6, %v11253_v1  ;;  %v6797_v3 = vmul.f32 -1.442695, %v1611_v38  ;;  %v1365_v47 = vpop.xlane.xlu1 %1364  ;;  %4530 = vperm.xlu1 %6989, %v9531_v22  }
 0x1e1   : > { %v7325_v21 = vpop.eup %7324  ;;  %7344 = vpow2.f32 %v6792_v49  ;;  %v6096_v30 = vrot.slane %v5648_v14, %v11257_v11  ;;  %v9628_v41 = vadd.f32 1.0, %v9533_v7  ;;  %v1362_v58 = vpop.xlane.xlu0 %1361  ;;  %v2972_v49 = vrot.slane %v9568_v44, %v11272_v36 }
 0x1e2   : > { %v7327_v48 = vpop.eup %7326  ;;  %v5269_v35 = vadd.f32 1.0, %v7325_v21  ;;  %7346 = vpow2.f32 %v6794_v56  ;;  %v6796_v6 = vmul.f32 -1.442695, %v1610_v61  ;;  %v1613_v38 = vadd.f32 %v1365_v47, %v11161_v9 }
 0x1e3   : > { %v7329_v4 = vpop.eup %7328  ;;  %v5650_v32 = vadd.f32 %v7327_v48, %v11253_v1  ;;  %v1612_v7 = vadd.f32 %v1362_v58, %v11161_v9  ;;  %v6101_v56 = vsel %vm4630_vm1, %v6100_v2, %v6096_v30  ;;  %v6110_v48 = vrot.slane %v5651_v13, %v11259_v19 }
 0x1e4   : > { %v7331_v50 = vpop.eup %7330  ;;  %7348 = vrcp.f32 %v5269_v35  ;;  %v5272_v10 = vadd.f32 1.0, %v7329_v4  ;;  %v6799_v4 = vmul.f32 -1.442695, %v1613_v38  ;;  %v2979_v47 = vrot.slane %v9593_v27, %v11272_v36 }
 0x1e5   : > { %v7333_v14 = vpop.eup %7332  ;;  %v6105_v22 = vrot.slane %v5650_v32, %v8801_v46  ;;  %v5271_v21 = vadd.f32 1.0, %v7331_v50  ;;  %7350 = vpow2.f32 %v6797_v3  ;;  %v1371_v32 = vpop.xlane.xlu1 %1370  ;;  %v6798_v57 = vmul.f32 -1.442695, %v1612_v7 }
 0x1e6   : > { %v7335_v31 = vpop.eup %7334  ;;  %v5653_v44 = vadd.f32 %v7333_v14, %v11253_v1  ;;  %7352 = vrcp.f32 %v5272_v10  ;;  %v2986_v13 = vrot.slane %v9599_v45, %v11272_v36  ;;  %v2987_v10 = vcombine.low %v2965_v20, %v2972_v49 }
 0x1e7   : > { %v7337_v35 = vpop.eup %7336  ;;  %7354 = vrcp.f32 %v5271_v21  ;;  %v5274_v61 = vadd.f32 1.0, %v7335_v31  ;;  %v6106_v3 = vsel %vm4637_vm2, %v6105_v22, %v6101_v56  ;;  %v1615_v27 = vadd.f32 %v1371_v32, %v11161_v9 }
 0x1e8   : > { %v7339_v50 = vpop.eup %7338  ;;  %v5273_v58 = vadd.f32 1.0, %v7337_v35  ;;  %7356 = vpow2.f32 %v6796_v6  ;;  %v6120_v31 = vrot.slane %v5653_v44, %v8819_v59  ;;  %v2988_v6 = vcombine.low %v2979_v47, %v2986_v13 }
 0x1e9   : > { %v7341_v2 = vpop.eup %7340  ;;  %7358 = vrcp.f32 %v5274_v61  ;;  %v5276_v30 = vadd.f32 1.0, %v7339_v50  ;;  %v2995_v7 = vrot.slane %v2987_v10, %v11272_v36  ;;  %v6111_v56 = vsel %vm11118_vm3, %v6110_v48, %v6106_v3  ;;  %v11313_v61 = vld [vmem:[#allocation26_spill] sm:$0xff] }
 0x1ea   : > { %v7343_v14 = vpop.eup %7342  ;;  %v5652_v38 = vadd.f32 %v7341_v2, %v11253_v1  ;;  %7360 = vrcp.f32 %v5273_v58  ;;  %v3002_v44 = vrot.slane %v2988_v6, %v11272_v36  ;;  %v6801_v35 = vmul.f32 -1.442695, %v1615_v27 }
 0x1eb   : > { %v7345_v21 = vpop.eup %7344  ;;  %v5655_v22 = vadd.f32 %v7343_v14, %v11253_v1  ;;  %7362 = vrcp.f32 %v5276_v30  ;;  %v2030_v32 = vrot.slane %v11313_v61, %v11220_v17  ;;  %v2038_v14 = vrot.slane %v11313_v61, %v11245_v51 }
 0x1ec   : > { %v6115_v45 = vrot.slane %v5652_v38, %v11260_v8  ;;  %v5275_v20 = vadd.f32 1.0, %v7345_v21  ;;  %7364 = vpow2.f32 %v6799_v4  ;;  %v7347_v49 = vpop.eup %7346  ;;  %v3003_v30 = vcombine.low %v2995_v7, %v3002_v44 }
 0x1ed   : > { %7366 = vpow2.f32 %v6798_v57  ;;  %v6130_v47 = vrot.slane %v5655_v22, %v11261_v5  ;;  %v5277_v2 = vadd.f32 1.0, %v7347_v49  ;;  %v2034_v57 = vrot.slane %v11313_v61, %v11241_v12 }
 0x1ee   : > { %v7349_v50 = vpop.eup %7348  ;;  %v6116_v58 = vsel %vm11117_vm4, %v6115_v45, %v6111_v56  ;;  %7368 = vrcp.f32 %v5275_v20  ;;  %v2042_v38 = vrot.slane %v11313_v61, %v11247_v55  ;;  %4524 = vperm.xlu0 %6988, %v3003_v30   ;;  %v2046_v22 = vrot.slane %v11313_v61, %v11248_v23 }
 0x1ef   : > { %v7351_v48 = vpop.eup %7350  ;;  %v6121_v3 = vsel %vm4658_vm5, %v6120_v31, %v6116_v58  ;;  %v5654_v4 = vadd.f32 %v7349_v50, %v11253_v1  ;;  %7370 = vrcp.f32 %v5277_v2  ;;  %v2050_v56 = vrot.slane %v11313_v61, %v11249_v15 }
 0x1f0   : > { %v7353_v13 = vpop.eup %7352  ;;  %v5280_v10 = vadd.f32 1.0, %v7351_v48  ;;  %7372 = vpow2.f32 %v6801_v35  ;;  %v2054_v45 = vrot.slane %v11313_v61, %v11250_v29  ;;  %v2058_v35 = vrot.slane %v11313_v61, %v11252_v26 }
 0x1f1   : > { %v7355_v27 = vpop.eup %7354  ;;  %v6125_v21 = vrot.slane %v5654_v4, %v11264_v33  ;;  %v5657_v31 = vadd.f32 %v7353_v13, %v11253_v1  ;;  %v3102_v30 = vcombine.low %v2030_v32, %v2034_v57  ;;  %v1609_v61 = vadd.f32 %v9591_v0, %v11161_v9 }
 0x1f2   : > { %v7357_v6 = vpop.eup %7356  ;;  %v5656_v7 = vadd.f32 %v7355_v27, %v11253_v1  ;;  %7374 = vrcp.f32 %v5280_v10  ;;  %v3103_v27 = vcombine.low %v2038_v14, %v2042_v38  ;;  %vm6488_vm0 = vcmask 1042434  }
 0x1f3   : > { %v7359_v20 = vpop.eup %7358  ;;  %v6126_v49 = vsel %vm4665_vm6, %v6125_v21, %v6121_v3  ;;  %v6140_v44 = vrot.slane %v5657_v31, %v11269_v34  ;;  %v5279_v50 = vadd.f32 1.0, %v7357_v6  ;;  %v3104_v3 = vcombine.low %v2046_v22, %v2050_v56 }
 0x1f4   : > { %v7361_v58 = vpop.eup %7360  ;;  %v6131_v2 = vsel %vm4672_vm7, %v6130_v47, %v6126_v49  ;;  %v6135_v48 = vrot.slane %v5656_v7, %v11270_v40  ;;  %v5659_v4 = vadd.f32 %v7359_v20, %v11253_v1  ;;  %v3105_v47 = vcombine.low %v2054_v45, %v2058_v35 }
 0x1f5   : > { %v7363_v13 = vpop.eup %7362  ;;  %v5658_v10 = vadd.f32 %v7361_v58, %v11253_v1  ;;  %7376 = vrcp.f32 %v5279_v50  ;;  %v3112_v20 = vrot.slane %v3102_v30, %v11272_v36  ;;  %v3119_v22 = vrot.slane %v3103_v27, %v11272_v36  ;;  %v1368_v58 = vpop.xlane.xlu0 %1367 }
 0x1f6   : > { %v7365_v21 = vpop.eup %7364  ;;  %v6136_v31 = vsel %vm4679_vm8, %v6135_v48, %v6131_v2  ;;  %v5661_v6 = vadd.f32 %v7363_v13, %v11253_v1  ;;  %v6150_v7 = vrot.slane %v5659_v4, %v11274_v60  ;;  %v3126_v56 = vrot.slane %v3104_v3, %v11272_v36 }
 0x1f7   : > { %v7367_v49 = vpop.eup %7366  ;;  %v6145_v32 = vrot.slane %v5658_v10, %v11275_v42  ;;  %v5282_v57 = vadd.f32 1.0, %v7365_v21  ;;  %v6141_v14 = vsel %vm4686_vm9, %v6140_v44, %v6136_v31  ;;  %v3133_v35 = vrot.slane %v3105_v47, %v11272_v36 }
 0x1f8   : > { %v7369_v50 = vpop.eup %7368  ;;  %v5281_v38 = vadd.f32 1.0, %v7367_v49  ;;  %v6160_v48 = vrot.slane %v5661_v6, %v11278_v39  ;;  %v6795_v4 = vmul.f32 -1.442695, %v1609_v61  ;;  %v3134_v30 = vcombine.low %v3112_v20, %v3119_v22 }
 0x1f9   : > { %v6146_v0 = vsel %vm4693_vm10, %v6145_v32, %v6141_v14  ;;  %v5660_v45 = vadd.f32 %v7369_v50, %v11253_v1  ;;  %7378 = vrcp.f32 %v5282_v57  ;;  %v7371_v2 = vpop.eup %7370  ;;  %v3135_v27 = vcombine.low %v3126_v56, %v3133_v35  ;;  %v11314_v32 = vld [vmem:[#allocation24_spill] sm:$0xff] }
 0x1fa   : > { %7380 = vrcp.f32 %v5281_v38  ;;  %v7373_v44 = vpop.eup %7372  ;;  %v5662_v10 = vadd.f32 %v7371_v2, %v11253_v1  ;;  %v1614_v3 = vadd.f32 %v1368_v58, %v11161_v9  ;;  %v6151_v31 = vsel %vm4700_vm11, %v6150_v7, %v6146_v0 }
 0x1fb   : > { %v6155_v13 = vrot.slane %v5660_v45, %v11290_v37  ;;  %v5284_v49 = vadd.f32 1.0, %v7373_v44  ;;  %v3142_v47 = vrot.slane %v3134_v30, %v11272_v36  ;;  %v2222_v6 = vrot.slane %v9507_v25, %v11220_v17  ;;  %v1377_v45 = vpop.xlane.xlu1 %1376 }
 0x1fc   : > { %v7375_v21 = vpop.eup %7374  ;;  %v6165_v57 = vrot.slane %v5662_v10, %v11314_v32  ;;  %v3149_v50 = vrot.slane %v3135_v27, %v11272_v36  ;;  %v6800_v38 = vmul.f32 -1.442695, %v1614_v3  ;;  %v2226_v7 = vrot.slane %v9507_v25, %v11241_v12 }
 0x1fd   : > { %v6156_v61 = vsel %vm4707_vm12, %v6155_v13, %v6151_v31  ;;  %v5665_v20 = vadd.f32 %v7375_v21, %v11253_v1  ;;  %7382 = vrcp.f32 %v5284_v49  ;;  %v2230_v0 = vrot.slane %v9507_v25, %v11245_v51 }
 0x1fe   : > { %v6161_v14 = vsel %vm4714_vm13, %v6160_v48, %v6156_v61  ;;  %7384 = vpow2.f32 %v6795_v4  ;;  %v3150_v58 = vcombine.low %v3142_v47, %v3149_v50  ;;  %v2234_v48 = vrot.slane %v9507_v25, %v11247_v55  ;;  %v11316_v61 = vld [vmem:[#allocation74_spill] sm:$0xff] }
 0x1ff   : > { %v7377_v22 = vpop.eup %7376  ;;  %v9710_v56 = vsel %vm4721_vm14, %v6165_v57, %v6161_v14  ;;  %v6179_v35 = vrot.slane %v5665_v20, %v11256_v16  ;;  %7386 = vpow2.f32 %v6800_v38  ;;  %v2238_v4 = vrot.slane %v9507_v25, %v11248_v23 }
 0x200   : > { %11315 = vst [vmem:[#allocation38_spill] sm:$0xff] %v9710_v56  ;;  %v5664_v2 = vadd.f32 %v7377_v22, %v11253_v1  ;;  %4533 = vperm.xlu1 %6989, %v3150_v58   ;;  %v2242_v30 = vrot.slane %v9507_v25, %v11249_v15  ;;  %v2246_v44 = vrot.slane %v9507_v25, %v11250_v29 }
 0x201   : > { %v2250_v13 = vrot.slane %v9507_v25, %v11252_v26  ;;  %v3396_v27 = vcombine.low %v2222_v6, %v2226_v7  ;;  %v3397_v3 = vcombine.low %v2230_v0, %v2234_v48  ;;  %v1617_v21 = vadd.f32 %v1377_v45, %v11161_v9 }
 0x202   : > { %v6175_v10 = vrot.slane %v5664_v2, %v11257_v11  ;;  %v3398_v49 = vcombine.low %v2238_v4, %v2242_v30  ;;  %v2062_v57 = vrot.slane %v11316_v61, %v11220_v17  ;;  %v2066_v20 = vrot.slane %v11316_v61, %v11241_v12 }
 0x203   : > { %v7379_v31 = vpop.eup %7378  ;;  %v3399_v47 = vcombine.low %v2246_v44, %v2250_v13  ;;  %v3406_v38 = vrot.slane %v3396_v27, %v11272_v36  ;;  %v3413_v6 = vrot.slane %v3397_v3, %v11272_v36  ;;  %v6803_v0 = vmul.f32 -1.442695, %v1617_v21 }
 0x204   : > { %v7381_v50 = vpop.eup %7380  ;;  %v6180_v14 = vsel %vm4630_vm1, %v6179_v35, %v6175_v10  ;;  %v5667_v25 = vadd.f32 %v7379_v31, %v11253_v1  ;;  %v3420_v22 = vrot.slane %v3398_v49, %v11272_v36  ;;  %v2070_v48 = vrot.slane %v11316_v61, %v11245_v51 }
 0x205   : > { %v5666_v7 = vadd.f32 %v7381_v50, %v11253_v1  ;;  %v3427_v58 = vrot.slane %v3399_v47, %v11272_v36  ;;  %v3428_v2 = vcombine.low %v3406_v38, %v3413_v6  ;;  %v2074_v35 = vrot.slane %v11316_v61, %v11247_v55  ;;  %v1374_v38 = vpop.xlane.xlu0 %1373 }
 0x206   : > { %v6189_v45 = vrot.slane %v5667_v25, %v11259_v19  ;;  %7388 = vpow2.f32 %v6803_v0  ;;  %v2078_v44 = vrot.slane %v11316_v61, %v11248_v23  ;;  %v2082_v27 = vrot.slane %v11316_v61, %v11249_v15 }
 0x207   : > { %v6184_v4 = vrot.slane %v5666_v7, %v8801_v46  ;;  %v3429_v30 = vcombine.low %v3420_v22, %v3427_v58  ;;  %v7383_v13 = vpop.eup %7382  ;;  %v3436_v10 = vrot.slane %v3428_v2, %v11272_v36  ;;  %v2086_v3 = vrot.slane %v11316_v61, %v11250_v29 }
 0x208   : > { %v2090_v21 = vrot.slane %v11316_v61, %v11252_v26  ;;  %v9754_v31 = vpop.eup %7384  ;;  %v9758_v47 = vadd.f32 %v7383_v13, %v11253_v1  ;;  %v3151_v25 = vcombine.low %v2062_v57, %v2066_v20  ;;  %v3152_v22 = vcombine.low %v2070_v48, %v2074_v35  ;;  %v11318_v61 = vld [vmem:[#allocation25_spill] sm:$0xff] }
 0x209   : > { %v6185_v49 = vsel %vm4637_vm2, %v6184_v4, %v6180_v14  ;;  %v3443_v50 = vrot.slane %v3429_v30, %v11272_v36  ;;  %v7387_v6 = vpop.eup %7386  ;;  %v3153_v58 = vcombine.low %v2078_v44, %v2082_v27  ;;  %v1616_v20 = vadd.f32 %v1374_v38, %v11161_v9 }
 0x20a   : > { %v9762_v7 = vsel %vm11118_vm3, %v6189_v45, %v6185_v49  ;;  %v3154_v0 = vcombine.low %v2086_v3, %v2090_v21  ;;  %v5283_v2 = vadd.f32 1.0, %v7387_v6  ;;  %v3161_v14 = vrot.slane %v3151_v25, %v11272_v36  ;;  %v11317_v45 = vld [vmem:[#allocation33_spill] sm:$0xff]  ;;  %v1383_v21 = vpop.xlane.xlu1 %1382 }
 0x20b   : > { %v3444_v56 = vcombine.low %v3436_v10, %v3443_v50  ;;  %v3168_v4 = vrot.slane %v3152_v22, %v11272_v36  ;;  %v3175_v30 = vrot.slane %v3153_v58, %v11272_v36  ;;  %v2478_v48 = vrot.slane %v11317_v45, %v11220_v17 }
 0x20c   : > { %v3182_v57 = vrot.slane %v3154_v0, %v11272_v36  ;;  %7390 = vrcp.f32 %v5283_v2  ;;  %v2482_v35 = vrot.slane %v11317_v45, %v11241_v12  ;;  %v2486_v44 = vrot.slane %v11317_v45, %v11245_v51 }
 0x20d   : > { %4551 = vperm.xlu0 %6988, %v3444_v56   ;;  %v3183_v13 = vcombine.low %v3161_v14, %v3168_v4  ;;  %v6802_v27 = vmul.f32 -1.442695, %v1616_v20  ;;  %v2490_v3 = vrot.slane %v11317_v45, %v11247_v55  ;;  %v2494_v49 = vrot.slane %v11317_v45, %v11248_v23 }
 0x20e   : > { %v3184_v10 = vcombine.low %v3175_v30, %v3182_v57  ;;  %v2498_v56 = vrot.slane %v11317_v45, %v11249_v15  ;;  %v2502_v50 = vrot.slane %v11317_v45, %v11250_v29  ;;  %v2506_v25 = vrot.slane %v11317_v45, %v11252_v26 }
 0x20f   : > { %v3191_v38 = vrot.slane %v3183_v13, %v11272_v36  ;;  %7392 = vpow2.f32 %v6802_v27  ;;  %v3788_v22 = vcombine.low %v2478_v48, %v2482_v35  ;;  %v3789_v0 = vcombine.low %v2486_v44, %v2490_v3  ;;  %v1380_v3 = vpop.xlane.xlu0 %1379 }
 0x210   : > { %v3198_v6 = vrot.slane %v3184_v10, %v11272_v36  ;;  %v7389_v58 = vpop.eup %7388  ;;  %v3790_v2 = vcombine.low %v2494_v49, %v2498_v56  ;;  %v3791_v14 = vcombine.low %v2502_v50, %v2506_v25  ;;  %v1619_v4 = vadd.f32 %v1383_v21, %v11161_v9 }
 0x211   : > { %v5286_v30 = vadd.f32 1.0, %v7389_v58  ;;  %v3798_v20 = vrot.slane %v3788_v22, %v11272_v36  ;;  %v2094_v32 = vrot.slane %v11318_v61, %v11220_v17  ;;  %v3805_v45 = vrot.slane %v3789_v0, %v11272_v36 }
 0x212   : > { %v3199_v57 = vcombine.low %v3191_v38, %v3198_v6  ;;  %v3812_v13 = vrot.slane %v3790_v2, %v11272_v36  ;;  %v3819_v10 = vrot.slane %v3791_v14, %v11272_v36  ;;  %v6805_v48 = vmul.f32 -1.442695, %v1619_v4 }
 0x213   : > { %7394 = vrcp.f32 %v5286_v30  ;;  %v2098_v35 = vrot.slane %v11318_v61, %v11241_v12  ;;  %v2102_v44 = vrot.slane %v11318_v61, %v11245_v51  ;;  %v2106_v27 = vrot.slane %v11318_v61, %v11247_v55 }
 0x214   : > { %4536 = vperm.xlu1 %6989, %v3199_v57   ;;  %v3820_v21 = vcombine.low %v3798_v20, %v3805_v45  ;;  %v3821_v49 = vcombine.low %v3812_v13, %v3819_v10  ;;  %7396 = vpow2.f32 %v6805_v48  ;;  %v2110_v56 = vrot.slane %v11318_v61, %v11248_v23 }
 0x215   : > { %v2114_v50 = vrot.slane %v11318_v61, %v11249_v15  ;;  %v2118_v25 = vrot.slane %v11318_v61, %v11250_v29  ;;  %v2122_v38 = vrot.slane %v11318_v61, %v11252_v26  ;;  %v3200_v6 = vcombine.low %v2094_v32, %v2098_v35  ;;  %v11319_v32 = vld [vmem:[#allocation65_spill] sm:$0xff] }
 0x216   : > { %v7391_v22 = vpop.eup %7390  ;;  %v3828_v58 = vrot.slane %v3820_v21, %v11272_v36  ;;  %v3835_v0 = vrot.slane %v3821_v49, %v11272_v36  ;;  %v3201_v2 = vcombine.low %v2102_v44, %v2106_v27  ;;  %v1618_v14 = vadd.f32 %v1380_v3, %v11161_v9 }
 0x217   : > { %v5668_v4 = vadd.f32 %v7391_v22, %v11253_v1  ;;  %v3202_v30 = vcombine.low %v2110_v56, %v2114_v50  ;;  %v3203_v57 = vcombine.low %v2118_v25, %v2122_v38  ;;  %v3210_v20 = vrot.slane %v3200_v6, %v11272_v36  ;;  %v1389_v22 = vpop.xlane.xlu1 %1388 }
 0x218   : > { %v3836_v45 = vcombine.low %v3828_v58, %v3835_v0  ;;  %v3217_v13 = vrot.slane %v3201_v2, %v11272_v36  ;;  %v6804_v10 = vmul.f32 -1.442695, %v1618_v14  ;;  %v2542_v61 = vrot.slane %v11319_v32, %v11220_v17 }
 0x219   : > { %v7393_v48 = vpop.eup %7392  ;;  %v6194_v35 = vrot.slane %v5668_v4, %v11260_v8  ;;  %v3224_v44 = vrot.slane %v3202_v30, %v11272_v36  ;;  %v3231_v27 = vrot.slane %v3203_v57, %v11272_v36  ;;  %v2546_v3 = vrot.slane %v11319_v32, %v11241_v12 }
 0x21a   : > { %v5285_v21 = vadd.f32 1.0, %v7393_v48  ;;  %4575 = vperm.xlu0 %6988, %v3836_v45   ;;  %v3232_v49 = vcombine.low %v3210_v20, %v3217_v13  ;;  %7398 = vpow2.f32 %v6804_v10  ;;  %v2550_v56 = vrot.slane %v11319_v32, %v11245_v51 }
 0x21b   : > { %v6195_v50 = vsel %vm11117_vm4, %v6194_v35, %v9762_v7  ;;  %v3233_v25 = vcombine.low %v3224_v44, %v3231_v27  ;;  %v2554_v38 = vrot.slane %v11319_v32, %v11247_v55  ;;  %v2558_v6 = vrot.slane %v11319_v32, %v11248_v23 }
 0x21c   : > { %v11320_v58 = vrot.slane %v9758_v47, %v8819_v59  ;;  %7400 = vrcp.f32 %v5285_v21  ;;  %v3240_v2 = vrot.slane %v3232_v49, %v11272_v36  ;;  %v2562_v7 = vrot.slane %v11319_v32, %v11249_v15 }
 0x21d   : > { %v7395_v14 = vpop.eup %7394  ;;  %v3247_v4 = vrot.slane %v3233_v25, %v11272_v36  ;;  %v2566_v30 = vrot.slane %v11319_v32, %v11250_v29  ;;  %v2570_v57 = vrot.slane %v11319_v32, %v11252_v26  ;;  %v3886_v20 = vcombine.low %v2542_v61, %v2546_v3 }
 0x21e   : > { %v9835_v0 = vsel %vm4658_vm5, %v11320_v58, %v6195_v50  ;;  %v7397_v47 = vpop.eup %7396  ;;  %v9846_v45 = vadd.f32 %v7395_v14, %v11253_v1  ;;  %v3887_v13 = vcombine.low %v2550_v56, %v2554_v38  ;;  %v3888_v10 = vcombine.low %v2558_v6, %v2562_v7  ;;  %v11321_v56 = vld [vmem:[#allocation51_spill] sm:$0xff] }
 0x21f   : > { %v1621_v48 = vadd.f32 %v1389_v22, %v11161_v9  ;;  %v5288_v35 = vadd.f32 1.0, %v7397_v47  ;;  %v3248_v44 = vcombine.low %v3240_v2, %v3247_v4  ;;  %v3889_v27 = vcombine.low %v2566_v30, %v2570_v57  ;;  %v1386_v2 = vpop.xlane.xlu0 %1385 }
 0x220   : > { %v3896_v21 = vrot.slane %v3886_v20, %v11272_v36  ;;  %v6209_v49 = vrot.slane %v9846_v45, %v11261_v5  ;;  %v3903_v50 = vrot.slane %v3887_v13, %v11272_v36  ;;  %v3910_v32 = vrot.slane %v3888_v10, %v11272_v36 }
 0x221   : > { %v6807_v61 = vmul.f32 -1.442695, %v1621_v48  ;;  %7402 = vrcp.f32 %v5288_v35  ;;  %4539 = vperm.xlu1 %6989, %v3248_v44   ;;  %v3917_v3 = vrot.slane %v3889_v27, %v11272_v36  ;;  %v2126_v25 = vrot.slane %v11321_v56, %v11220_v17 }
 0x222   : > { %v2130_v38 = vrot.slane %v11321_v56, %v11241_v12  ;;  %v3918_v6 = vcombine.low %v3896_v21, %v3903_v50  ;;  %v2134_v22 = vrot.slane %v11321_v56, %v11245_v51  ;;  %v2138_v58 = vrot.slane %v11321_v56, %v11247_v55 }
 0x223   : > { %7404 = vpow2.f32 %v6807_v61  ;;  %v3919_v7 = vcombine.low %v3910_v32, %v3917_v3  ;;  %v2142_v14 = vrot.slane %v11321_v56, %v11248_v23  ;;  %v2146_v4 = vrot.slane %v11321_v56, %v11249_v15  ;;  %v11322_v61 = vld [vmem:[#allocation68_spill] sm:$0xff] }
 0x224   : > { %v2150_v30 = vrot.slane %v11321_v56, %v11250_v29  ;;  %v7399_v57 = vpop.eup %7398  ;;  %v3926_v20 = vrot.slane %v3918_v6, %v11272_v36  ;;  %v2154_v47 = vrot.slane %v11321_v56, %v11252_v26  ;;  %v3249_v45 = vcombine.low %v2126_v25, %v2130_v38 }
 0x225   : > { %v3250_v13 = vcombine.low %v2134_v22, %v2138_v58  ;;  %v5287_v10 = vadd.f32 1.0, %v7399_v57  ;;  %v3933_v48 = vrot.slane %v3919_v7, %v11272_v36  ;;  %v3251_v35 = vcombine.low %v2142_v14, %v2146_v4 }
 0x226   : > { %v1620_v44 = vadd.f32 %v1386_v2, %v11161_v9  ;;  %v7401_v27 = vpop.eup %7400  ;;  %v3252_v21 = vcombine.low %v2150_v30, %v2154_v47  ;;  %v3259_v50 = vrot.slane %v3249_v45, %v11272_v36  ;;  %v2606_v3 = vrot.slane %v11322_v61, %v11220_v17 }
 0x227   : > { %v3266_v32 = vrot.slane %v3250_v13, %v11272_v36  ;;  %v5670_v6 = vadd.f32 %v7401_v27, %v11253_v1  ;;  %7406 = vrcp.f32 %v5287_v10  ;;  %v3934_v56 = vcombine.low %v3926_v20, %v3933_v48 }
 0x228   : > { %v3273_v25 = vrot.slane %v3251_v35, %v11272_v36  ;;  %v3280_v38 = vrot.slane %v3252_v21, %v11272_v36  ;;  %v6806_v58 = vmul.f32 -1.442695, %v1620_v44  ;;  %v2610_v2 = vrot.slane %v11322_v61, %v11241_v12  ;;  %v1395_v44 = vpop.xlane.xlu1 %1394 }
 0x229   : > { %v3281_v22 = vcombine.low %v3259_v50, %v3266_v32  ;;  %v6204_v7 = vrot.slane %v5670_v6, %v11264_v33  ;;  %4581 = vperm.xlu0 %6988, %v3934_v56   ;;  %v2614_v14 = vrot.slane %v11322_v61, %v11245_v51  ;;  %v2618_v4 = vrot.slane %v11322_v61, %v11247_v55 }
 0x22a   : > { %v2622_v30 = vrot.slane %v11322_v61, %v11248_v23  ;;  %v3282_v57 = vcombine.low %v3273_v25, %v3280_v38  ;;  %7408 = vpow2.f32 %v6806_v58  ;;  %v2626_v47 = vrot.slane %v11322_v61, %v11249_v15 }
 0x22b   : > { %v3289_v20 = vrot.slane %v3281_v22, %v11272_v36  ;;  %v7403_v45 = vpop.eup %7402  ;;  %v6205_v13 = vsel %vm4665_vm6, %v6204_v7, %v9835_v0  ;;  %v2630_v10 = vrot.slane %v11322_v61, %v11250_v29  ;;  %v2634_v48 = vrot.slane %v11322_v61, %v11252_v26  ;;  %v11323_v7 = vld [vmem:[#allocation49_spill] sm:$0xff] }
 0x22c   : > { %v3984_v35 = vcombine.low %v2606_v3, %v2610_v2  ;;  %v5673_v21 = vadd.f32 %v7403_v45, %v11253_v1  ;;  %v6210_v50 = vsel %vm4672_vm7, %v6209_v49, %v6205_v13  ;;  %v3296_v32 = vrot.slane %v3282_v57, %v11272_v36 }
 0x22d   : > { %v7405_v27 = vpop.eup %7404  ;;  %v3985_v6 = vcombine.low %v2614_v14, %v2618_v4  ;;  %v3986_v25 = vcombine.low %v2622_v30, %v2626_v47  ;;  %v3987_v38 = vcombine.low %v2630_v10, %v2634_v48  ;;  %v1623_v3 = vadd.f32 %v1395_v44, %v11161_v9 }
 0x22e   : > { %v5290_v56 = vadd.f32 1.0, %v7405_v27  ;;  %v3994_v0 = vrot.slane %v3984_v35, %v11272_v36  ;;  %v6219_v22 = vrot.slane %v5673_v21, %v11269_v34  ;;  %v3297_v58 = vcombine.low %v3289_v20, %v3296_v32  ;;  %v1392_v35 = vpop.xlane.xlu0 %1391 }
 0x22f   : > { %v4001_v61 = vrot.slane %v3985_v6, %v11272_v36  ;;  %v4008_v2 = vrot.slane %v3986_v25, %v11272_v36  ;;  %v4015_v49 = vrot.slane %v3987_v38, %v11272_v36  ;;  %v2158_v14 = vrot.slane %v11323_v7, %v11220_v17 }
 0x230   : > { %7410 = vrcp.f32 %v5290_v56  ;;  %4542 = vperm.xlu1 %6989, %v3297_v58   ;;  %v6809_v30 = vmul.f32 -1.442695, %v1623_v3  ;;  %v2162_v57 = vrot.slane %v11323_v7, %v11241_v12  ;;  %v2166_v20 = vrot.slane %v11323_v7, %v11245_v51  ;;  %v11324_v3 = vld [vmem:[#allocation71_spill] sm:$0xff] }
 0x231   : > { %v4016_v4 = vcombine.low %v3994_v0, %v4001_v61  ;;  %v7407_v47 = vpop.eup %7406  ;;  %v4017_v45 = vcombine.low %v4008_v2, %v4015_v49  ;;  %v2170_v13 = vrot.slane %v11323_v7, %v11247_v55  ;;  %v2174_v10 = vrot.slane %v11323_v7, %v11248_v23 }
 0x232   : > { %v2178_v48 = vrot.slane %v11323_v7, %v11249_v15  ;;  %v5672_v44 = vadd.f32 %v7407_v47, %v11253_v1  ;;  %7412 = vpow2.f32 %v6809_v30  ;;  %v2182_v21 = vrot.slane %v11323_v7, %v11250_v29 }
 0x233   : > { %v4024_v27 = vrot.slane %v4016_v4, %v11272_v36  ;;  %v4031_v32 = vrot.slane %v4017_v45, %v11272_v36  ;;  %v2186_v6 = vrot.slane %v11323_v7, %v11252_v26  ;;  %v3298_v56 = vcombine.low %v2158_v14, %v2162_v57 }
 0x234   : > { %v3299_v25 = vcombine.low %v2166_v20, %v2170_v13  ;;  %v7409_v38 = vpop.eup %7408  ;;  %v6214_v0 = vrot.slane %v5672_v44, %v11270_v40  ;;  %v3300_v58 = vcombine.low %v2174_v10, %v2178_v48  ;;  %v1622_v61 = vadd.f32 %v1392_v35, %v11161_v9 }
 0x235   : > { %v2670_v2 = vrot.slane %v11324_v3, %v11220_v17  ;;  %v5289_v49 = vadd.f32 1.0, %v7409_v38  ;;  %v4032_v4 = vcombine.low %v4024_v27, %v4031_v32  ;;  %v3301_v30 = vcombine.low %v2182_v21, %v2186_v6 }
 0x236   : > { %v3308_v47 = vrot.slane %v3298_v56, %v11272_v36  ;;  %v6215_v45 = vsel %vm4679_vm8, %v6214_v0, %v6210_v50  ;;  %v3315_v7 = vrot.slane %v3299_v25, %v11272_v36  ;;  %v3322_v14 = vrot.slane %v3300_v58, %v11272_v36 }
 0x237   : > { %v6808_v57 = vmul.f32 -1.442695, %v1622_v61  ;;  %v9936_v20 = vsel %vm4686_vm9, %v6219_v22, %v6215_v45  ;;  %7414 = vrcp.f32 %v5289_v49  ;;  %4587 = vperm.xlu0 %6988, %v4032_v4   ;;  %v3329_v13 = vrot.slane %v3301_v30, %v11272_v36 }
 0x238   : > { %v2674_v10 = vrot.slane %v11324_v3, %v11241_v12  ;;  %v3330_v48 = vcombine.low %v3308_v47, %v3315_v7  ;;  %v2678_v50 = vrot.slane %v11324_v3, %v11245_v51  ;;  %v2682_v35 = vrot.slane %v11324_v3, %v11247_v55 }
 0x239   : > { %7416 = vpow2.f32 %v6808_v57  ;;  %v3331_v27 = vcombine.low %v3322_v14, %v3329_v13  ;;  %v2686_v22 = vrot.slane %v11324_v3, %v11248_v23  ;;  %v2690_v21 = vrot.slane %v11324_v3, %v11249_v15 }
 0x23a   : > { %v7411_v44 = vpop.eup %7410  ;;  %v2694_v32 = vrot.slane %v11324_v3, %v11250_v29  ;;  %7418 = vrcp.f32 %v9628_v41  ;;  %v3338_v6 = vrot.slane %v3330_v48, %v11272_v36  ;;  %v2698_v56 = vrot.slane %v11324_v3, %v11252_v26  ;;  %v11325_v41 = vld [vmem:[#allocation53_spill] sm:$0xff] }
 0x23b   : > { %v4082_v25 = vcombine.low %v2670_v2, %v2674_v10  ;;  %v5262_v38 = vadd.f32 1.0, %v9562_v62  ;;  %v3345_v0 = vrot.slane %v3331_v27, %v11272_v36  ;;  %v4083_v58 = vcombine.low %v2678_v50, %v2682_v35 }
 0x23c   : > { %v4084_v61 = vcombine.low %v2686_v22, %v2690_v21  ;;  %v7413_v49 = vpop.eup %7412  ;;  %v5261_v4 = vadd.f32 1.0, %v9570_v18  ;;  %v4085_v30 = vcombine.low %v2694_v32, %v2698_v56  ;;  %v2190_v45 = vrot.slane %v11325_v41, %v11220_v17 }
 0x23d   : > { %v4092_v47 = vrot.slane %v4082_v25, %v11272_v36  ;;  %v5292_v7 = vadd.f32 1.0, %v7413_v49  ;;  %v3346_v14 = vcombine.low %v3338_v6, %v3345_v0  ;;  %v4099_v3 = vrot.slane %v4083_v58, %v11272_v36 }
 0x23e   : > { %v4106_v2 = vrot.slane %v4084_v61, %v11272_v36  ;;  %v5675_v62 = vadd.f32 %v7411_v44, %v11253_v1  ;;  %v4113_v57 = vrot.slane %v4085_v30, %v11272_v36  ;;  %v2194_v13 = vrot.slane %v11325_v41, %v11241_v12  ;;  %v1401_v44 = vpop.xlane.xlu1 %1400 }
 0x23f   : > { %v2198_v18 = vrot.slane %v11325_v41, %v11245_v51  ;;  %7420 = vrcp.f32 %v5262_v38  ;;  %4545 = vperm.xlu1 %6989, %v3346_v14   ;;  %v4114_v10 = vcombine.low %v4092_v47, %v4099_v3  ;;  %v2202_v48 = vrot.slane %v11325_v41, %v11247_v55 }
 0x240   : > { %v2206_v50 = vrot.slane %v11325_v41, %v11248_v23  ;;  %7422 = vrcp.f32 %v5292_v7  ;;  %v4115_v35 = vcombine.low %v4106_v2, %v4113_v57  ;;  %v2210_v27 = vrot.slane %v11325_v41, %v11249_v15 }
 0x241   : > { %v2214_v22 = vrot.slane %v11325_v41, %v11250_v29  ;;  %v7415_v21 = vpop.eup %7414  ;;  %v4122_v32 = vrot.slane %v4114_v10, %v11272_v36  ;;  %v2218_v6 = vrot.slane %v11325_v41, %v11252_v26  ;;  %v3347_v56 = vcombine.low %v2190_v45, %v2194_v13  ;;  %v11327_v13 = vld [vmem:[#allocation76_spill] sm:$0xff] }
 0x242   : > { %v3348_v25 = vcombine.low %v2198_v18, %v2202_v48  ;;  %v6229_v0 = vrot.slane %v5675_v62, %v11274_v60  ;;  %v5674_v58 = vadd.f32 %v7415_v21, %v11253_v1  ;;  %v4129_v61 = vrot.slane %v4115_v35, %v11272_v36  ;;  %v1407_v35 = vpop.xlane.xlu1 %1406 }
 0x243   : > { %v7417_v38 = vpop.eup %7416  ;;  %v3349_v49 = vcombine.low %v2206_v50, %v2210_v27  ;;  %v3350_v47 = vcombine.low %v2214_v22, %v2218_v6  ;;  %v3357_v7 = vrot.slane %v3347_v56, %v11272_v36  ;;  %7424 = vrcp.f32 %v5261_v4 }
 0x244   : > { %v5291_v30 = vadd.f32 1.0, %v7417_v38  ;;  %v3364_v14 = vrot.slane %v3348_v25, %v11272_v36  ;;  %v9985_v3 = vpop.eup %7418  ;;  %v6224_v41 = vrot.slane %v5674_v58, %v11275_v42  ;;  %v4130_v45 = vcombine.low %v4122_v32, %v4129_v61 }
 0x245   : > { %11326 = vst [vmem:[#allocation36_spill] sm:$0xff] %v9985_v3  ;;  %v3371_v2 = vrot.slane %v3349_v49, %v11272_v36  ;;  %v3378_v62 = vrot.slane %v3350_v47, %v11272_v36  ;;  %v2734_v18 = vrot.slane %v11327_v13, %v11220_v17  ;;  %v5278_v10 = vadd.f32 1.0, %v9754_v31  ;;  %v1398_v31 = vpop.xlane.xlu0 %1397 }
 0x246   : > { %7426 = vrcp.f32 %v5291_v30  ;;  %v3379_v57 = vcombine.low %v3357_v7, %v3364_v14  ;;  %v6225_v48 = vsel %vm4693_vm10, %v6224_v41, %v9936_v20  ;;  %4593 = vperm.xlu0 %6988, %v4130_v45   ;;  %v2738_v4 = vrot.slane %v11327_v13, %v11241_v12 }
 0x247   : > { %v2742_v50 = vrot.slane %v11327_v13, %v11245_v51  ;;  %v6230_v27 = vsel %vm4700_vm11, %v6229_v0, %v6225_v48  ;;  %v3380_v22 = vcombine.low %v3371_v2, %v3378_v62  ;;  %v2746_v32 = vrot.slane %v11327_v13, %v11247_v55 }
 0x248   : > { %v3387_v21 = vrot.slane %v3379_v57, %v11272_v36  ;;  %v2750_v20 = vrot.slane %v11327_v13, %v11248_v23  ;;  %v2754_v6 = vrot.slane %v11327_v13, %v11249_v15  ;;  %v2758_v56 = vrot.slane %v11327_v13, %v11250_v29 }
 0x249   : > { %v2762_v25 = vrot.slane %v11327_v13, %v11252_v26  ;;  %v10011_v38 = vpop.eup %7420  ;;  %v3394_v0 = vrot.slane %v3380_v22, %v11272_v36  ;;  %v4180_v58 = vcombine.low %v2734_v18, %v2738_v4  ;;  %v4181_v61 = vcombine.low %v2742_v50, %v2746_v32 }
 0x24a   : > { %11328 = vst [vmem:[#allocation41_spill] sm:$0xff] %v10011_v38  ;;  %v1627_v49 = vadd.f32 %v1407_v35, %v11161_v9  ;;  %v7423_v30 = vpop.eup %7422  ;;  %v11329_v47 = vrot.slane %v9589_v52, %v8819_v59  ;;  %7428 = vrcp.f32 %v5278_v10  ;;  %v4182_v14 = vcombine.low %v2750_v20, %v2754_v6  ;;  %v11330_v52 = vld [vmem:[#allocation63_spill] sm:$0xff]  ;;  %v1404_v20 = vpop.xlane.xlu0 %1403 }
 0x24b   : > { %v4183_v41 = vcombine.low %v2758_v56, %v2762_v25  ;;  %v1625_v45 = vadd.f32 %v1401_v44, %v11161_v9  ;;  %v3395_v2 = vcombine.low %v3387_v21, %v3394_v0  ;;  %v4190_v62 = vrot.slane %v4180_v58, %v11272_v36 }
 0x24c   : > { %v10020_v7 = vsel %vm4658_vm5, %v11329_v47, %v9619_v43  ;;  %v4197_v57 = vrot.slane %v4181_v61, %v11272_v36  ;;  %v4204_v13 = vrot.slane %v4182_v14, %v11272_v36  ;;  %v6813_v48 = vmul.f32 -1.442695, %v1627_v49 }
 0x24d   : > { %v4211_v18 = vrot.slane %v4183_v41, %v11272_v36  ;;  %v2446_v4 = vrot.slane %v11330_v52, %v11220_v17  ;;  %v5677_v43 = vadd.f32 %v7423_v30, %v11253_v1  ;;  %4548 = vperm.xlu1 %6989, %v3395_v2   ;;  %v2450_v44 = vrot.slane %v11330_v52, %v11241_v12  ;;  %v10034_v35 = vpop.eup %7424 }
 0x24e   : > { %v4212_v10 = vcombine.low %v4190_v62, %v4197_v57  ;;  %v2454_v50 = vrot.slane %v11330_v52, %v11245_v51  ;;  %11331 = vst [vmem:[#allocation42_spill] sm:$0xff] %v10034_v35  ;;  %7430 = vpow2.f32 %v6813_v48  ;;  %v2458_v21 = vrot.slane %v11330_v52, %v11247_v55 }
 0x24f   : > { %v4213_v22 = vcombine.low %v4204_v13, %v4211_v18  ;;  %v2462_v32 = vrot.slane %v11330_v52, %v11248_v23  ;;  %v2466_v25 = vrot.slane %v11330_v52, %v11249_v15  ;;  %v2470_v0 = vrot.slane %v11330_v52, %v11250_v29 }
 0x250   : > { %v7427_v6 = vpop.eup %7426  ;;  %v4220_v56 = vrot.slane %v4212_v10, %v11272_v36  ;;  %v2474_v58 = vrot.slane %v11330_v52, %v11252_v26  ;;  %v3739_v30 = vcombine.low %v2446_v4, %v2450_v44  ;;  %v3740_v47 = vcombine.low %v2454_v50, %v2458_v21  ;;  %v11333_v21 = vld [vmem:[#allocation81_spill] sm:$0xff] }
 0x251   : > { %v5676_v61 = vadd.f32 %v7427_v6, %v11253_v1  ;;  %v4227_v49 = vrot.slane %v4213_v22, %v11272_v36  ;;  %v6239_v14 = vrot.slane %v5677_v43, %v11278_v39  ;;  %v3741_v41 = vcombine.low %v2462_v32, %v2466_v25  ;;  %v1413_v25 = vpop.xlane.xlu1 %1412 }
 0x252   : > { %v3742_v2 = vcombine.low %v2470_v0, %v2474_v58  ;;  %v1626_v62 = vadd.f32 %v1404_v20, %v11161_v9  ;;  %v3749_v18 = vrot.slane %v3739_v30, %v11272_v36  ;;  %v3756_v48 = vrot.slane %v3740_v47, %v11272_v36 }
 0x253   : > { %v6234_v57 = vrot.slane %v5676_v61, %v11290_v37  ;;  %v4228_v13 = vcombine.low %v4220_v56, %v4227_v49  ;;  %v1624_v52 = vadd.f32 %v1398_v31, %v11161_v9  ;;  %v3763_v10 = vrot.slane %v3741_v41, %v11272_v36 }
 0x254   : > { %v3770_v4 = vrot.slane %v3742_v2, %v11272_v36  ;;  %v6812_v44 = vmul.f32 -1.442695, %v1626_v62  ;;  %v10057_v50 = vpop.eup %7428  ;;  %v3771_v22 = vcombine.low %v3749_v18, %v3756_v48  ;;  %v2766_v32 = vrot.slane %v11333_v21, %v11220_v17 }
 0x255   : > { %11332 = vst [vmem:[#allocation40_spill] sm:$0xff] %v10057_v50  ;;  %v6235_v43 = vsel %vm4707_vm12, %v6234_v57, %v6230_v27  ;;  %4599 = vperm.xlu0 %6988, %v4228_v13   ;;  %v2770_v20 = vrot.slane %v11333_v21, %v11241_v12  ;;  %v2774_v56 = vrot.slane %v11333_v21, %v11245_v51  ;;  %v6811_v2 = vmul.f32 -1.442695, %v1625_v45  ;;  %v11335_v45 = vld [vmem:[#allocation67_spill] sm:$0xff] }
 0x256   : > { %v10065_v6 = vsel %vm4714_vm13, %v6239_v14, %v6235_v43  ;;  %v3772_v31 = vcombine.low %v3763_v10, %v3770_v4  ;;  %7432 = vpow2.f32 %v6812_v44  ;;  %v3779_v0 = vrot.slane %v3771_v22, %v11272_v36 }
 0x257   : > { %11334 = vst [vmem:[#allocation18_spill] sm:$0xff] %v10065_v6  ;;  %v2778_v27 = vrot.slane %v11333_v21, %v11247_v55  ;;  %v2782_v58 = vrot.slane %v11333_v21, %v11248_v23  ;;  %v2786_v61 = vrot.slane %v11333_v21, %v11249_v15  ;;  %v2790_v30 = vrot.slane %v11333_v21, %v11250_v29 }
 0x258   : > { %v3786_v49 = vrot.slane %v3772_v31, %v11272_v36  ;;  %v2794_v47 = vrot.slane %v11333_v21, %v11252_v26  ;;  %v4229_v14 = vcombine.low %v2766_v32, %v2770_v20  ;;  %v7431_v41 = vpop.eup %7430  ;;  %v1629_v13 = vadd.f32 %v1413_v25, %v11161_v9 }
 0x259   : > { %v4230_v62 = vcombine.low %v2774_v56, %v2778_v27  ;;  %v4231_v57 = vcombine.low %v2782_v58, %v2786_v61  ;;  %v5296_v18 = vadd.f32 1.0, %v7431_v41  ;;  %v6810_v44 = vmul.f32 -1.442695, %v1624_v52 }
 0x25a   : > { %v3787_v48 = vcombine.low %v3779_v0, %v3786_v49  ;;  %v4232_v10 = vcombine.low %v2790_v30, %v2794_v47  ;;  %v4239_v4 = vrot.slane %v4229_v14, %v11272_v36  ;;  %v6815_v31 = vmul.f32 -1.442695, %v1629_v13  ;;  %v1410_v0 = vpop.xlane.xlu0 %1409 }
 0x25b   : > { %v4246_v43 = vrot.slane %v4230_v62, %v11272_v36  ;;  %v4253_v22 = vrot.slane %v4231_v57, %v11272_v36  ;;  %7434 = vrcp.f32 %v5296_v18  ;;  %v2510_v32 = vrot.slane %v11335_v45, %v11220_v17 }
 0x25c   : > { %4572 = vperm.xlu1 %6989, %v3787_v48   ;;  %v4260_v21 = vrot.slane %v4232_v10, %v11272_v36  ;;  %v2514_v20 = vrot.slane %v11335_v45, %v11241_v12  ;;  %7436 = vpow2.f32 %v6815_v31  ;;  %v2518_v52 = vrot.slane %v11335_v45, %v11245_v51 }
 0x25d   : > { %v4261_v56 = vcombine.low %v4239_v4, %v4246_v43  ;;  %v2522_v25 = vrot.slane %v11335_v45, %v11247_v55  ;;  %v2526_v58 = vrot.slane %v11335_v45, %v11248_v23  ;;  %v2530_v61 = vrot.slane %v11335_v45, %v11249_v15 }
 0x25e   : > { %v4262_v27 = vcombine.low %v4253_v22, %v4260_v21  ;;  %v2534_v49 = vrot.slane %v11335_v45, %v11250_v29  ;;  %7438 = vpow2.f32 %v6811_v2  ;;  %v2538_v47 = vrot.slane %v11335_v45, %v11252_v26  ;;  %v11336_v21 = vld [vmem:[#allocation11_spill] sm:$0xff] }
 0x25f   : > { %v4269_v30 = vrot.slane %v4261_v56, %v11272_v36  ;;  %v3837_v14 = vcombine.low %v2510_v32, %v2514_v20  ;;  %v3838_v57 = vcombine.low %v2518_v52, %v2522_v25  ;;  %v3839_v13 = vcombine.low %v2526_v58, %v2530_v61  ;;  %v11337_v20 = vld [vmem:[#allocation79_spill] sm:$0xff] }
 0x260   : > { %v7433_v41 = vpop.eup %7432  ;;  %v4276_v62 = vrot.slane %v4262_v27, %v11272_v36  ;;  %v1628_v18 = vadd.f32 %v1410_v0, %v11161_v9  ;;  %7440 = vpow2.f32 %v6810_v44  ;;  %v3840_v10 = vcombine.low %v2534_v49, %v2538_v47  ;;  %v1419_v49 = vpop.xlane.xlu1 %1418 }
 0x261   : > { %v5295_v48 = vadd.f32 1.0, %v7433_v41  ;;  %v3847_v4 = vrot.slane %v3837_v14, %v11272_v36  ;;  %v3854_v2 = vrot.slane %v3838_v57, %v11272_v36  ;;  %v3861_v22 = vrot.slane %v3839_v13, %v11272_v36 }
 0x262   : > { %v4277_v43 = vcombine.low %v4269_v30, %v4276_v62  ;;  %v6814_v31 = vmul.f32 -1.442695, %v1628_v18  ;;  %v10110_v45 = vadd.f32 %v11336_v21, %v11253_v1  ;;  %v3868_v32 = vrot.slane %v3840_v10, %v11272_v36 }
 0x263   : > { %7442 = vrcp.f32 %v5295_v48  ;;  %v2798_v44 = vrot.slane %v11337_v20, %v11220_v17  ;;  %v3869_v56 = vcombine.low %v3847_v4, %v3854_v2  ;;  %v2802_v52 = vrot.slane %v11337_v20, %v11241_v12 }
 0x264   : > { %4602 = vperm.xlu0 %6988, %v4277_v43   ;;  %7444 = vpow2.f32 %v6814_v31  ;;  %v2806_v25 = vrot.slane %v11337_v20, %v11245_v51  ;;  %v3870_v0 = vcombine.low %v3861_v22, %v3868_v32  ;;  %v2810_v27 = vrot.slane %v11337_v20, %v11247_v55 }
 0x265   : > { %v2814_v58 = vrot.slane %v11337_v20, %v11248_v23  ;;  %v2818_v61 = vrot.slane %v11337_v20, %v11249_v15  ;;  %v7435_v30 = vpop.eup %7434  ;;  %v3877_v47 = vrot.slane %v3869_v56, %v11272_v36  ;;  %v2822_v14 = vrot.slane %v11337_v20, %v11250_v29 }
 0x266   : > { %v2826_v41 = vrot.slane %v11337_v20, %v11252_v26  ;;  %v4278_v62 = vcombine.low %v2798_v44, %v2802_v52  ;;  %v7437_v57 = vpop.eup %7436  ;;  %v5681_v13 = vadd.f32 %v7435_v30, %v11253_v1  ;;  %v3884_v18 = vrot.slane %v3870_v0, %v11272_v36 }
 0x267   : > { %v4279_v48 = vcombine.low %v2806_v25, %v2810_v27  ;;  %v4280_v10 = vcombine.low %v2814_v58, %v2818_v61  ;;  %v5298_v4 = vadd.f32 1.0, %v7437_v57  ;;  %v1631_v22 = vadd.f32 %v1419_v49, %v11161_v9  ;;  %v11338_v25 = vld [vmem:[#allocation69_spill] sm:$0xff]  ;;  %v1416_v57 = vpop.xlane.xlu0 %1415 }
 0x268   : > { %v4281_v43 = vcombine.low %v2822_v14, %v2826_v41  ;;  %v4288_v2 = vrot.slane %v4278_v62, %v11272_v36  ;;  %v10134_v31 = vpop.eup %7438  ;;  %v6258_v21 = vrot.slane %v5681_v13, %v11256_v16  ;;  %v3885_v32 = vcombine.low %v3877_v47, %v3884_v18  ;;  %v1425_v47 = vpop.xlane.xlu1 %1424 }
 0x269   : > { %v4295_v20 = vrot.slane %v4279_v48, %v11272_v36  ;;  %v4302_v44 = vrot.slane %v4280_v10, %v11272_v36  ;;  %7446 = vrcp.f32 %v5298_v4  ;;  %v6817_v52 = vmul.f32 -1.442695, %v1631_v22 }
 0x26a   : > { %v4309_v56 = vrot.slane %v4281_v43, %v11272_v36  ;;  %v2574_v0 = vrot.slane %v11338_v25, %v11220_v17  ;;  %v10142_v27 = vpop.eup %7440  ;;  %4578 = vperm.xlu1 %6989, %v3885_v32   ;;  %v2578_v61 = vrot.slane %v11338_v25, %v11241_v12  ;;  %v2582_v49 = vrot.slane %v11338_v25, %v11245_v51 }
 0x26b   : > { %v4310_v58 = vcombine.low %v4288_v2, %v4295_v20  ;;  %v2586_v30 = vrot.slane %v11338_v25, %v11247_v55  ;;  %7448 = vpow2.f32 %v6817_v52  ;;  %v2590_v41 = vrot.slane %v11338_v25, %v11248_v23 }
 0x26c   : > { %v4311_v14 = vcombine.low %v4302_v44, %v4309_v56  ;;  %v2594_v62 = vrot.slane %v11338_v25, %v11249_v15  ;;  %v2598_v48 = vrot.slane %v11338_v25, %v11250_v29  ;;  %v2602_v10 = vrot.slane %v11338_v25, %v11252_v26 }
 0x26d   : > { %v7443_v13 = vpop.eup %7442  ;;  %v4318_v18 = vrot.slane %v4310_v58, %v11272_v36  ;;  %v3935_v4 = vcombine.low %v2574_v0, %v2578_v61  ;;  %v3936_v32 = vcombine.low %v2582_v49, %v2586_v30  ;;  %v1630_v58 = vadd.f32 %v1416_v57, %v11161_v9  ;;  %v11339_v49 = vld [vmem:[#allocation85_spill] sm:$0xff] }
 0x26e   : > { %v7445_v43 = vpop.eup %7444  ;;  %v5680_v2 = vadd.f32 %v7443_v13, %v11253_v1  ;;  %v4325_v22 = vrot.slane %v4311_v14, %v11272_v36  ;;  %v3937_v20 = vcombine.low %v2590_v41, %v2594_v62  ;;  %v3938_v56 = vcombine.low %v2598_v48, %v2602_v10  ;;  %v10169_v14 = vpop.xlane.xlu1 %1430 }
 0x26f   : > { %v5297_v44 = vadd.f32 1.0, %v7445_v43  ;;  %v3945_v52 = vrot.slane %v3935_v4, %v11272_v36  ;;  %v3952_v16 = vrot.slane %v3936_v32, %v11272_v36  ;;  %v6816_v61 = vmul.f32 -1.442695, %v1630_v58  ;;  %v11340_v58 = vld [vmem:[#allocation73_spill] sm:$0xff] }
 0x270   : > { %v6254_v6 = vrot.slane %v5680_v2, %v11257_v11  ;;  %v4326_v50 = vcombine.low %v4318_v18, %v4325_v22  ;;  %v3959_v25 = vrot.slane %v3937_v20, %v11272_v36  ;;  %v3966_v0 = vrot.slane %v3938_v56, %v11272_v36 }
 0x271   : > { %7450 = vrcp.f32 %v5297_v44  ;;  %v2830_v30 = vrot.slane %v11339_v49, %v11220_v17  ;;  %v3967_v62 = vcombine.low %v3945_v52, %v3952_v16  ;;  %v2834_v57 = vrot.slane %v11339_v49, %v11241_v12 }
 0x272   : > { %v10172_v41 = vsel %vm4630_vm1, %v6258_v21, %v6254_v6  ;;  %4605 = vperm.xlu0 %6988, %v4326_v50   ;;  %v2838_v13 = vrot.slane %v11339_v49, %v11245_v51  ;;  %v3968_v18 = vcombine.low %v3959_v25, %v3966_v0  ;;  %7452 = vpow2.f32 %v6816_v61  ;;  %v10196_v11 = vpop.xlane.xlu1 %1436 }
 0x273   : > { %v2842_v48 = vrot.slane %v11339_v49, %v11247_v55  ;;  %v2846_v10 = vrot.slane %v11339_v49, %v11248_v23  ;;  %v7447_v4 = vpop.eup %7446  ;;  %v3975_v6 = vrot.slane %v3967_v62, %v11272_v36  ;;  %v2850_v16 = vrot.slane %v11339_v49, %v11249_v15 }
 0x274   : > { %v2854_v50 = vrot.slane %v11339_v49, %v11250_v29  ;;  %v2858_v21 = vrot.slane %v11339_v49, %v11252_v26  ;;  %v5683_v43 = vadd.f32 %v7447_v4, %v11253_v1  ;;  %v3982_v2 = vrot.slane %v3968_v18, %v11272_v36 }
 0x275   : > { %v4327_v22 = vcombine.low %v2830_v30, %v2834_v57  ;;  %v4328_v32 = vcombine.low %v2838_v13, %v2842_v48  ;;  %v7449_v20 = vpop.eup %7448  ;;  %v4329_v44 = vcombine.low %v2846_v10, %v2850_v16  ;;  %v1633_v52 = vadd.f32 %v1425_v47, %v11161_v9 }
 0x276   : > { %v4330_v56 = vcombine.low %v2854_v50, %v2858_v21  ;;  %v2638_v25 = vrot.slane %v11340_v58, %v11220_v17  ;;  %v6268_v0 = vrot.slane %v5683_v43, %v11259_v19  ;;  %v5300_v61 = vadd.f32 1.0, %v7449_v20  ;;  %v1422_v50 = vpop.xlane.xlu0 %1421 }
 0x277   : > { %v3983_v62 = vcombine.low %v3975_v6, %v3982_v2  ;;  %v4337_v49 = vrot.slane %v4327_v22, %v11272_v36  ;;  %v4344_v18 = vrot.slane %v4328_v32, %v11272_v36  ;;  %v4351_v30 = vrot.slane %v4329_v44, %v11272_v36 }
 0x278   : > { %v4358_v57 = vrot.slane %v4330_v56, %v11272_v36  ;;  %v6819_v13 = vmul.f32 -1.442695, %v1633_v52  ;;  %7454 = vrcp.f32 %v5300_v61  ;;  %v2642_v47 = vrot.slane %v11340_v58, %v11241_v12 }
 0x279   : > { %4584 = vperm.xlu1 %6989, %v3983_v62   ;;  %v2646_v48 = vrot.slane %v11340_v58, %v11245_v51  ;;  %v2650_v10 = vrot.slane %v11340_v58, %v11247_v55  ;;  %v4359_v4 = vcombine.low %v4337_v49, %v4344_v18  ;;  %v2654_v16 = vrot.slane %v11340_v58, %v11248_v23 }
 0x27a   : > { %v4360_v6 = vcombine.low %v4351_v30, %v4358_v57  ;;  %7456 = vpow2.f32 %v6819_v13  ;;  %v2658_v43 = vrot.slane %v11340_v58, %v11249_v15  ;;  %v2662_v2 = vrot.slane %v11340_v58, %v11250_v29  ;;  %v10220_v57 = vpop.xlane.xlu1 %1442 }
 0x27b   : > { %v7451_v21 = vpop.eup %7450  ;;  %v2666_v22 = vrot.slane %v11340_v58, %v11252_v26  ;;  %v4033_v32 = vcombine.low %v2638_v25, %v2642_v47  ;;  %v4367_v44 = vrot.slane %v4359_v4, %v11272_v36  ;;  %v4034_v52 = vcombine.low %v2646_v48, %v2650_v10  ;;  %v11341_v10 = vld [vmem:[#allocation83_spill] sm:$0xff] }
 0x27c   : > { %v5682_v20 = vadd.f32 %v7451_v21, %v11253_v1  ;;  %v4374_v56 = vrot.slane %v4360_v6, %v11272_v36  ;;  %v7453_v61 = vpop.eup %7452  ;;  %v4035_v62 = vcombine.low %v2654_v16, %v2658_v43  ;;  %v1632_v30 = vadd.f32 %v1422_v50, %v11161_v9 }
 0x27d   : > { %v4036_v49 = vcombine.low %v2662_v2, %v2666_v22  ;;  %v4043_v18 = vrot.slane %v4033_v32, %v11272_v36  ;;  %v5299_v58 = vadd.f32 1.0, %v7453_v61  ;;  %v4050_v47 = vrot.slane %v4034_v52, %v11272_v36 }
 0x27e   : > { %v6263_v13 = vrot.slane %v5682_v20, %v8801_v46  ;;  %v4375_v25 = vcombine.low %v4367_v44, %v4374_v56  ;;  %v4057_v4 = vrot.slane %v4035_v62, %v11272_v36  ;;  %v6818_v48 = vmul.f32 -1.442695, %v1632_v30  ;;  %v10249_v30 = vpop.xlane.xlu1 %1448 }
 0x27f   : > { %v4064_v6 = vrot.slane %v4036_v49, %v11272_v36  ;;  %v2862_v16 = vrot.slane %v11341_v10, %v11220_v17  ;;  %7458 = vrcp.f32 %v5299_v58  ;;  %v4065_v50 = vcombine.low %v4043_v18, %v4050_v47  ;;  %v1428_v18 = vpop.xlane.xlu0 %1427 }
 0x280   : > { %v6264_v21 = vsel %vm4637_vm2, %v6263_v13, %v10172_v41  ;;  %4608 = vperm.xlu0 %6988, %v4375_v25   ;;  %v2866_v43 = vrot.slane %v11341_v10, %v11241_v12  ;;  %7460 = vpow2.f32 %v6818_v48  ;;  %v2870_v32 = vrot.slane %v11341_v10, %v11245_v51 }
 0x281   : > { %v10233_v2 = vsel %vm11118_vm3, %v6268_v0, %v6264_v21  ;;  %v4066_v22 = vcombine.low %v4057_v4, %v4064_v6  ;;  %v4073_v20 = vrot.slane %v4065_v50, %v11272_v36  ;;  %v2874_v44 = vrot.slane %v11341_v10, %v11247_v55 }
 0x282   : > { %v2878_v41 = vrot.slane %v11341_v10, %v11248_v23  ;;  %v2882_v56 = vrot.slane %v11341_v10, %v11249_v15  ;;  %v7455_v52 = vpop.eup %7454  ;;  %v2886_v61 = vrot.slane %v11341_v10, %v11250_v29  ;;  %v2890_v62 = vrot.slane %v11341_v10, %v11252_v26 }
 0x283   : > { %v4080_v0 = vrot.slane %v4066_v22, %v11272_v36  ;;  %v4376_v49 = vcombine.low %v2862_v16, %v2866_v43  ;;  %v5685_v58 = vadd.f32 %v7455_v52, %v11253_v1  ;;  %v4377_v25 = vcombine.low %v2870_v32, %v2874_v44  ;;  %v11342_v44 = vld [vmem:[#allocation77_spill] sm:$0xff] }
 0x284   : > { %v7457_v13 = vpop.eup %7456  ;;  %v4378_v47 = vcombine.low %v2878_v41, %v2882_v56  ;;  %v1635_v4 = vadd.f32 %v10169_v14, %v11161_v9  ;;  %v4379_v21 = vcombine.low %v2886_v61, %v2890_v62  ;;  %v2702_v41 = vrot.slane %v11342_v44, %v11220_v17 }
 0x285   : > { %v5302_v6 = vadd.f32 1.0, %v7457_v13  ;;  %v4081_v48 = vcombine.low %v4073_v20, %v4080_v0  ;;  %v4386_v50 = vrot.slane %v4376_v49, %v11272_v36  ;;  %v6278_v22 = vrot.slane %v5685_v58, %v8819_v59  ;;  %v10273_v13 = vpop.xlane.xlu0 %1433  ;;  %v10275_v58 = vpop.xlane.xlu1 %1454 }
 0x286   : > { %v4393_v10 = vrot.slane %v4377_v25, %v11272_v36  ;;  %v4400_v16 = vrot.slane %v4378_v47, %v11272_v36  ;;  %v6821_v43 = vmul.f32 -1.442695, %v1635_v4  ;;  %v4407_v32 = vrot.slane %v4379_v21, %v11272_v36 }
 0x287   : > { %7462 = vrcp.f32 %v5302_v6  ;;  %4590 = vperm.xlu1 %6989, %v4081_v48   ;;  %v2706_v14 = vrot.slane %v11342_v44, %v11241_v12  ;;  %v2710_v56 = vrot.slane %v11342_v44, %v11245_v51  ;;  %v2714_v52 = vrot.slane %v11342_v44, %v11247_v55 }
 0x288   : > { %v4408_v20 = vcombine.low %v4386_v50, %v4393_v10  ;;  %7464 = vpow2.f32 %v6821_v43  ;;  %v4409_v0 = vcombine.low %v4400_v16, %v4407_v32  ;;  %v2718_v61 = vrot.slane %v11342_v44, %v11248_v23 }
 0x289   : > { %v2722_v62 = vrot.slane %v11342_v44, %v11249_v15  ;;  %v2726_v49 = vrot.slane %v11342_v44, %v11250_v29  ;;  %v7459_v25 = vpop.eup %7458  ;;  %v2730_v4 = vrot.slane %v11342_v44, %v11252_v26  ;;  %v4131_v6 = vcombine.low %v2702_v41, %v2706_v14 }
 0x28a   : > { %v4416_v47 = vrot.slane %v4408_v20, %v11272_v36  ;;  %v4132_v48 = vcombine.low %v2710_v56, %v2714_v52  ;;  %v7461_v21 = vpop.eup %7460  ;;  %v5684_v50 = vadd.f32 %v7459_v25, %v11253_v1  ;;  %v4423_v10 = vrot.slane %v4409_v0, %v11272_v36  ;;  %v11343_v52 = vld [vmem:[#allocation29_spill] sm:$0xff]  ;;  %v10298_v25 = vpop.xlane.xlu1 %1460 }
 0x28b   : > { %v4133_v16 = vcombine.low %v2718_v61, %v2722_v62  ;;  %v1634_v43 = vadd.f32 %v1428_v18, %v11161_v9  ;;  %v5301_v32 = vadd.f32 1.0, %v7461_v21  ;;  %v4134_v59 = vcombine.low %v2726_v49, %v2730_v4  ;;  %v10296_v49 = vpop.xlane.xlu0 %1439 }
 0x28c   : > { %v4141_v19 = vrot.slane %v4131_v6, %v11272_v36  ;;  %v4148_v46 = vrot.slane %v4132_v48, %v11272_v36  ;;  %v6273_v20 = vrot.slane %v5684_v50, %v11260_v8  ;;  %v4424_v38 = vcombine.low %v4416_v47, %v4423_v10 }
 0x28d   : > { %v4155_v44 = vrot.slane %v4133_v16, %v11272_v36  ;;  %v6820_v41 = vmul.f32 -1.442695, %v1634_v43  ;;  %7466 = vrcp.f32 %v5301_v32  ;;  %v4162_v14 = vrot.slane %v4134_v59, %v11272_v36 }
 0x28e   : > { %v4163_v56 = vcombine.low %v4141_v19, %v4148_v46  ;;  %v2894_v0 = vrot.slane %v11343_v52, %v11220_v17  ;;  %v6274_v18 = vsel %vm11117_vm4, %v6273_v20, %v10233_v2  ;;  %4611 = vperm.xlu0 %6988, %v4424_v38   ;;  %v2898_v61 = vrot.slane %v11343_v52, %v11241_v12 }
 0x28f   : > { %7468 = vpow2.f32 %v6820_v41  ;;  %v2902_v62 = vrot.slane %v11343_v52, %v11245_v51  ;;  %v6279_v46 = vsel %vm4658_vm5, %v6278_v22, %v6274_v18  ;;  %v4164_v59 = vcombine.low %v4155_v44, %v4162_v14 }
 0x290   : > { %v4171_v19 = vrot.slane %v4163_v56, %v11272_v36  ;;  %v2906_v2 = vrot.slane %v11343_v52, %v11247_v55  ;;  %v2910_v47 = vrot.slane %v11343_v52, %v11248_v23  ;;  %v2914_v4 = vrot.slane %v11343_v52, %v11249_v15 }
 0x291   : > { %v7463_v38 = vpop.eup %7462  ;;  %v2918_v6 = vrot.slane %v11343_v52, %v11250_v29  ;;  %v2922_v48 = vrot.slane %v11343_v52, %v11252_v26  ;;  %v4178_v50 = vrot.slane %v4164_v59, %v11272_v36  ;;  %v4425_v10 = vcombine.low %v2894_v0, %v2898_v61  ;;  %v10326_v59 = vpop.xlane.xlu1 %1466 }
 0x292   : > { %v7465_v22 = vpop.eup %7464  ;;  %v10313_v21 = vadd.f32 %v7463_v38, %v11253_v1  ;;  %v4426_v16 = vcombine.low %v2902_v62, %v2906_v2  ;;  %v4427_v32 = vcombine.low %v2910_v47, %v2914_v4  ;;  %v1637_v44 = vadd.f32 %v10196_v11, %v11161_v9  ;;  %v10324_v62 = vpop.xlane.xlu0 %1445  ;;  %v11344_v2 = vld [vmem:[#allocation56_spill] sm:$0xff] }
 0x293   : > { %v5304_v43 = vadd.f32 1.0, %v7465_v22  ;;  %v4428_v20 = vcombine.low %v2918_v6, %v2922_v48  ;;  %v4179_v14 = vcombine.low %v4171_v19, %v4178_v50  ;;  %v4435_v56 = vrot.slane %v4425_v10, %v11272_v36 }
 0x294   : > { %v6288_v41 = vrot.slane %v10313_v21, %v11261_v5  ;;  %v4442_v52 = vrot.slane %v4426_v16, %v11272_v36  ;;  %v4449_v18 = vrot.slane %v4427_v32, %v11272_v36  ;;  %v6823_v61 = vmul.f32 -1.442695, %v1637_v44 }
 0x295   : > { %7470 = vrcp.f32 %v5304_v43  ;;  %v4456_v0 = vrot.slane %v4428_v20, %v11272_v36  ;;  %4596 = vperm.xlu1 %6989, %v4179_v14   ;;  %v2254_v38 = vrot.slane %v11344_v2, %v11220_v17  ;;  %v2258_v19 = vrot.slane %v11344_v2, %v11241_v12 }
 0x296   : > { %v4457_v11 = vcombine.low %v4435_v56, %v4442_v52  ;;  %v2262_v47 = vrot.slane %v11344_v2, %v11245_v51  ;;  %7472 = vpow2.f32 %v6823_v61  ;;  %v2266_v6 = vrot.slane %v11344_v2, %v11247_v55  ;;  %v10352_v35 = vpop.xlane.xlu0 %1451 }
 0x297   : > { %v4458_v4 = vcombine.low %v4449_v18, %v4456_v0  ;;  %v2270_v48 = vrot.slane %v11344_v2, %v11248_v23  ;;  %v7467_v22 = vpop.eup %7466  ;;  %v2274_v50 = vrot.slane %v11344_v2, %v11249_v15  ;;  %v2278_v10 = vrot.slane %v11344_v2, %v11250_v29 }
 0x298   : > { %v4465_v21 = vrot.slane %v4457_v11, %v11272_v36  ;;  %v2282_v16 = vrot.slane %v11344_v2, %v11252_v26  ;;  %v5686_v32 = vadd.f32 %v7467_v22, %v11253_v1  ;;  %v3445_v44 = vcombine.low %v2254_v38, %v2258_v19  ;;  %v10354_v22 = vpop.xlane.xlu1 %1472 }
 0x299   : > { %v7469_v43 = vpop.eup %7468  ;;  %v4472_v20 = vrot.slane %v4458_v4, %v11272_v36  ;;  %v3446_v14 = vcombine.low %v2262_v47, %v2266_v6  ;;  %v3447_v52 = vcombine.low %v2270_v48, %v2274_v50  ;;  %v1636_v0 = vadd.f32 %v10273_v13, %v11161_v9  ;;  %v11345_v6 = vld [vmem:[#allocation28_spill] sm:$0xff]  ;;  %v11346_v50 = vld [vmem:[#allocation13_spill] sm:$0xff] }
 0x29a   : > { %v5303_v56 = vadd.f32 1.0, %v7469_v43  ;;  %v3448_v18 = vcombine.low %v2278_v10, %v2282_v16  ;;  %v6283_v61 = vrot.slane %v5686_v32, %v11264_v33  ;;  %v3455_v8 = vrot.slane %v3445_v44, %v11272_v36 }
 0x29b   : > { %v4473_v11 = vcombine.low %v4465_v21, %v4472_v20  ;;  %v3462_v2 = vrot.slane %v3446_v14, %v11272_v36  ;;  %v3469_v38 = vrot.slane %v3447_v52, %v11272_v36  ;;  %v6822_v47 = vmul.f32 -1.442695, %v1636_v0 }
 0x29c   : > { %7474 = vrcp.f32 %v5303_v56  ;;  %v3476_v19 = vrot.slane %v3448_v18, %v11272_v36  ;;  %v6284_v4 = vsel %vm4665_vm6, %v6283_v61, %v6279_v46  ;;  %v2926_v48 = vrot.slane %v11345_v6, %v11220_v17 }
 0x29d   : > { %4614 = vperm.xlu0 %6988, %v4473_v11   ;;  %v3477_v13 = vcombine.low %v3455_v8, %v3462_v2  ;;  %v2930_v21 = vrot.slane %v11345_v6, %v11241_v12  ;;  %v10365_v10 = vadd.f32 %v11346_v50, %v11253_v1  ;;  %7476 = vpow2.f32 %v6822_v47  ;;  %v10386_v47 = vpop.xlane.xlu1 %1478 }
 0x29e   : > { %v3478_v16 = vcombine.low %v3469_v38, %v3476_v19  ;;  %v2934_v43 = vrot.slane %v11345_v6, %v11245_v51  ;;  %v2938_v8 = vrot.slane %v11345_v6, %v11247_v55  ;;  %v2942_v20 = vrot.slane %v11345_v6, %v11248_v23  ;;  %v10384_v19 = vpop.xlane.xlu0 %1457 }
 0x29f   : > { %11347 = vst [vmem:[#allocation34_spill] sm:$0xff] %v10365_v10  ;;  %v7471_v32 = vpop.eup %7470  ;;  %v3485_v46 = vrot.slane %v3477_v13, %v11272_v36  ;;  %v2946_v44 = vrot.slane %v11345_v6, %v11249_v15  ;;  %v6289_v14 = vsel %vm4672_vm7, %v6288_v41, %v6284_v4  ;;  %v2950_v52 = vrot.slane %v11345_v6, %v11250_v29 }
 0x2a0   : > { %v3492_v56 = vrot.slane %v3478_v16, %v11272_v36  ;;  %v2954_v18 = vrot.slane %v11345_v6, %v11252_v26  ;;  %v7473_v0 = vpop.eup %7472  ;;  %v4474_v61 = vcombine.low %v2926_v48, %v2930_v21  ;;  %v4475_v11 = vcombine.low %v2934_v43, %v2938_v8  ;;  %v11348_v43 = vld [vmem:[#allocation55_spill] sm:$0xff] }
 0x2a1   : > { %v4476_v2 = vcombine.low %v2942_v20, %v2946_v44  ;;  %v1639_v38 = vadd.f32 %v10220_v57, %v11161_v9  ;;  %v10389_v41 = vadd.f32 %v7471_v32, %v11253_v1  ;;  %v5306_v4 = vadd.f32 1.0, %v7473_v0 }
 0x2a2   : > { %v3493_v13 = vcombine.low %v3485_v46, %v3492_v56  ;;  %v4477_v50 = vcombine.low %v2950_v52, %v2954_v18  ;;  %v4484_v16 = vrot.slane %v4474_v61, %v11272_v36  ;;  %v4491_v6 = vrot.slane %v4475_v11, %v11272_v36 }
 0x2a3   : > { %v4498_v48 = vrot.slane %v4476_v2, %v11272_v36  ;;  %v6825_v21 = vmul.f32 -1.442695, %v1639_v38  ;;  %7478 = vrcp.f32 %v5306_v4  ;;  %v2286_v8 = vrot.slane %v11348_v43, %v11220_v17 }
 0x2a4   : > { %4554 = vperm.xlu1 %6989, %v3493_v13   ;;  %v4505_v57 = vrot.slane %v4477_v50, %v11272_v36  ;;  %v2290_v32 = vrot.slane %v11348_v43, %v11241_v12  ;;  %v4506_v20 = vcombine.low %v4484_v16, %v4491_v6  ;;  %v2294_v46 = vrot.slane %v11348_v43, %v11245_v51  ;;  %v10413_v13 = vpop.xlane.xlu0 %1463  ;;  %v10415_v50 = vpop.xlane.xlu1 %1484 }
 0x2a5   : > { %7480 = vpow2.f32 %v6825_v21  ;;  %v2298_v44 = vrot.slane %v11348_v43, %v11247_v55  ;;  %v2302_v18 = vrot.slane %v11348_v43, %v11248_v23  ;;  %v2306_v0 = vrot.slane %v11348_v43, %v11249_v15 }
 0x2a6   : > { %v7475_v56 = vpop.eup %7474  ;;  %v4507_v52 = vcombine.low %v4498_v48, %v4505_v57  ;;  %v2310_v61 = vrot.slane %v11348_v43, %v11250_v29  ;;  %v4514_v2 = vrot.slane %v4506_v20, %v11272_v36  ;;  %v2314_v38 = vrot.slane %v11348_v43, %v11252_v26 }
 0x2a7   : > { %v5688_v11 = vadd.f32 %v7475_v56, %v11253_v1  ;;  %v3494_v4 = vcombine.low %v2286_v8, %v2290_v32  ;;  %v7477_v16 = vpop.eup %7476  ;;  %v3495_v48 = vcombine.low %v2294_v46, %v2298_v44  ;;  %v3496_v21 = vcombine.low %v2302_v18, %v2306_v0  ;;  %v11349_v0 = vld [vmem:[#allocation58_spill] sm:$0xff] }
 0x2a8   : > { %v4521_v6 = vrot.slane %v4507_v52, %v11272_v36  ;;  %v1638_v57 = vadd.f32 %v10296_v49, %v11161_v9  ;;  %v5305_v24 = vadd.f32 1.0, %v7477_v16  ;;  %v3497_v20 = vcombine.low %v2310_v61, %v2314_v38 }
 0x2a9   : > { %v6293_v56 = vrot.slane %v5688_v11, %v11270_v40  ;;  %v3504_v3 = vrot.slane %v3494_v4, %v11272_v36  ;;  %v3511_v8 = vrot.slane %v3495_v48, %v11272_v36  ;;  %v3518_v32 = vrot.slane %v3496_v21, %v11272_v36  ;;  %v10438_v4 = vpop.xlane.xlu1 %1490 }
 0x2aa   : > { %v4522_v43 = vcombine.low %v4514_v2, %v4521_v6  ;;  %v6824_v54 = vmul.f32 -1.442695, %v1638_v57  ;;  %v6298_v52 = vrot.slane %v10389_v41, %v11269_v34  ;;  %7482 = vrcp.f32 %v5305_v24  ;;  %v10436_v41 = vpop.xlane.xlu0 %1469 }
 0x2ab   : > { %v3525_v46 = vrot.slane %v3497_v20, %v11272_v36  ;;  %v1641_v49 = vadd.f32 %v10249_v30, %v11161_v9  ;;  %v6294_v44 = vsel %vm4679_vm8, %v6293_v56, %v6289_v14  ;;  %v3526_v18 = vcombine.low %v3504_v3, %v3511_v8 }
 0x2ac   : > { %4617 = vperm.xlu0 %6988, %v4522_v43   ;;  %7484 = vpow2.f32 %v6824_v54  ;;  %v2318_v61 = vrot.slane %v11349_v0, %v11220_v17  ;;  %v2322_v38 = vrot.slane %v11349_v0, %v11241_v12  ;;  %v2326_v24 = vrot.slane %v11349_v0, %v11245_v51 }
 0x2ad   : > { %v3527_v11 = vcombine.low %v3518_v32, %v3525_v46  ;;  %v6827_v2 = vmul.f32 -1.442695, %v1641_v49  ;;  %v7479_v30 = vpop.eup %7478  ;;  %v3534_v14 = vrot.slane %v3526_v18, %v11272_v36  ;;  %v2330_v54 = vrot.slane %v11349_v0, %v11247_v55 }
 0x2ae   : > { %v2334_v3 = vrot.slane %v11349_v0, %v11248_v23  ;;  %v2338_v16 = vrot.slane %v11349_v0, %v11249_v15  ;;  %v10448_v48 = vadd.f32 1.0, %v10134_v31  ;;  %v6299_v21 = vsel %vm4686_vm9, %v6298_v52, %v6294_v44 }
 0x2af   : > { %v7481_v6 = vpop.eup %7480  ;;  %v3541_v57 = vrot.slane %v3527_v11, %v11272_v36  ;;  %v2342_v56 = vrot.slane %v11349_v0, %v11250_v29  ;;  %v2346_v43 = vrot.slane %v11349_v0, %v11252_v26  ;;  %v3543_v8 = vcombine.low %v2318_v61, %v2322_v38  ;;  %v11350_v61 = vld [vmem:[#allocation57_spill] sm:$0xff] }
 0x2b0   : > { %v5308_v20 = vadd.f32 1.0, %v7481_v6  ;;  %v3544_v32 = vcombine.low %v2326_v24, %v2330_v54  ;;  %v5691_v46 = vadd.f32 %v7479_v30, %v11253_v1  ;;  %v3545_v18 = vcombine.low %v2334_v3, %v2338_v16  ;;  %v10466_v24 = vpop.xlane.xlu0 %1475  ;;  %v10468_v30 = vpop.xlane.xlu1 %1496 }
 0x2b1   : > { %v3542_v49 = vcombine.low %v3534_v14, %v3541_v57  ;;  %v1640_v31 = vadd.f32 %v10324_v62, %v11161_v9  ;;  %7486 = vpow2.f32 %v6827_v2  ;;  %v3546_v52 = vcombine.low %v2342_v56, %v2346_v43 }
 0x2b2   : > { %v3553_v44 = vrot.slane %v3543_v8, %v11272_v36  ;;  %v3560_v11 = vrot.slane %v3544_v32, %v11272_v36  ;;  %7488 = vrcp.f32 %v5308_v20  ;;  %v3567_v6 = vrot.slane %v3545_v18, %v11272_v36 }
 0x2b3   : > { %4557 = vperm.xlu1 %6989, %v3542_v49   ;;  %v1643_v0 = vadd.f32 %v10275_v58, %v11161_v9  ;;  %v2350_v38 = vrot.slane %v11350_v61, %v11220_v17  ;;  %v3574_v62 = vrot.slane %v3546_v52, %v11272_v36  ;;  %v2354_v14 = vrot.slane %v11350_v61, %v11241_v12 }
 0x2b4   : > { %v3575_v2 = vcombine.low %v3553_v44, %v3560_v11  ;;  %v2358_v54 = vrot.slane %v11350_v61, %v11245_v51  ;;  %v7483_v3 = vpop.eup %7482  ;;  %v6308_v16 = vrot.slane %v5691_v46, %v11274_v60  ;;  %v6826_v58 = vmul.f32 -1.442695, %v1640_v31 }
 0x2b5   : > { %v2362_v57 = vrot.slane %v11350_v61, %v11247_v55  ;;  %v2366_v56 = vrot.slane %v11350_v61, %v11248_v23  ;;  %v5690_v43 = vadd.f32 %v7483_v3, %v11253_v1  ;;  %v3576_v8 = vcombine.low %v3567_v6, %v3574_v62 }
 0x2b6   : > { %v7485_v20 = vpop.eup %7484  ;;  %v3583_v32 = vrot.slane %v3575_v2, %v11272_v36  ;;  %v2370_v49 = vrot.slane %v11350_v61, %v11249_v15  ;;  %v6829_v52 = vmul.f32 -1.442695, %v1643_v0  ;;  %v2374_v46 = vrot.slane %v11350_v61, %v11250_v29  ;;  %v10494_v0 = vpop.xlane.xlu1 %1502 }
 0x2b7   : > { %v5307_v18 = vadd.f32 1.0, %v7485_v20  ;;  %v2378_v31 = vrot.slane %v11350_v61, %v11252_v26  ;;  %v6303_v44 = vrot.slane %v5690_v43, %v11275_v42  ;;  %v3590_v11 = vrot.slane %v3576_v8, %v11272_v36  ;;  %v10492_v20 = vpop.xlane.xlu0 %1481 }
 0x2b8   : > { %v3592_v60 = vcombine.low %v2350_v38, %v2354_v14  ;;  %v3593_v3 = vcombine.low %v2358_v54, %v2362_v57  ;;  %v3594_v6 = vcombine.low %v2366_v56, %v2370_v49  ;;  %v1642_v2 = vadd.f32 %v10352_v35, %v11161_v9 }
 0x2b9   : > { %7490 = vrcp.f32 %v5307_v18  ;;  %v3595_v62 = vcombine.low %v2374_v46, %v2378_v31  ;;  %v6304_v10 = vsel %vm4693_vm10, %v6303_v44, %v6299_v21  ;;  %v3591_v34 = vcombine.low %v3583_v32, %v3590_v11 }
 0x2ba   : > { %7492 = vpow2.f32 %v6826_v58  ;;  %v3602_v61 = vrot.slane %v3592_v60, %v11272_v36  ;;  %v10499_v43 = vsel %vm4700_vm11, %v6308_v16, %v6304_v10  ;;  %v3609_v38 = vrot.slane %v3593_v3, %v11272_v36  ;;  %v11351_v10 = vld [vmem:[#allocation60_spill] sm:$0xff]  ;;  %v10522_v31 = vpop.xlane.xlu1 %1508 }
 0x2bb   : > { %v3616_v14 = vrot.slane %v3594_v6, %v11272_v36  ;;  %v3623_v54 = vrot.slane %v3595_v62, %v11272_v36  ;;  %v7487_v35 = vpop.eup %7486  ;;  %v5293_v57 = vadd.f32 1.0, %v10142_v27  ;;  %4560 = vperm.xlu1 %6989, %v3591_v34   ;;  %7494 = vpow2.f32 %v6829_v52  ;;  %v10520_v46 = vpop.xlane.xlu0 %1487 }
 0x2bc   : > { %v6828_v56 = vmul.f32 -1.442695, %v1642_v2  ;;  %v1645_v21 = vadd.f32 %v10298_v25, %v11161_v9  ;;  %v7489_v58 = vpop.eup %7488  ;;  %v3624_v60 = vcombine.low %v3602_v61, %v3609_v38  ;;  %v2382_v16 = vrot.slane %v11351_v10, %v11220_v17 }
 0x2bd   : > { %v3625_v8 = vcombine.low %v3616_v14, %v3623_v54  ;;  %v2386_v32 = vrot.slane %v11351_v10, %v11241_v12  ;;  %v2390_v27 = vrot.slane %v11351_v10, %v11245_v51  ;;  %v2394_v34 = vrot.slane %v11351_v10, %v11247_v55 }
 0x2be   : > { %7496 = vpow2.f32 %v6828_v56  ;;  %v6831_v49 = vmul.f32 -1.442695, %v1645_v21  ;;  %v3632_v25 = vrot.slane %v3624_v60, %v11272_v36  ;;  %v2398_v52 = vrot.slane %v11351_v10, %v11248_v23 }
 0x2bf   : > { %7498 = vrcp.f32 %v10448_v48  ;;  %v3639_v18 = vrot.slane %v3625_v8, %v11272_v36  ;;  %v5693_v44 = vadd.f32 %v7489_v58, %v11253_v1  ;;  %v2402_v11 = vrot.slane %v11351_v10, %v11249_v15 }
 0x2c0   : > { %7500 = vrcp.f32 %v5293_v57  ;;  %v2406_v48 = vrot.slane %v11351_v10, %v11250_v29  ;;  %v2410_v6 = vrot.slane %v11351_v10, %v11252_v26  ;;  %v3641_v62 = vcombine.low %v2382_v16, %v2386_v32 }
 0x2c1   : > { %v3640_v3 = vcombine.low %v3632_v25, %v3639_v18  ;;  %v3642_v2 = vcombine.low %v2390_v27, %v2394_v34  ;;  %v5310_v61 = vadd.f32 1.0, %v7487_v35  ;;  %7502 = vpow2.f32 %v6831_v49  ;;  %v11352_v27 = vld [vmem:[#allocation59_spill] sm:$0xff]  ;;  %v10543_v25 = vpop.xlane.xlu0 %1493  ;;  %v10545_v18 = vpop.xlane.xlu1 %1514 }
 0x2c2   : > { %v3643_v38 = vcombine.low %v2398_v52, %v2402_v11  ;;  %v1644_v14 = vadd.f32 %v10384_v19, %v11161_v9  ;;  %v3644_v57 = vcombine.low %v2406_v48, %v2410_v6  ;;  %v3651_v56 = vrot.slane %v3641_v62, %v11272_v36 }
 0x2c3   : > { %v7491_v54 = vpop.eup %7490  ;;  %4563 = vperm.xlu1 %6989, %v3640_v3   ;;  %v3658_v21 = vrot.slane %v3642_v2, %v11272_v36  ;;  %v1647_v58 = vadd.f32 %v10326_v59, %v11161_v9  ;;  %v6318_v8 = vrot.slane %v5693_v44, %v11278_v39  ;;  %v2414_v34 = vrot.slane %v11352_v27, %v11220_v17 }
 0x2c4   : > { %v7493_v60 = vpop.eup %7492  ;;  %v5692_v35 = vadd.f32 %v7491_v54, %v11253_v1  ;;  %v3665_v10 = vrot.slane %v3643_v38, %v11272_v36  ;;  %v6830_v16 = vmul.f32 -1.442695, %v1644_v14  ;;  %v3672_v19 = vrot.slane %v3644_v57, %v11272_v36 }
 0x2c5   : > { %v3673_v32 = vcombine.low %v3651_v56, %v3658_v21  ;;  %v6833_v49 = vmul.f32 -1.442695, %v1647_v58  ;;  %v7495_v59 = vpop.eup %7494  ;;  %v2418_v44 = vrot.slane %v11352_v27, %v11241_v12  ;;  %v2422_v11 = vrot.slane %v11352_v27, %v11245_v51 }
 0x2c6   : > { %v6313_v52 = vrot.slane %v5692_v35, %v11290_v37  ;;  %7504 = vpow2.f32 %v6830_v16  ;;  %v5309_v48 = vadd.f32 1.0, %v7493_v60  ;;  %v3674_v3 = vcombine.low %v3665_v10, %v3672_v19  ;;  %v10573_v60 = vpop.xlane.xlu0 %1499 }
 0x2c7   : > { %v3681_v6 = vrot.slane %v3673_v32, %v11272_v36  ;;  %7506 = vpow2.f32 %v6833_v49  ;;  %v2426_v2 = vrot.slane %v11352_v27, %v11247_v55  ;;  %v2430_v38 = vrot.slane %v11352_v27, %v11248_v23 }
 0x2c8   : > { %v7497_v17 = vpop.eup %7496  ;;  %v6314_v62 = vsel %vm4707_vm12, %v6313_v52, %v10499_v43  ;;  %v2434_v12 = vrot.slane %v11352_v27, %v11249_v15  ;;  %7508 = vrcp.f32 %v5310_v61  ;;  %v5312_v54 = vadd.f32 1.0, %v7495_v59 }
 0x2c9   : > { %v10561_v14 = vpop.eup %7498  ;;  %v10564_v51 = vsel %vm4714_vm13, %v6318_v8, %v6314_v62  ;;  %v3688_v57 = vrot.slane %v3674_v3, %v11272_v36  ;;  %v2438_v55 = vrot.slane %v11352_v27, %v11250_v29  ;;  %v2442_v23 = vrot.slane %v11352_v27, %v11252_v26  ;;  %v10575_v8 = vpop.xlane.xlu1 %1520 }
 0x2ca   : > { %v10567_v56 = vpop.eup %7500  ;;  %v3690_v43 = vcombine.low %v2414_v34, %v2418_v44  ;;  %v3691_v21 = vcombine.low %v2422_v11, %v2426_v2  ;;  %7510 = vrcp.f32 %v5309_v48  ;;  %v5311_v15 = vadd.f32 1.0, %v7497_v17  ;;  %v10596_v2 = vpop.xlane.xlu0 %1505 }
 0x2cb   : > { %v3689_v58 = vcombine.low %v3681_v6, %v3688_v57  ;;  %v3692_v61 = vcombine.low %v2430_v38, %v2434_v12  ;;  %v7503_v35 = vpop.eup %7502  ;;  %v3693_v10 = vcombine.low %v2438_v55, %v2442_v23  ;;  %v1646_v29 = vadd.f32 %v10413_v13, %v11161_v9 }
 0x2cc   : > { %v3700_v16 = vrot.slane %v3690_v43, %v11272_v36  ;;  %v3707_v19 = vrot.slane %v3691_v21, %v11272_v36  ;;  %v6046_v26 = vrot.slane %v10110_v45, %v11264_v33  ;;  %7512 = vrcp.f32 %v5312_v54 }
 0x2cd   : > { %4566 = vperm.xlu1 %6989, %v3689_v58   ;;  %v3714_v32 = vrot.slane %v3692_v61, %v11272_v36  ;;  %v1649_v49 = vadd.f32 %v10354_v22, %v11161_v9  ;;  %v3721_v27 = vrot.slane %v3693_v10, %v11272_v36  ;;  %v6832_v59 = vmul.f32 -1.442695, %v1646_v29  ;;  %v10598_v38 = vpop.xlane.xlu1 %1526 }
 0x2ce   : > { %v3722_v34 = vcombine.low %v3700_v16, %v3707_v19  ;;  %v1648_v52 = vadd.f32 %v10436_v41, %v11161_v9  ;;  %7514 = vrcp.f32 %v5311_v15  ;;  %v5314_v44 = vadd.f32 1.0, %v7503_v35  ;;  %v10622_v16 = vpop.xlane.xlu0 %1511 }
 0x2cf   : > { %v6835_v13 = vmul.f32 -1.442695, %v1649_v49  ;;  %v1651_v45 = vadd.f32 %v10386_v47, %v11161_v9  ;;  %v3723_v48 = vcombine.low %v3714_v32, %v3721_v27  ;;  %7516 = vpow2.f32 %v6832_v59  ;;  %v11355_v59 = vld [vmem:[#allocation34_spill] sm:$0xff] }
 0x2d0   : > { %v7505_v11 = vpop.eup %7504  ;;  %v3730_v3 = vrot.slane %v3722_v34, %v11272_v36  ;;  %v6834_v6 = vmul.f32 -1.442695, %v1648_v52  ;;  %v6047_v17 = vsel %vm4665_vm6, %v6046_v26, %v10020_v7  ;;  %v5640_v62 = vadd.f32 %v9573_v63, %v11253_v1  ;;  %v11354_v34 = vld [vmem:[#allocation39_spill] sm:$0xff] }
 0x2d1   : > { %v7507_v22 = vpop.eup %7506  ;;  %v5313_v41 = vadd.f32 1.0, %v7505_v11  ;;  %7518 = vpow2.f32 %v6835_v13  ;;  %v3737_v12 = vrot.slane %v3723_v48, %v11272_v36  ;;  %v6837_v54 = vmul.f32 -1.442695, %v1651_v45  ;;  %v10624_v19 = vpop.xlane.xlu1 %1532  ;;  %v11356_v13 = vld [vmem:[#allocation35_spill] sm:$0xff] }
 0x2d2   : > { %v5316_v47 = vadd.f32 1.0, %v7507_v22  ;;  %7520 = vpow2.f32 %v6834_v6  ;;  %v10601_v57 = vpop.eup %7508  ;;  %v1650_v7 = vadd.f32 %v10466_v24, %v11161_v9  ;;  %v1653_v63 = vadd.f32 %v10415_v50, %v11161_v9 }
 0x2d3   : > { %7522 = vrcp.f32 %v5314_v44  ;;  %v1652_v55 = vadd.f32 %v10492_v20, %v11161_v9  ;;  %v3738_v23 = vcombine.low %v3730_v3, %v3737_v12  ;;  %v1655_v43 = vadd.f32 %v10438_v4, %v11161_v9 }
 0x2d4   : > { %7524 = vrcp.f32 %v5313_v41  ;;  %v1654_v21 = vadd.f32 %v10520_v46, %v11161_v9  ;;  %v10613_v15 = vpop.eup %7510  ;;  %v6836_v58 = vmul.f32 -1.442695, %v1650_v7  ;;  %v6839_v61 = vmul.f32 -1.442695, %v1653_v63  ;;  %v11358_v41 = vld [vmem:[#allocation37_spill] sm:$0xff]  ;;  %v10650_v7 = vpop.xlane.xlu0 %1517 }
 0x2d5   : > { %7526 = vpow2.f32 %v6837_v54  ;;  %v6838_v24 = vmul.f32 -1.442695, %v1652_v55  ;;  %v6056_v35 = vrot.slane %v5640_v62, %v11270_v40  ;;  %4569 = vperm.xlu1 %6989, %v3738_v23   ;;  %v6841_v50 = vmul.f32 -1.442695, %v1655_v43  ;;  %v10652_v63 = vpop.xlane.xlu1 %1538  ;;  %v11359_v55 = vld [vmem:[#allocation43_spill] sm:$0xff] }
 0x2d6   : > { %7528 = vrcp.f32 %v5316_v47  ;;  %v1657_v20 = vadd.f32 %v10468_v30, %v11161_v9  ;;  %v10618_v10 = vpop.eup %7512  ;;  %v5642_v4 = vadd.f32 %v9585_v28, %v11253_v1  ;;  %v6840_v46 = vmul.f32 -1.442695, %v1654_v21 }
 0x2d7   : > { %7530 = vpow2.f32 %v6836_v58  ;;  %v1656_v26 = vadd.f32 %v10543_v25, %v11161_v9  ;;  %v11353_v30 = vrot.slane %v9606_v53, %v11261_v5  ;;  %v1659_v28 = vadd.f32 %v10494_v0, %v11161_v9  ;;  %v11357_v0 = vld [vmem:[#allocation36_spill] sm:$0xff] }
 0x2d8   : > { %7532 = vpow2.f32 %v6839_v61  ;;  %v6843_v29 = vmul.f32 -1.442695, %v1657_v20  ;;  %v10628_v32 = vpop.eup %7514  ;;  %v6061_v52 = vrot.slane %v11355_v59, %v11354_v34  ;;  %v5643_v25 = vadd.f32 %v11356_v13, %v11253_v1  ;;  %v11361_v59 = vld [vmem:[#allocation41_spill] sm:$0xff] }
 0x2d9   : > { %v6052_v49 = vsel %vm4672_vm7, %v11353_v30, %v6047_v17  ;;  %7534 = vpow2.f32 %v6838_v24  ;;  %v7517_v27 = vpop.eup %7516  ;;  %v6066_v11 = vrot.slane %v5642_v4, %v11275_v42  ;;  %v1658_v48 = vadd.f32 %v10573_v60, %v11161_v9 }
 0x2da   : > { %v6057_v44 = vsel %vm4679_vm8, %v6056_v35, %v6052_v49  ;;  %7536 = vpow2.f32 %v6841_v50  ;;  %v5315_v53 = vadd.f32 1.0, %v7517_v27  ;;  %v5644_v6 = vadd.f32 %v11357_v0, %v11253_v1  ;;  %v11362_v0 = vld [vmem:[#allocation24_spill] sm:$0xff] }
 0x2db   : > { %v7519_v45 = vpop.eup %7518  ;;  %7538 = vpow2.f32 %v6840_v46  ;;  %v6842_v17 = vmul.f32 -1.442695, %v1656_v26  ;;  %v5645_v47 = vadd.f32 %v11358_v41, %v11253_v1  ;;  %v6845_v54 = vmul.f32 -1.442695, %v1659_v28  ;;  %v11360_v46 = vld [vmem:[#allocation42_spill] sm:$0xff] }
 0x2dc   : > { %v7521_v3 = vpop.eup %7520  ;;  %v5318_v22 = vadd.f32 1.0, %v7519_v45  ;;  %7540 = vpow2.f32 %v6843_v29  ;;  %v6071_v23 = vrot.slane %v5643_v25, %v11359_v55  ;;  %v6062_v43 = vsel %vm4686_vm9, %v6061_v52, %v6057_v44  ;;  %v1524_v25 = vpop.xlane.xlu0 %1523 }
 0x2dd   : > { %v10646_v62 = vpop.eup %7522  ;;  %7542 = vrcp.f32 %v5315_v53  ;;  %v5317_v12 = vadd.f32 1.0, %v7521_v3  ;;  %v6067_v58 = vsel %vm4693_vm10, %v6066_v11, %v6062_v43  ;;  %v6844_v61 = vmul.f32 -1.442695, %v1658_v48  ;;  %v10672_v45 = vpop.xlane.xlu1 %1544 }
 0x2de   : > { %v7525_v60 = vpop.eup %7524  ;;  %7544 = vrcp.f32 %v5318_v22  ;;  %v6076_v35 = vrot.slane %v5644_v6, %v11290_v37  ;;  %v6081_v4 = vrot.slane %v5645_v47, %v11278_v39  ;;  %v5646_v29 = vadd.f32 %v11360_v46, %v11253_v1 }
 0x2df   : > { %v7527_v21 = vpop.eup %7526  ;;  %7546 = vrcp.f32 %v5317_v12  ;;  %v6072_v30 = vsel %vm4700_vm11, %v6071_v23, %v6067_v58  ;;  %v1661_v28 = vadd.f32 %v10522_v31, %v11161_v9  ;;  %v10668_v52 = vadd.f32 %v11361_v59, %v11253_v1  ;;  %v11363_v58 = vld [vmem:[#allocation23_spill] sm:$0xff] }
 0x2e0   : > { %v10657_v24 = vpop.eup %7528  ;;  %v5320_v50 = vadd.f32 1.0, %v7527_v21  ;;  %7548 = vpow2.f32 %v6842_v17  ;;  %v1660_v13 = vadd.f32 %v10596_v2, %v11161_v9  ;;  %v6077_v53 = vsel %vm4707_vm12, %v6076_v35, %v6072_v30  ;;  %v11364_v30 = vld [vmem:[#allocation9_spill] sm:$0xff] }
 0x2e1   : > { %v7531_v20 = vpop.eup %7530  ;;  %7550 = vpow2.f32 %v6845_v54  ;;  %v1663_v31 = vadd.f32 %v10545_v18, %v11161_v9  ;;  %v6086_v6 = vrot.slane %v5646_v29, %v11362_v0  ;;  %v5697_v22 = vadd.f32 %v10618_v10, %v11253_v1  ;;  %v10695_v29 = vpop.permute.xlu1 %4527 }
 0x2e2   : > { %v7533_v26 = vpop.eup %7532  ;;  %7552 = vrcp.f32 %v5320_v50  ;;  %v5319_v49 = vadd.f32 1.0, %v7531_v20  ;;  %v5696_v41 = vadd.f32 %v10628_v32, %v11253_v1  ;;  %v6847_v12 = vmul.f32 -1.442695, %v1661_v28  ;;  %v11365_v28 = vld [vmem:[#allocation12_spill] sm:$0xff] }
 0x2e3   : > { %v7535_v27 = vpop.eup %7534  ;;  %v5322_v44 = vadd.f32 1.0, %v7533_v26  ;;  %7554 = vpow2.f32 %v6844_v61  ;;  %v6846_v43 = vmul.f32 -1.442695, %v1660_v13  ;;  %v1662_v18 = vadd.f32 %v10622_v16, %v11161_v9  ;;  %v1530_v16 = vpop.xlane.xlu0 %1529 }
 0x2e4   : > { %v7537_v11 = vpop.eup %7536  ;;  %7556 = vrcp.f32 %v5319_v49  ;;  %v5321_v48 = vadd.f32 1.0, %v7535_v27  ;;  %v6091_v10 = vrot.slane %v10668_v52, %v11363_v58  ;;  %v6082_v61 = vsel %vm4714_vm13, %v6081_v4, %v6077_v53 }
 0x2e5   : > { %v7539_v3 = vpop.eup %7538  ;;  %7558 = vrcp.f32 %v5322_v44  ;;  %v5324_v17 = vadd.f32 1.0, %v7537_v11  ;;  %v6849_v35 = vmul.f32 -1.442695, %v1663_v31  ;;  %v10690_v50 = vsel %vm4721_vm14, %v6086_v6, %v6082_v61 }
 0x2e6   : > { %v7541_v2 = vpop.eup %7540  ;;  %7560 = vrcp.f32 %v5321_v48  ;;  %v5323_v47 = vadd.f32 1.0, %v7539_v3  ;;  %v5698_v20 = vadd.f32 %v7525_v60, %v11253_v1  ;;  %v1665_v46 = vadd.f32 %v10575_v8, %v11161_v9  ;;  %v11366_v3 = vld [vmem:[#allocation14_spill] sm:$0xff] }
 0x2e7   : > { %v7543_v54 = vpop.eup %7542  ;;  %7562 = vrcp.f32 %v5324_v17  ;;  %v5326_v23 = vadd.f32 1.0, %v7541_v2  ;;  %v6337_v49 = vrot.slane %v5697_v22, %v11364_v30  ;;  %v6333_v4 = vrot.slane %v5696_v41, %v11365_v28 }
 0x2e8   : > { %v10684_v21 = vpop.eup %7544  ;;  %7564 = vrcp.f32 %v5323_v47  ;;  %v1664_v27 = vadd.f32 %v10650_v7, %v11161_v9  ;;  %v6848_v60 = vmul.f32 -1.442695, %v1662_v18  ;;  %v1667_v13 = vadd.f32 %v10598_v38, %v11161_v9 }
 0x2e9   : > { %v7547_v32 = vpop.eup %7546  ;;  %7566 = vrcp.f32 %v5326_v23  ;;  %v5699_v11 = vadd.f32 %v10646_v62, %v11253_v1  ;;  %v1666_v48 = vadd.f32 %v1524_v25, %v11161_v9  ;;  %v6342_v6 = vrot.slane %v5698_v20, %v11366_v3  ;;  %v1536_v23 = vpop.xlane.xlu0 %1535 }
 0x2ea   : > { %v7549_v26 = vpop.eup %7548  ;;  %7568 = vpow2.f32 %v6847_v12  ;;  %v6851_v7 = vmul.f32 -1.442695, %v1665_v46  ;;  %v1669_v22 = vadd.f32 %v10624_v19, %v11161_v9  ;;  %v6850_v2 = vmul.f32 -1.442695, %v1664_v27  ;;  %v11367_v19 = vld [vmem:[#allocation10_spill] sm:$0xff] }
 0x2eb   : > { %v7551_v59 = vpop.eup %7550  ;;  %v5325_v44 = vadd.f32 1.0, %v7549_v26  ;;  %7570 = vpow2.f32 %v6846_v43  ;;  %v1668_v41 = vadd.f32 %v1530_v16, %v11161_v9  ;;  %v6338_v62 = vsel %vm4630_vm1, %v6337_v49, %v6333_v4  ;;  %v10716_v43 = vpop.permute.xlu1 %4530  ;;  %v11368_v4 = vld [vmem:[#allocation40_spill] sm:$0xff] }
 0x2ec   : > { %v10703_v8 = vpop.eup %7552  ;;  %v5328_v53 = vadd.f32 1.0, %v7551_v59  ;;  %7572 = vpow2.f32 %v6849_v35  ;;  %v5700_v25 = vadd.f32 %v7543_v54, %v11253_v1  ;;  %v6853_v12 = vmul.f32 -1.442695, %v1667_v13  ;;  %v11369_v13 = vld [vmem:[#allocation16_spill] sm:$0xff] }
 0x2ed   : > { %v7555_v31 = vpop.eup %7554  ;;  %7574 = vrcp.f32 %v5325_v44  ;;  %v6347_v61 = vrot.slane %v5699_v11, %v11367_v19  ;;  %v5701_v35 = vadd.f32 %v10657_v24, %v11253_v1  ;;  %v6852_v20 = vmul.f32 -1.442695, %v1666_v48 }
 0x2ee   : > { %v7557_v17 = vpop.eup %7556  ;;  %7576 = vrcp.f32 %v5328_v53  ;;  %v5327_v38 = vadd.f32 1.0, %v7555_v31  ;;  %v6343_v16 = vsel %vm4637_vm2, %v6342_v6, %v6338_v62  ;;  %v6855_v54 = vmul.f32 -1.442695, %v1669_v22  ;;  %v11370_v31 = vld [vmem:[#allocation15_spill] sm:$0xff] }
 0x2ef   : > { %v10712_v47 = vpop.eup %7558  ;;  %7578 = vpow2.f32 %v6848_v60  ;;  %v1671_v26 = vadd.f32 %v10652_v63, %v11161_v9  ;;  %v10732_v27 = vadd.f32 %v11368_v4, %v11253_v1  ;;  %v6854_v59 = vmul.f32 -1.442695, %v1668_v41  ;;  %v10751_v41 = vpop.permute.xlu1 %4533 }
 0x2f0   : > { %v10718_v18 = vpop.eup %7560  ;;  %7580 = vrcp.f32 %v5327_v38  ;;  %v1670_v24 = vadd.f32 %v1536_v23, %v11161_v9  ;;  %v10739_v60 = vadd.f32 %v10561_v14, %v11253_v1  ;;  %v6352_v11 = vrot.slane %v5700_v25, %v11369_v13 }
 0x2f1   : > { %v10723_v46 = vpop.eup %7562  ;;  %7582 = vpow2.f32 %v6851_v7  ;;  %v5702_v63 = vadd.f32 %v7547_v32, %v11253_v1  ;;  %v10745_v48 = vadd.f32 %v10567_v56, %v11253_v1  ;;  %v6357_v6 = vrot.slane %v5701_v35, %v11370_v31 }
 0x2f2   : > { %v10728_v49 = vpop.eup %7564  ;;  %7584 = vpow2.f32 %v6850_v2  ;;  %v6348_v7 = vsel %vm11118_vm3, %v6347_v61, %v6343_v16  ;;  %v6857_v14 = vmul.f32 -1.442695, %v1671_v26  ;;  %v1673_v2 = vadd.f32 %v10672_v45, %v11161_v9 }
 0x2f3   : > { %v10735_v44 = vpop.eup %7566  ;;  %7586 = vpow2.f32 %v6853_v12  ;;  %v5703_v62 = vadd.f32 %v10684_v21, %v11253_v1  ;;  %v6856_v25 = vmul.f32 -1.442695, %v1670_v24  ;;  %v1542_v12 = vpop.xlane.xlu0 %1541  ;;  %v6353_v61 = vsel %vm11117_vm4, %v6352_v11, %v6348_v7 }
 0x2f4   : > { %v7569_v53 = vpop.eup %7568  ;;  %7588 = vpow2.f32 %v6852_v20  ;;  %v6362_v35 = vrot.slane %v5702_v63, %v11264_v33  ;;  %v10764_v45 = vsel %vm4728_vm15, %v6091_v10, %v10690_v50  ;;  %v6170_v21 = vrot.slane %v10732_v27, %v11363_v58 }
 0x2f5   : > { %v7571_v22 = vpop.eup %7570  ;;  %v5330_v38 = vadd.f32 1.0, %v7569_v53  ;;  %7590 = vpow2.f32 %v6855_v54  ;;  %v5704_v54 = vadd.f32 %v7557_v17, %v11253_v1  ;;  %v6249_v4 = vrot.slane %v10739_v60, %v11363_v58  ;;  %v11373_v60 = vld [vmem:[#allocation31_spill] sm:$0xff] }
 0x2f6   : > { %v7573_v32 = vpop.eup %7572  ;;  %v5329_v56 = vadd.f32 1.0, %v7571_v22  ;;  %7592 = vpow2.f32 %v6854_v59  ;;  %v6859_v59 = vmul.f32 -1.442695, %v1673_v2  ;;  %v1672_v24 = vadd.f32 %v1542_v12, %v11161_v9  ;;  %v10779_v22 = vpop.permute.xlu1 %4536 }
 0x2f7   : > { %v10755_v23 = vpop.eup %7574  ;;  %7594 = vrcp.f32 %v5330_v38  ;;  %v5332_v20 = vadd.f32 1.0, %v7573_v32  ;;  %v6358_v52 = vsel %vm4658_vm5, %v6357_v6, %v6353_v61  ;;  %v5705_v10 = vadd.f32 %v10703_v8, %v11253_v1 }
 0x2f8   : > { %v7577_v16 = vpop.eup %7576  ;;  %7596 = vrcp.f32 %v5329_v56  ;;  %v6244_v17 = vrot.slane %v10745_v48, %v11362_v0  ;;  %v6367_v53 = vrot.slane %v5703_v62, %v11261_v5  ;;  %v6363_v7 = vsel %vm4665_vm6, %v6362_v35, %v6358_v52 }
 0x2f9   : > { %v7579_v26 = vpop.eup %7578  ;;  %7598 = vrcp.f32 %v5332_v20  ;;  %v6372_v38 = vrot.slane %v5704_v54, %v11270_v40  ;;  %v5706_v6 = vadd.f32 %v10718_v18, %v11253_v1  ;;  %v5713_v2 = vadd.f32 %v7577_v16, %v11253_v1 }
 0x2fa   : > { %v7581_v11 = vpop.eup %7580  ;;  %v5331_v50 = vadd.f32 1.0, %v7579_v26  ;;  %7600 = vpow2.f32 %v6857_v14  ;;  %v6858_v61 = vmul.f32 -1.442695, %v1672_v24  ;;  %v6368_v20 = vsel %vm4672_vm7, %v6367_v53, %v6363_v7 }
 0x2fb   : > { %v7583_v63 = vpop.eup %7582  ;;  %7602 = vpow2.f32 %v6856_v25  ;;  %v5712_v32 = vadd.f32 %v7581_v11, %v11253_v1  ;;  %v6377_v25 = vrot.slane %v5705_v10, %v11354_v34  ;;  %v5707_v18 = vadd.f32 %v10712_v47, %v11253_v1 }
 0x2fc   : > { %v7585_v9 = vpop.eup %7584  ;;  %7604 = vrcp.f32 %v5331_v50  ;;  %v5334_v8 = vadd.f32 1.0, %v7583_v63  ;;  %v6373_v16 = vsel %vm4679_vm8, %v6372_v38, %v6368_v20  ;;  %v6382_v11 = vrot.slane %v5706_v6, %v11275_v42  ;;  %v10796_v63 = vpop.permute.xlu1 %4539 }
 0x2fd   : > { %v7587_v14 = vpop.eup %7586  ;;  %v5333_v56 = vadd.f32 1.0, %v7585_v9  ;;  %7606 = vpow2.f32 %v6859_v59  ;;  %v5708_v59 = vadd.f32 %v10728_v49, %v11253_v1  ;;  %v6416_v24 = vrot.slane %v5713_v2, %v11364_v30 }
 0x2fe   : > { %v7589_v62 = vpop.eup %7588  ;;  %7608 = vrcp.f32 %v5334_v8  ;;  %v5336_v12 = vadd.f32 1.0, %v7587_v14  ;;  %v6412_v10 = vrot.slane %v5712_v32, %v11365_v28  ;;  %v10800_v53 = vadd.f32 %v10601_v57, %v11253_v1 }
 0x2ff   : > { %v7591_v35 = vpop.eup %7590  ;;  %7610 = vrcp.f32 %v5333_v56  ;;  %v5335_v54 = vadd.f32 1.0, %v7589_v62  ;;  %v5694_v7 = vadd.f32 %v10613_v15, %v11253_v1  ;;  %v6387_v6 = vrot.slane %v5707_v18, %v11359_v55 }
 0x300   : > { %v7593_v26 = vpop.eup %7592  ;;  %7612 = vrcp.f32 %v5336_v12  ;;  %v5338_v9 = vadd.f32 1.0, %v7591_v35  ;;  %v6378_v8 = vsel %vm4686_vm9, %v6377_v25, %v6373_v16  ;;  %v5709_v57 = vadd.f32 %v10723_v46, %v11253_v1 }
 0x301   : > { %v7595_v52 = vpop.eup %7594  ;;  %7614 = vrcp.f32 %v5335_v54  ;;  %v5337_v50 = vadd.f32 1.0, %v7593_v26  ;;  %v6383_v32 = vsel %vm4693_vm10, %v6382_v11, %v6378_v8  ;;  %v6392_v56 = vrot.slane %v5708_v59, %v11290_v37  ;;  %v10823_v59 = vpop.permute.xlu1 %4542 }
 0x302   : > { %v7597_v47 = vpop.eup %7596  ;;  %v5715_v49 = vadd.f32 %v7595_v52, %v11253_v1  ;;  %v5710_v62 = vadd.f32 %v10755_v23, %v11253_v1  ;;  %v6417_v12 = vsel %vm4630_vm1, %v6416_v24, %v6412_v10  ;;  %v6323_v16 = vrot.slane %v5694_v7, %v11362_v0 }
 0x303   : > { %v7599_v38 = vpop.eup %7598  ;;  %v5714_v14 = vadd.f32 %v7597_v47, %v11253_v1  ;;  %7616 = vrcp.f32 %v5337_v50  ;;  %v6397_v24 = vrot.slane %v5709_v57, %v11278_v39  ;;  %v6388_v10 = vsel %vm4700_vm11, %v6387_v6, %v6383_v32  ;;  %v11371_v32 = vld [vmem:[#allocation18_spill] sm:$0xff] }
 0x304   : > { %v7601_v2 = vpop.eup %7600  ;;  %7618 = vpow2.f32 %v6858_v61  ;;  %v5717_v35 = vadd.f32 %v7599_v38, %v11253_v1  ;;  %v6426_v18 = vrot.slane %v5715_v49, %v11367_v19  ;;  %v5711_v61 = vadd.f32 %v10735_v44, %v11253_v1 }
 0x305   : > { %v7603_v15 = vpop.eup %7602  ;;  %v6421_v25 = vrot.slane %v5714_v14, %v11366_v3  ;;  %7620 = vrcp.f32 %v5338_v9  ;;  %v5340_v54 = vadd.f32 1.0, %v7601_v2  ;;  %v6393_v49 = vsel %vm4707_vm12, %v6392_v56, %v6388_v10 }
 0x306   : > { %v7605_v20 = vpop.eup %7604  ;;  %v5339_v26 = vadd.f32 1.0, %v7603_v15  ;;  %v6402_v7 = vrot.slane %v5710_v62, %v11362_v0  ;;  %v6436_v44 = vrot.slane %v5717_v35, %v11370_v31  ;;  %v6245_v57 = vsel %vm4721_vm14, %v6244_v17, %v11371_v32 }
 0x307   : > { %v7607_v46 = vpop.eup %7606  ;;  %v6422_v23 = vsel %vm4637_vm2, %v6421_v25, %v6417_v12  ;;  %v5716_v11 = vadd.f32 %v7605_v20, %v11253_v1  ;;  %v6328_v56 = vrot.slane %v10800_v53, %v11363_v58  ;;  %v6407_v15 = vrot.slane %v5711_v61, %v11363_v58  ;;  %v10843_v12 = vpop.permute.xlu0 %4524 }
 0x308   : > { %v7609_v52 = vpop.eup %7608  ;;  %7622 = vrcp.f32 %v5339_v26  ;;  %v5342_v50 = vadd.f32 1.0, %v7607_v46  ;;  %v6427_v8 = vsel %vm11118_vm3, %v6426_v18, %v6422_v23  ;;  %v6398_v25 = vsel %vm4714_vm13, %v6397_v24, %v6393_v49  ;;  %v11372_v18 = vld [vmem:[#allocation38_spill] sm:$0xff]  ;;  %v10856_v26 = vpop.permute.xlu1 %4545  ;;  %v11374_v49 = vld [vmem:[#allocation32_spill] sm:$0xff] }
 0x309   : > { %v7611_v47 = vpop.eup %7610  ;;  %v6431_v9 = vrot.slane %v5716_v11, %v11369_v13  ;;  %v5719_v14 = vadd.f32 %v7609_v52, %v11253_v1  ;;  %7624 = vrcp.f32 %v5340_v54  ;;  %v6171_v17 = vsel %vm4728_vm15, %v6170_v21, %v11372_v18 }
 0x30a   : > { %v7613_v38 = vpop.eup %7612  ;;  %v5718_v2 = vadd.f32 %v7611_v47, %v11253_v1  ;;  %7626 = vrcp.f32 %v5342_v50  ;;  %v6324_v53 = vsel %vm4721_vm14, %v6323_v16, %v10564_v51  ;;  %v6403_v54 = vsel %vm4721_vm14, %v6402_v7, %v6398_v25 }
 0x30b   : > { %v7615_v6 = vpop.eup %7614  ;;  %v6432_v62 = vsel %vm11117_vm4, %v6431_v9, %v6427_v8  ;;  %v6446_v61 = vrot.slane %v5719_v14, %v11261_v5  ;;  %v5721_v11 = vadd.f32 %v7613_v38, %v11253_v1  ;;  %v6250_v27 = vsel %vm4728_vm15, %v6249_v4, %v6245_v57  ;;  %v10871_v47 = vpop.permute.xlu0 %4551 }
 0x30c   : > { %v6441_v35 = vrot.slane %v5718_v2, %v11264_v33  ;;  %v5720_v20 = vadd.f32 %v7615_v6, %v11253_v1  ;;  %v6437_v23 = vsel %vm4658_vm5, %v6436_v44, %v6432_v62  ;;  %vm6490_vm4 = vcmask 1043459   ;;  %v10881_v6 = vpop.permute.xlu1 %4548 }
 0x30d   : > { %v7617_v48 = vpop.eup %7616  ;;  %vm6492_vm3 = vcmask 1044484   ;;  %v6329_v10 = vsel %vm4728_vm15, %v6328_v56, %v6324_v53  ;;  %v6408_v50 = vsel %vm4728_vm15, %v6407_v15, %v6403_v54  ;;  %v6489_v4 = vsel %vm6488_vm0, %v10764_v45, %v11373_v60 }
 0x30e   : > { %v7619_v46 = vpop.eup %7618  ;;  %v6442_v51 = vsel %vm4665_vm6, %v6441_v35, %v6437_v23  ;;  %v6451_v52 = vrot.slane %v5720_v20, %v11270_v40  ;;  %v5722_v24 = vadd.f32 %v7617_v48, %v11253_v1  ;;  %v6494_v7 = vsel %vm6488_vm0, %v6171_v17, %v11374_v49 }
 0x30f   : > { %v5341_v21 = vadd.f32 1.0, %v7619_v46  ;;  %v7621_v16 = vpop.eup %7620  ;;  %v6491_v9 = vsel %vm6490_vm4, %v6250_v27, %v6489_v4  ;;  %v6495_v38 = vsel %vm6490_vm4, %v6329_v10, %v6494_v7  ;;  %v6456_v8 = vrot.slane %v5721_v11, %v11354_v34  ;;  %v4576_v48 = vpop.permute.xlu0 %4575 }
 0x310   : > { %v6447_v14 = vsel %vm4672_vm7, %v6446_v61, %v6442_v51  ;;  %v5723_v2 = vadd.f32 %v7621_v16, %v11253_v1  ;;  %v6493_v32 = vsel %vm6492_vm3, %v6408_v50, %v6491_v9  ;;  %v6461_v45 = vrot.slane %v5722_v24, %v11275_v42  ;;  %v4573_v54 = vpop.permute.xlu1 %4572 }
 0x311   : > { %7628 = vrcp.f32 %v5341_v21  ;;  %v6452_v56 = vsel %vm4679_vm8, %v6451_v52, %v6447_v14  ;;  %6499 = vst [vmem:[%s10887_s11] sm:$0x1e] %v6493_v32  ;;  %vm11376_vm4 = vcmask 326912  }
 0x312   : > { %v7623_v44 = vpop.eup %7622  ;;  %v6466_v25 = vrot.slane %v5723_v2, %v11359_v55  ;;  %v6457_v35 = vsel %vm4686_vm9, %v6456_v8, %v6452_v56  ;;  %v4733_v8 = vrot.slane %v4573_v54, %v11365_v28  ;;  %v4737_v2 = vrot.slane %v4576_v48, %v11364_v30  ;;  %vm11378_vm0 = vmmov %vm11376_vm4 }
 0x313   : > { %v7625_v57 = vpop.eup %7624  ;;  %v5724_v15 = vadd.f32 %v7623_v44, %v11253_v1  ;;  %v6462_v18 = vsel %vm4693_vm10, %v6461_v45, %v6457_v35  ;;  %v4582_v21 = vpop.permute.xlu0 %4581 }
 0x314   : > { %v7627_v62 = vpop.eup %7626  ;;  %v5725_v20 = vadd.f32 %v7625_v57, %v11253_v1  ;;  %v6467_v23 = vsel %vm4700_vm11, %v6466_v25, %v6462_v18  ;;  %v4579_v24 = vpop.permute.xlu1 %4578  ;;  %v4738_v57 = vsel %vm4630_vm1, %v4737_v2, %v4733_v8 }
 0x315   : > { %v6471_v17 = vrot.slane %v5724_v15, %v11290_v37  ;;  %v5727_v53 = vadd.f32 %v7627_v62, %v11253_v1  ;;  %v4742_v14 = vrot.slane %v4579_v24, %v11366_v3  ;;  %v4747_v15 = vrot.slane %v4582_v21, %v11367_v19 }
 0x316   : > { %v6476_v61 = vrot.slane %v5725_v20, %v11278_v39  ;;  %v4629_v21 = vrot.slane %v10695_v29, %v11364_v30  ;;  %v4657_v29 = vrot.slane %v10796_v63, %v11370_v31 }
 0x317   : > { %v6472_v11 = vsel %vm4707_vm12, %v6471_v17, %v6467_v23  ;;  %v6486_v51 = vrot.slane %v5727_v53, %v11363_v58  ;;  %v4588_v4 = vpop.permute.xlu0 %4587  ;;  %v4743_v56 = vsel %vm4637_vm2, %v4742_v14, %v4738_v57  ;;  %v4624_v23 = vrot.slane %v10843_v12, %v11365_v28 }
 0x318   : > { %v6477_v52 = vsel %vm4714_vm13, %v6476_v61, %v6472_v11  ;;  %v4585_v49 = vpop.permute.xlu1 %4584  ;;  %v4757_v18 = vrot.slane %v4588_v4, %v11370_v31  ;;  %v4650_v12 = vrot.slane %v10779_v22, %v11369_v13  ;;  %v4678_v31 = vrot.slane %v10881_v6, %v11270_v40 }
 0x319   : > { %v4631_v24 = vsel %vm4630_vm1, %v4629_v21, %v4624_v23 }
 0x31b   : > { %v7629_v46 = vpop.eup %7628  ;;  %v4594_v7 = vpop.permute.xlu0 %4593 }
 0x31c   : > { %v5726_v27 = vadd.f32 %v7629_v46, %v11253_v1  ;;  %v4591_v44 = vpop.permute.xlu1 %4590  ;;  %v4767_v46 = vrot.slane %v4594_v7, %v11261_v5 }
 0x31d   : > { %v4762_v20 = vrot.slane %v4591_v44, %v11264_v33 }
 0x31e   : > { %v6481_v16 = vrot.slane %v5726_v27, %v11362_v0 }
 0x31f   : > { %v4600_v1 = vpop.permute.xlu0 %4599 }
 0x320   : > { %v6482_v10 = vsel %vm4721_vm14, %v6481_v16, %v6477_v52  ;;  %v4597_v9 = vpop.permute.xlu1 %4596  ;;  %v4777_v16 = vrot.slane %v4600_v1, %v11354_v34  ;;  %v4636_v52 = vrot.slane %v10716_v43, %v11366_v3  ;;  %v4664_v3 = vrot.slane %v10823_v59, %v11264_v33 }
 0x321   : > { %v6487_v50 = vsel %vm4728_vm15, %v6486_v51, %v6482_v10  ;;  %v4772_v54 = vrot.slane %v4597_v9, %v11270_v40  ;;  %v4643_v10 = vrot.slane %v10751_v41, %v11367_v19  ;;  %v4671_v41 = vrot.slane %v10856_v26, %v11261_v5 }
 0x322   : > { %v6496_v60 = vsel %vm6492_vm3, %v6487_v50, %v6495_v38  ;;  %v4752_v38 = vrot.slane %v4585_v49, %v11369_v13  ;;  %vm11375_vm3 = vcmask 261312   ;;  %v4638_v30 = vsel %vm4637_vm2, %v4636_v52, %v4631_v24 }
 0x323   : > { %6500 = vst [vmem:[%s10887_s11 + $0x8] sm:$0x1e] %v6496_v60  ;;  %v4603_v32 = vpop.permute.xlu0 %4602  ;;  %v4748_v62 = vsel %vm11375_vm3, %v4747_v15, %v4743_v56  ;;  %vm11377_vm1 = vmmov %vm11375_vm3  ;;  %v4685_v40 = vrot.slane %v10871_v47, %v11354_v34 }
 0x324   : > { %v4555_v45 = vpop.permute.xlu1 %4554  ;;  %v4753_v35 = vsel %vm11376_vm4, %v4752_v38, %v4748_v62  ;;  %v4782_v50 = vrot.slane %v4603_v32, %v11275_v42  ;;  %v4645_v19 = vsel %vm11377_vm1, %v4643_v10, %v4638_v30 }
 0x325   : > { %v4758_v17 = vsel %vm4658_vm5, %v4757_v18, %v4753_v35  ;;  %v4652_v22 = vsel %vm11378_vm0, %v4650_v12, %v4645_v19  ;;  %v4692_v1 = vrot.slane %v4555_v45, %v11275_v42 }
 0x326   : > { %v4763_v53 = vsel %vm4665_vm6, %v4762_v20, %v4758_v17  ;;  %v4659_v63 = vsel %vm4658_vm5, %v4657_v29, %v4652_v22 }
 0x327   : > { %v4606_v25 = vpop.permute.xlu0 %4605  ;;  %v4768_v11 = vsel %vm4672_vm7, %v4767_v46, %v4763_v53  ;;  %v4666_v33 = vsel %vm4665_vm6, %v4664_v3, %v4659_v63 }
 0x328   : > { %v4773_v27 = vsel %vm4679_vm8, %v4772_v54, %v4768_v11  ;;  %v4787_v13 = vrot.slane %v4606_v25, %v11359_v55  ;;  %v4673_v44 = vsel %vm4672_vm7, %v4671_v41, %v4666_v33 }
 0x329   : > { %v4778_v28 = vsel %vm4686_vm9, %v4777_v16, %v4773_v27  ;;  %v4680_v5 = vsel %vm4679_vm8, %v4678_v31, %v4673_v44 }
 0x32a   : > { %v4783_v43 = vsel %vm4693_vm10, %v4782_v50, %v4778_v28  ;;  %v4687_v32 = vsel %vm4686_vm9, %v4685_v40, %v4680_v5 }
 0x32b   : > { %v4609_v61 = vpop.permute.xlu0 %4608  ;;  %v4788_v49 = vsel %vm4700_vm11, %v4787_v13, %v4783_v43  ;;  %v4694_v42 = vsel %vm4693_vm10, %v4692_v1, %v4687_v32 }
 0x32c   : > { %v4792_v59 = vrot.slane %v4609_v61, %v11290_v37 }
 0x32e   : > { %v4793_v26 = vsel %vm4707_vm12, %v4792_v59, %v4788_v49 }
 0x32f   : > { %v4612_v60 = vpop.permute.xlu0 %4611 }
 0x330   : > { %v4797_v6 = vrot.slane %v4612_v60, %v11278_v39 }
 0x332   : > { %v4558_v48 = vpop.permute.xlu1 %4557  ;;  %v4798_v2 = vsel %vm4714_vm13, %v4797_v6, %v4793_v26 }
 0x333   : > { %v4615_v7 = vpop.permute.xlu0 %4614  ;;  %v4699_v8 = vrot.slane %v4558_v48, %v11359_v55  ;;  %v11379_v48 = vlaneseq }
 0x334   : > { %v4802_v56 = vrot.slane %v4615_v7, %v11362_v0 }
 0x335   : > { %v4701_v47 = vsel %vm4700_vm11, %v4699_v8, %v4694_v42  ;;  %vm4827_vm2 = vcmp.lt.s32.totalorder %v11379_v48, 256 }
 0x336   : > { %v4803_v55 = vsel %vm4721_vm14, %v4802_v56, %v4798_v2 }
 0x337   : > { %v4618_v38 = vpop.permute.xlu0 %4617 }
 0x338   : > { %v4807_v15 = vrot.slane %v4618_v38, %v11363_v58 }
 0x33a   : > { %v4561_v51 = vpop.permute.xlu1 %4560  ;;  %v4808_v35 = vsel %vm4728_vm15, %v4807_v15, %v4803_v55 }
 0x33b   : > { %v4706_v14 = vrot.slane %v4561_v51, %v11290_v37 }
 0x33d   : > { %v4708_v37 = vsel %vm4707_vm12, %v4706_v14, %v4701_v47 }
 0x342   : > { %v4564_v4 = vpop.permute.xlu1 %4563 }
 0x343   : > { %v4713_v57 = vrot.slane %v4564_v4, %v11278_v39 }
 0x345   : > { %v4715_v39 = vsel %vm4714_vm13, %v4713_v57, %v4708_v37 }
 0x34c   : > { %v4567_v9 = vpop.permute.xlu1 %4566 }
 0x34d   : > { %v4720_v34 = vrot.slane %v4567_v9, %v11362_v0 }
 0x34f   : > { %v4722_v25 = vsel %vm4721_vm14, %v4720_v34, %v4715_v39 }
 0x354   : > { %v4570_v45 = vpop.permute.xlu1 %4569 }
 0x355   : > { %v4727_v62 = vrot.slane %v4570_v45, %v11363_v58 }
 0x357   : > { %v4729_v0 = vsel %vm4728_vm15, %v4727_v62, %v4722_v25 }
 0x358   : > { %v4809_v20 = vcombine.low %v4729_v0, %v4808_v35  ;;  %6508 = sbr.rel (!%p11380_p11) target bundleno = 890 (0x37a), region = 96 }
 0x35a   : > { %v4816_v18 = vrot.slane %v4809_v20, %v11272_v36 }
 0x35c   : > { %v4823_v17 = vrot.slane %v4816_v18, %v11272_v36 }
 0x35e   : > { %4829 = vst.msk [vmem:[%s10887_s11] ss:$8 sm:$0x3] %vm4827_vm2, %v4823_v17 }
 0x35f   : > { %s11395_s7 = smov (!%p6511_p12, %s6510_s7), 2 }
 0x360   : > { %s10987_s8 = sshll.u32 %s11395_s7, 7 }
 0x361   : > { %s6515_s28 = ssub.s32 256, %s10987_s8 }
 0x362   : > { %6516 = vsyncadd %s6502_s20, %s6515_s28  ;;  %p6863_p8 = scmp.ne.s32.totalorder %s10987_s8, 0  ;;  %s6872_s26 = sshll.u32 %s7859_s19, 8 }
 0x363   : > { %s10997_s12 = scalar_lea.hbm %s11044_s4, %s6872_s26  ;;  %s6522_s13 = sshll.u32 %s10887_s11, 4  ;;  %s6523_s13 = int_to_ptr.vmem [resolvable:$true] %s6522_s13 }
 0x364   : > { %s7677_s14 = scalar_lea.vmem %s6523_s13, %s10987_s8  ;;  %s7812_s22 = smov [#allocation6]  }
 0x365   : > { %p7678_p9 = scmp.ne.s32.totalorder %s6523_s13, %s7677_s14  ;;  %s7681_s6 = sshll.u32 %s7812_s22, 4  ;;  %s7682_s6 = int_to_ptr.vmem [resolvable:$false] %s7681_s6 }
 0x366   : > { %s7683_s29 = scalar_lea.vmem %s7682_s6, 512  ;;  %p7684_p10 = scmp.lt.s32.totalorder %s6523_s13, %s7682_s6 }
 0x367   : > { %p7679_p13 = pnand %p7678_p9, %p6863_p8  ;;  %p7685_p0 = scmp.lt.s32.totalorder %s7683_s29, %s7677_s14 }
 0x369   : > { %p7680_p5 = pneg %p7679_p13  ;;  %p7686_p1 = por %p7685_p0, %p7684_p10 }
 0x36b   : > { %p7687_p2 = pnand %p7686_p1, %p7680_p5 }
 0x36d   : > { %7690 = shalt.err (!%p7687_p2)
}
 0x36e   : > { %s7691_s19 = scalar_lea.hbm %s10997_s12, %s10987_s8  ;;  %s7695_s11 = scalar_lea.hbm %s11044_s4, 384 }
 0x36f   : > { %p7692_p3 = scmp.ne.s32.totalorder %s10997_s12, %s7691_s19  ;;  %p7696_p11 = scmp.lt.u32.totalorder %s10997_s12, %s11044_s4 }
 0x370   : > { %p7697_p12 = scmp.lt.u32.totalorder %s7695_s11, %s7691_s19  ;;  %p7699_p13 = scmp.lt.u32.totalorder %s7691_s19, %s10997_s12 }
 0x371   : > { %p7693_p4 = pnand %p7692_p3, %p6863_p8 }
 0x372   : > { %p7698_p9 = por %p7697_p12, %p7696_p11 }
 0x373   : > { %p7694_p7 = pneg %p7693_p4 }
 0x374   : > { %p7700_p5 = por %p7699_p13, %p7698_p9 }
 0x376   : > { %p7701_p10 = pnand %p7700_p5, %p7694_p7 }
 0x378   : > { %7704 = shalt.err (!%p7701_p10)
}
 0x379   : > { %6525 = dma.vmem_to_hbm [thread:$0]  (%p6863_p8), %s6523_s13, %s10987_s8, %s10997_s12, %s6502_s20  }
 0x37a PF: > { %s6534_s28 = sand.u32 1, %s7763_s15   ;;  %p11381_p0 = scmp.ne.s32.totalorder %s11121_s27, 0 }
 0x37b   : > { %s6535_s26 = scalar_lea.sflag [#allocation4], %s6534_s28 }
 0x37c   : > { %p6883_p1 = pnand %p6674_p6, %p11381_p0 }
 0x37e   : > { %7758 = dma.done.wait (!%p6883_p1), %s6535_s26, 256  }
 0x37f   : > { %7760 = vsyncadd (!%p6883_p1), %s6535_s26, 4294967040  ;;  %p15_p2 = scmp.ge.s32.totalorder %s7863_s21, 4   ;;  %s11382_s15 = smov %s7767_s16 }
 0x380   : > { %s11383_s16 = smov %s7771_s17  ;;  %s11384_s17 = smov %s7875_s24 }
 0x381   : > { %s11385_s18 = smov %s7863_s21  ;;  %17 = sbr.rel (!%p15_p2) target bundleno = 4 (0x4), region = 169 }
 0x388   :  { %6540 = vsyncpa [#allocation4], 1 }
 0x389   :  { %6542 = vsyncpa [#allocation4 + $0x1], 1 }
 0x38a   :  { %6543 = vsyncpa [#allocation5], 1 }
 0x38b   :  { %6545 = vsyncpa [#allocation5 + $0x1], 1 }

</bundles_post_ra>
